<compile_context>
chip_gen: v5e
topology: v5e:2x2
jax: 0.10.0
libtpu: 0.0.40
codegen_flags: <defaults>
</compile_context>

<pallas_src>
import math
import functools

import jax
import jax.numpy as jnp
from jax.experimental import pallas as pl
from jax.experimental.pallas import tpu as pltpu

# ---- tiny BERT config -------------------------------------------------------
VOCAB = 100          # logical vocab size (ids drawn < VOCAB)
VOCAB_PAD = 128      # word table padded to 128 rows
TYPE_VOCAB = 2
TYPE_PAD = 8
MAX_POS = 16
H = 32               # hidden size
NHEADS = 2
DH = H // NHEADS     # head dim
INTER = 64           # FFN intermediate size
LAYERS = 2
EPS = 1e-12          # BERT layer_norm_eps

B, C, S = 2, 4, 8    # batch, num_choices, seq_len
N = B * C            # flattened sequences
TOK = N * S          # total tokens (64)
TOK2 = NHEADS * TOK  # head-stacked rows (128)

assert (S & (S - 1)) == 0 and (C & (C - 1)) == 0
LOG2_S = S.bit_length() - 1
LOG2_C = C.bit_length() - 1
NEG = -1e30          # finite additive mask value (avoids -inf arithmetic)

# ---- packed-slab row offsets (all block starts are multiples of 8) ----------
# Slab A: trailing dim H=32
EMB_ROWS = VOCAB_PAD + TYPE_PAD + S       # 144: [word | type | pos] stacked tables
A_MISC = EMB_ROWS                         # 144: emb_ln_g, emb_ln_b, pool_b, cls_b(col0)
A_LVEC = A_MISC + 8                       # 152: per layer [bo, ln1g, ln1b, bf, ln2g, ln2b, 0, 0]
A_WO = A_LVEC + 8 * LAYERS                # 168: wo per layer (H rows each)
A_WF = A_WO + H * LAYERS                  # 232: wf per layer (INTER rows each)
A_POOLW = A_WF + INTER * LAYERS           # 360
A_CLSW = A_POOLW + H                      # 392: cls_w in column 0, rest zero
A_ROWS = A_CLSW + H                       # 424
# Slab B: trailing dim DH=16 (per-head q/k/v weights, q pre-scaled by 1/sqrt(DH))
LB = 6 * H + 8                            # 200 rows per layer
B_ROWS = LB * LAYERS                      # 400
# Slab C: trailing dim INTER=64
C_BI = H * LAYERS                         # 64: bi per layer at rows 64 + 8*l
C_ROWS = C_BI + 8 * LAYERS                # 80


# =============================== fused kernel ================================

def _layer_norm(y, g, b):
    mu = jnp.mean(y, axis=-1, keepdims=True)
    var = jnp.mean(jnp.square(y - mu), axis=-1, keepdims=True)
    return (y - mu) * jax.lax.rsqrt(var + EPS) * g + b


def fused_bert_mc_kernel(int_ref, kvalid_ref, a_ref, b_ref, c_ref,
                         loss_ref, logits_ref):
    f32 = jnp.float32

    ints = int_ref[...]                                    # (TOK, 4) int32
    ids = ints[:, 0:1]                                     # word ids
    tt = ints[:, 1:2]                                      # token type ids

    # ---------- fused embedding lookup: one (TOK,144) one-hot matmul ----------
    col = jax.lax.broadcasted_iota(jnp.int32, (TOK, EMB_ROWS), 1)
    row = jax.lax.broadcasted_iota(jnp.int32, (TOK, EMB_ROWS), 0)
    pos_col = (VOCAB_PAD + TYPE_PAD) + (row & (S - 1))     # position = token & (S-1)
    emb_oh = ((col == ids) | (col == VOCAB_PAD + tt) | (col == pos_col)).astype(f32)
    x = jnp.dot(emb_oh, a_ref[0:EMB_ROWS, :], preferred_element_type=f32)  # (TOK,H)

    misc = a_ref[A_MISC:A_MISC + 8, :]                     # (8,H)
    x = _layer_norm(x, misc[0:1, :], misc[1:2, :])         # embedding LN

    # ---------- stacked-head additive mask (same head AND same sequence) -----
    ri = jax.lax.broadcasted_iota(jnp.int32, (TOK2, TOK2), 0)
    ci = jax.lax.broadcasted_iota(jnp.int32, (TOK2, TOK2), 1)
    same = (ri >> LOG2_S) == (ci >> LOG2_S)                # block-diag over head+seq
    key_valid = kvalid_ref[...] > 0.5                      # (1, TOK2)
    bigmask = jnp.where(same & key_valid, 0.0, NEG)        # (TOK2, TOK2) f32

    # ------------------------------ transformer layers -----------------------
    for l in range(LAYERS):
        base = l * LB
        bias6 = b_ref[base + 6 * H: base + 6 * H + 8, :]   # (8,DH): bq0,bq1,bk0,bk1,bv0,bv1

        def head_w(i, base=base):                          # per-head (H,DH) weight block
            return b_ref[base + i * H: base + (i + 1) * H, :]

        # per-head projections (weights pre-split in wrapper -> no lane slicing here)
        q0 = jnp.dot(x, head_w(0), preferred_element_type=f32) + bias6[0:1, :]
        q1 = jnp.dot(x, head_w(1), preferred_element_type=f32) + bias6[1:2, :]
        k0 = jnp.dot(x, head_w(2), preferred_element_type=f32) + bias6[2:3, :]
        k1 = jnp.dot(x, head_w(3), preferred_element_type=f32) + bias6[3:4, :]
        v0 = jnp.dot(x, head_w(4), preferred_element_type=f32) + bias6[4:5, :]
        v1 = jnp.dot(x, head_w(5), preferred_element_type=f32) + bias6[5:6, :]
        qs = jnp.concatenate([q0, q1], axis=0)             # (TOK2, DH), sublane concat
        ks = jnp.concatenate([k0, k1], axis=0)
        vs = jnp.concatenate([v0, v1], axis=0)

        # one score matmul / softmax / PV matmul for both heads
        s = jax.lax.dot_general(qs, ks, (((1,), (1,)), ((), ())),
                                preferred_element_type=f32) + bigmask        # (TOK2,TOK2)
        p = jnp.exp(s - jnp.max(s, axis=-1, keepdims=True))
        inv = pl.reciprocal(jnp.sum(p, axis=-1, keepdims=True), approx=True)  # (TOK2,1)
        ctx = jnp.dot(p, vs, preferred_element_type=f32) * inv                # (TOK2,DH)

        lvec = a_ref[A_LVEC + 8 * l: A_LVEC + 8 * (l + 1), :]                 # (8,H)
        # merge heads: per-head output projection (sublane slices, 8-aligned)
        attn = (jnp.dot(ctx[0:TOK, :],
                        a_ref[A_WO + H * l: A_WO + H * l + DH, :],
                        preferred_element_type=f32)
                + jnp.dot(ctx[TOK:TOK2, :],
                          a_ref[A_WO + H * l + DH: A_WO + H * (l + 1), :],
                          preferred_element_type=f32)
                + lvec[0:1, :])
        x = _layer_norm(attn + x, lvec[1:2, :], lvec[2:3, :])

        # fused FFN: wi + exact (erf) GELU + wf (kept f32 / erf for fidelity)
        inter = (jnp.dot(x, c_ref[H * l: H * (l + 1), :], preferred_element_type=f32)
                 + c_ref[C_BI + 8 * l: C_BI + 8 * l + 1, :])
        inter = 0.5 * inter * (1.0 + jax.lax.erf(inter * (1.0 / math.sqrt(2.0))))
        ffn = (jnp.dot(inter, a_ref[A_WF + INTER * l: A_WF + INTER * (l + 1), :],
                       preferred_element_type=f32) + lvec[3:4, :])
        x = _layer_norm(ffn + x, lvec[4:5, :], lvec[5:6, :])

    # --------------------- pooler (CLS tokens) + classifier ------------------
    rs = jax.lax.broadcasted_iota(jnp.int32, (N, TOK), 0)
    cs = jax.lax.broadcasted_iota(jnp.int32, (N, TOK), 1)
    sel = (cs == (rs << LOG2_S)).astype(jnp.float32)       # picks token 0 of each sequence
    cls = jnp.dot(sel, x, preferred_element_type=f32)      # (N,H)
    pooled = jnp.tanh(jnp.dot(cls, a_ref[A_POOLW:A_POOLW + H, :],
                              preferred_element_type=f32) + misc[2:3, :])
    flat = jnp.dot(pooled, a_ref[A_CLSW:A_CLSW + H, :],
                   preferred_element_type=f32) + misc[3:4, :]   # (N,H), col0 = logit
    flat0 = flat[:, 0:1]                                    # (N,1)

    # rearrange (N,1) -> (B,C) with shift/and selection matrices + one tiny matmul
    rn = jax.lax.broadcasted_iota(jnp.int32, (N, C), 0)
    cc = jax.lax.broadcasted_iota(jnp.int32, (N, C), 1)
    fm = ((rn & (C - 1)) == cc).astype(jnp.float32)         # n mod C == c
    rb = jax.lax.broadcasted_iota(jnp.int32, (B, N), 0)
    cn = jax.lax.broadcasted_iota(jnp.int32, (B, N), 1)
    em = ((cn >> LOG2_C) == rb).astype(jnp.float32)         # n div C == b
    logits = jnp.dot(em, flat0 * fm, preferred_element_type=f32)   # (B,C)
    logits_ref[...] = logits

    # ------------------------------ cross entropy ----------------------------
    labels = ints[0:B, 2:3]                                 # (B,1) int32
    lab_oh = (jax.lax.broadcasted_iota(jnp.int32, (B, C), 1) == labels).astype(jnp.float32)
    mxl = jnp.max(logits, axis=-1, keepdims=True)
    lse = mxl + jnp.log(jnp.sum(jnp.exp(logits - mxl), axis=-1, keepdims=True))
    picked = jnp.sum(logits * lab_oh, axis=-1, keepdims=True)
    loss_ref[...] = jnp.mean(lse - picked, keepdims=True)   # (1,1)


# =============================== wrapper / glue ===============================

def bert_mc_forward(slab_a, slab_b, slab_c, input_ids, token_type_ids,
                    attention_mask, labels):
    ids = input_ids.reshape(TOK).astype(jnp.int32)
    tt = token_type_ids.reshape(TOK).astype(jnp.int32)
    lab = jnp.zeros((TOK,), jnp.int32).at[:B].set(labels.astype(jnp.int32))
    int_in = jnp.stack([ids, tt, lab, jnp.zeros((TOK,), jnp.int32)], axis=1)  # (TOK,4)
    kvalid = jnp.tile(attention_mask.reshape(1, TOK).astype(jnp.float32),
                      (1, NHEADS))                                            # (1,TOK2)

    out_shape = (jax.ShapeDtypeStruct((1, 1), jnp.float32),
                 jax.ShapeDtypeStruct((B, C), jnp.float32))

    # Single fused call, no grid: 5 input DMAs total; weights + activations stay
    # VMEM-resident (working set well under every generation's scoped VMEM).
    loss2, logits = pl.pallas_call(
        fused_bert_mc_kernel,
        out_shape=out_shape,
        compiler_params=pltpu.CompilerParams(vmem_limit_bytes=16 * 1024 * 1024),
    )(int_in, kvalid, slab_a, slab_b, slab_c)
    return loss2[0, 0], logits


def init_params(key):
    ks = iter(jax.random.split(key, 16))

    def w(shape):
        return 0.02 * jax.random.normal(next(ks), shape, jnp.float32)

    return {
        "word_emb": w((VOCAB, H)),
        "pos_emb": w((MAX_POS, H)),
        "type_emb": w((TYPE_VOCAB, H)),
        "emb_ln_g": jnp.ones((H,), jnp.float32),
        "emb_ln_b": jnp.zeros((H,), jnp.float32),
        "wq": w((LAYERS, H, H)), "bq": jnp.zeros((LAYERS, H), jnp.float32),
        "wk": w((LAYERS, H, H)), "bk": jnp.zeros((LAYERS, H), jnp.float32),
        "wv": w((LAYERS, H, H)), "bv": jnp.zeros((LAYERS, H), jnp.float32),
        "wo": w((LAYERS, H, H)), "bo": jnp.zeros((LAYERS, H), jnp.float32),
        "ln1_g": jnp.ones((LAYERS, H), jnp.float32),
        "ln1_b": jnp.zeros((LAYERS, H), jnp.float32),
        "wi": w((LAYERS, H, INTER)), "bi": jnp.zeros((LAYERS, INTER), jnp.float32),
        "wf": w((LAYERS, INTER, H)), "bf": jnp.zeros((LAYERS, H), jnp.float32),
        "ln2_g": jnp.ones((LAYERS, H), jnp.float32),
        "ln2_b": jnp.zeros((LAYERS, H), jnp.float32),
        "pool_w": w((H, H)), "pool_b": jnp.zeros((H,), jnp.float32),
        "cls_w": w((H, 1)), "cls_b": jnp.zeros((1,), jnp.float32),
    }


def pack_params(p):
    """Pack all weights into 3 VMEM slabs (done once, outside jit).
    Attention scale 1/sqrt(DH) is folded into the Q weights & biases here."""
    scale = 1.0 / math.sqrt(DH)

    a = jnp.zeros((A_ROWS, H), jnp.float32)
    a = a.at[0:VOCAB].set(p["word_emb"])
    a = a.at[VOCAB_PAD:VOCAB_PAD + TYPE_VOCAB].set(p["type_emb"])
    a = a.at[VOCAB_PAD + TYPE_PAD:VOCAB_PAD + TYPE_PAD + S].set(p["pos_emb"][:S])
    a = a.at[A_MISC + 0].set(p["emb_ln_g"])
    a = a.at[A_MISC + 1].set(p["emb_ln_b"])
    a = a.at[A_MISC + 2].set(p["pool_b"])
    a = a.at[A_MISC + 3, 0].set(p["cls_b"][0])
    for l in range(LAYERS):
        lv = A_LVEC + 8 * l
        a = a.at[lv + 0].set(p["bo"][l])
        a = a.at[lv + 1].set(p["ln1_g"][l])
        a = a.at[lv + 2].set(p["ln1_b"][l])
        a = a.at[lv + 3].set(p["bf"][l])
        a = a.at[lv + 4].set(p["ln2_g"][l])
        a = a.at[lv + 5].set(p["ln2_b"][l])
        a = a.at[A_WO + H * l:A_WO + H * (l + 1)].set(p["wo"][l])
        a = a.at[A_WF + INTER * l:A_WF + INTER * (l + 1)].set(p["wf"][l])
    a = a.at[A_POOLW:A_POOLW + H].set(p["pool_w"])
    a = a.at[A_CLSW:A_CLSW + H, 0].set(p["cls_w"][:, 0])

    b = jnp.zeros((B_ROWS, DH), jnp.float32)
    for l in range(LAYERS):
        base = LB * l
        bb = base + 6 * H
        for h in range(NHEADS):
            lo, hi = h * DH, (h + 1) * DH
            b = b.at[base + H * h:base + H * (h + 1)].set(p["wq"][l][:, lo:hi] * scale)
            b = b.at[base + 2 * H + H * h:base + 2 * H + H * (h + 1)].set(p["wk"][l][:, lo:hi])
            b = b.at[base + 4 * H + H * h:base + 4 * H + H * (h + 1)].set(p["wv"][l][:, lo:hi])
            b = b.at[bb + h].set(p["bq"][l][lo:hi] * scale)
            b = b.at[bb + 2 + h].set(p["bk"][l][lo:hi])
            b = b.at[bb + 4 + h].set(p["bv"][l][lo:hi])

    c = jnp.zeros((C_ROWS, INTER), jnp.float32)
    for l in range(LAYERS):
        c = c.at[H * l:H * (l + 1)].set(p["wi"][l])
        c = c.at[C_BI + 8 * l].set(p["bi"][l])

    return a, b, c


# =================================== driver ===================================

if __name__ == "__main__":
    root = jax.random.PRNGKey(0)
    pkey, k_ids, k_lab = jax.random.split(root, 3)

    params = init_params(pkey)
    slab_a, slab_b, slab_c = pack_params(params)

    input_ids = jax.random.randint(k_ids, (B, C, S), 0, VOCAB, dtype=jnp.int32)
    token_type_ids = jnp.concatenate(
        [jnp.zeros((B, C, S // 2), jnp.int32), jnp.ones((B, C, S // 2), jnp.int32)], axis=-1)
    attention_mask = jnp.ones((B, C, S), jnp.int32).at[:, :, -1].set(0)   # last token = padding
    labels = jax.random.randint(k_lab, (B,), 0, C, dtype=jnp.int32)

    fwd = jax.jit(functools.partial(bert_mc_forward, slab_a, slab_b, slab_c))
    loss, logits = fwd(input_ids, token_type_ids, attention_mask, labels)
    jax.block_until_ready((loss, logits))

    assert logits.shape == (B, C) and loss.shape == ()
    print("KERNEL_OK")
</pallas_src>

<mosaic_0001>
module attributes {stable_mosaic.version = 11 : i64} {
  func.func @fused_bert_mc_kernel(%arg0: memref<64x4xi32, #tpu.memory_space<vmem>>, %arg1: memref<1x128xf32, #tpu.memory_space<vmem>>, %arg2: memref<424x32xf32, #tpu.memory_space<vmem>>, %arg3: memref<400x16xf32, #tpu.memory_space<vmem>>, %arg4: memref<80x64xf32, #tpu.memory_space<vmem>>, %arg5: memref<1x1xf32, #tpu.memory_space<vmem>>, %arg6: memref<2x4xf32, #tpu.memory_space<vmem>>) attributes {dimension_semantics = [], scalar_prefetch = 0 : i64, scratch_operands = 0 : i64, tpu.core_type = #tpu.core_type<tc>} {
    %c0 = arith.constant 0 : index
    %c0_0 = arith.constant 0 : index
    %0 = vector.load %arg0[%c0, %c0_0] : memref<64x4xi32, #tpu.memory_space<vmem>>, vector<64x4xi32>
    %1 = vector.extract_strided_slice %0 {offsets = [0, 0], sizes = [64, 1], strides = [1, 1]} : vector<64x4xi32> to vector<64x1xi32>
    %2 = vector.extract_strided_slice %0 {offsets = [0, 1], sizes = [64, 1], strides = [1, 1]} : vector<64x4xi32> to vector<64x1xi32>
    %3 = tpu.iota {dimensions = array<i32: 1>} : vector<64x144xi32>
    %4 = tpu.iota {dimensions = array<i32: 0>} : vector<64x144xi32>
    %c7_i32 = arith.constant 7 : i32
    %5 = vector.broadcast %c7_i32 : i32 to vector<64x144xi32>
    %6 = arith.andi %4, %5 : vector<64x144xi32>
    %c136_i32 = arith.constant 136 : i32
    %7 = vector.broadcast %c136_i32 : i32 to vector<64x144xi32>
    %8 = arith.addi %7, %6 : vector<64x144xi32>
    %9 = vector.broadcast %1 : vector<64x1xi32> to vector<64x144xi32>
    %10 = arith.cmpi eq, %3, %9 : vector<64x144xi32>
    %c128_i32 = arith.constant 128 : i32
    %11 = vector.broadcast %c128_i32 : i32 to vector<64x1xi32>
    %12 = arith.addi %11, %2 : vector<64x1xi32>
    %13 = vector.broadcast %12 : vector<64x1xi32> to vector<64x144xi32>
    %14 = arith.cmpi eq, %3, %13 : vector<64x144xi32>
    %15 = arith.ori %10, %14 : vector<64x144xi1>
    %16 = arith.cmpi eq, %3, %8 : vector<64x144xi32>
    %17 = arith.ori %15, %16 : vector<64x144xi1>
    %18 = arith.extui %17 : vector<64x144xi1> to vector<64x144xi32>
    %19 = arith.sitofp %18 : vector<64x144xi32> to vector<64x144xf32>
    %c0_1 = arith.constant 0 : index
    %c0_2 = arith.constant 0 : index
    %20 = vector.load %arg2[%c0_1, %c0_2] : memref<424x32xf32, #tpu.memory_space<vmem>>, vector<144x32xf32>
    %cst = arith.constant dense<0.000000e+00> : vector<64x32xf32>
    %21 = tpu.matmul %19, %20, %cst {dimension_numbers = #tpu.dot_dimension_numbers<[1], [0], [0], [1], [0, 0, 1, 1], [], []>} : vector<64x144xf32>, vector<144x32xf32>, vector<64x32xf32> -> vector<64x32xf32>
    %c144 = arith.constant 144 : index
    %c0_3 = arith.constant 0 : index
    %22 = vector.load %arg2[%c144, %c0_3] : memref<424x32xf32, #tpu.memory_space<vmem>>, vector<8x32xf32>
    %23 = vector.extract_strided_slice %22 {offsets = [0, 0], sizes = [1, 32], strides = [1, 1]} : vector<8x32xf32> to vector<1x32xf32>
    %24 = vector.extract_strided_slice %22 {offsets = [1, 0], sizes = [1, 32], strides = [1, 1]} : vector<8x32xf32> to vector<1x32xf32>
    %cst_4 = arith.constant dense<0.000000e+00> : vector<64xf32>
    %25 = vector.multi_reduction <add>, %21, %cst_4 [1] : vector<64x32xf32> to vector<64xf32>
    %26 = vector.shape_cast %25 : vector<64xf32> to vector<64x1xf32>
    %cst_5 = arith.constant 3.200000e+01 : f32
    %27 = vector.broadcast %cst_5 : f32 to vector<64x1xf32>
    %28 = arith.divf %26, %27 : vector<64x1xf32>
    %29 = vector.broadcast %28 : vector<64x1xf32> to vector<64x32xf32>
    %30 = arith.subf %21, %29 : vector<64x32xf32>
    %31 = arith.mulf %30, %30 : vector<64x32xf32>
    %cst_6 = arith.constant dense<0.000000e+00> : vector<64xf32>
    %32 = vector.multi_reduction <add>, %31, %cst_6 [1] : vector<64x32xf32> to vector<64xf32>
    %33 = vector.shape_cast %32 : vector<64xf32> to vector<64x1xf32>
    %cst_7 = arith.constant 3.200000e+01 : f32
    %34 = vector.broadcast %cst_7 : f32 to vector<64x1xf32>
    %35 = arith.divf %33, %34 : vector<64x1xf32>
    %36 = vector.broadcast %28 : vector<64x1xf32> to vector<64x32xf32>
    %37 = arith.subf %21, %36 : vector<64x32xf32>
    %cst_8 = arith.constant 9.99999996E-13 : f32
    %38 = vector.broadcast %cst_8 : f32 to vector<64x1xf32>
    %39 = arith.addf %35, %38 : vector<64x1xf32>
    %40 = math.rsqrt %39 : vector<64x1xf32>
    %41 = vector.broadcast %40 : vector<64x1xf32> to vector<64x32xf32>
    %42 = arith.mulf %37, %41 : vector<64x32xf32>
    %43 = vector.broadcast %23 : vector<1x32xf32> to vector<64x32xf32>
    %44 = arith.mulf %42, %43 : vector<64x32xf32>
    %45 = vector.broadcast %24 : vector<1x32xf32> to vector<64x32xf32>
    %46 = arith.addf %44, %45 : vector<64x32xf32>
    %47 = tpu.iota {dimensions = array<i32: 0>} : vector<128x128xi32>
    %48 = tpu.iota {dimensions = array<i32: 1>} : vector<128x128xi32>
    %c3_i32 = arith.constant 3 : i32
    %49 = vector.broadcast %c3_i32 : i32 to vector<128x128xi32>
    %50 = arith.shrsi %47, %49 : vector<128x128xi32>
    %c3_i32_9 = arith.constant 3 : i32
    %51 = vector.broadcast %c3_i32_9 : i32 to vector<128x128xi32>
    %52 = arith.shrsi %48, %51 : vector<128x128xi32>
    %53 = arith.cmpi eq, %50, %52 : vector<128x128xi32>
    %c0_10 = arith.constant 0 : index
    %c0_11 = arith.constant 0 : index
    %54 = vector.load %arg1[%c0_10, %c0_11] : memref<1x128xf32, #tpu.memory_space<vmem>>, vector<1x128xf32>
    %cst_12 = arith.constant 5.000000e-01 : f32
    %55 = vector.broadcast %cst_12 : f32 to vector<1x128xf32>
    %56 = arith.cmpf ogt, %54, %55 : vector<1x128xf32>
    %57 = vector.broadcast %56 : vector<1x128xi1> to vector<128x128xi1>
    %58 = arith.andi %53, %57 : vector<128x128xi1>
    %cst_13 = arith.constant 0.000000e+00 : f32
    %cst_14 = arith.constant -1.000000e+30 : f32
    %59 = vector.broadcast %cst_13 : f32 to vector<128x128xf32>
    %60 = vector.broadcast %cst_14 : f32 to vector<128x128xf32>
    %61 = arith.select %58, %59, %60 : vector<128x128xi1>, vector<128x128xf32>
    %c192 = arith.constant 192 : index
    %c0_15 = arith.constant 0 : index
    %62 = vector.load %arg3[%c192, %c0_15] : memref<400x16xf32, #tpu.memory_space<vmem>>, vector<8x16xf32>
    %c0_16 = arith.constant 0 : index
    %c0_17 = arith.constant 0 : index
    %63 = vector.load %arg3[%c0_16, %c0_17] : memref<400x16xf32, #tpu.memory_space<vmem>>, vector<32x16xf32>
    %cst_18 = arith.constant dense<0.000000e+00> : vector<64x16xf32>
    %64 = tpu.matmul %46, %63, %cst_18 {dimension_numbers = #tpu.dot_dimension_numbers<[1], [0], [0], [1], [0, 0, 1, 1], [], []>} : vector<64x32xf32>, vector<32x16xf32>, vector<64x16xf32> -> vector<64x16xf32>
    %65 = vector.extract_strided_slice %62 {offsets = [0, 0], sizes = [1, 16], strides = [1, 1]} : vector<8x16xf32> to vector<1x16xf32>
    %66 = vector.broadcast %65 : vector<1x16xf32> to vector<64x16xf32>
    %67 = arith.addf %64, %66 : vector<64x16xf32>
    %c32 = arith.constant 32 : index
    %c0_19 = arith.constant 0 : index
    %68 = vector.load %arg3[%c32, %c0_19] : memref<400x16xf32, #tpu.memory_space<vmem>>, vector<32x16xf32>
    %cst_20 = arith.constant dense<0.000000e+00> : vector<64x16xf32>
    %69 = tpu.matmul %46, %68, %cst_20 {dimension_numbers = #tpu.dot_dimension_numbers<[1], [0], [0], [1], [0, 0, 1, 1], [], []>} : vector<64x32xf32>, vector<32x16xf32>, vector<64x16xf32> -> vector<64x16xf32>
    %70 = vector.extract_strided_slice %62 {offsets = [1, 0], sizes = [1, 16], strides = [1, 1]} : vector<8x16xf32> to vector<1x16xf32>
    %71 = vector.broadcast %70 : vector<1x16xf32> to vector<64x16xf32>
    %72 = arith.addf %69, %71 : vector<64x16xf32>
    %c64 = arith.constant 64 : index
    %c0_21 = arith.constant 0 : index
    %73 = vector.load %arg3[%c64, %c0_21] : memref<400x16xf32, #tpu.memory_space<vmem>>, vector<32x16xf32>
    %cst_22 = arith.constant dense<0.000000e+00> : vector<64x16xf32>
    %74 = tpu.matmul %46, %73, %cst_22 {dimension_numbers = #tpu.dot_dimension_numbers<[1], [0], [0], [1], [0, 0, 1, 1], [], []>} : vector<64x32xf32>, vector<32x16xf32>, vector<64x16xf32> -> vector<64x16xf32>
    %75 = vector.extract_strided_slice %62 {offsets = [2, 0], sizes = [1, 16], strides = [1, 1]} : vector<8x16xf32> to vector<1x16xf32>
    %76 = vector.broadcast %75 : vector<1x16xf32> to vector<64x16xf32>
    %77 = arith.addf %74, %76 : vector<64x16xf32>
    %c96 = arith.constant 96 : index
    %c0_23 = arith.constant 0 : index
    %78 = vector.load %arg3[%c96, %c0_23] : memref<400x16xf32, #tpu.memory_space<vmem>>, vector<32x16xf32>
    %cst_24 = arith.constant dense<0.000000e+00> : vector<64x16xf32>
    %79 = tpu.matmul %46, %78, %cst_24 {dimension_numbers = #tpu.dot_dimension_numbers<[1], [0], [0], [1], [0, 0, 1, 1], [], []>} : vector<64x32xf32>, vector<32x16xf32>, vector<64x16xf32> -> vector<64x16xf32>
    %80 = vector.extract_strided_slice %62 {offsets = [3, 0], sizes = [1, 16], strides = [1, 1]} : vector<8x16xf32> to vector<1x16xf32>
    %81 = vector.broadcast %80 : vector<1x16xf32> to vector<64x16xf32>
    %82 = arith.addf %79, %81 : vector<64x16xf32>
    %c128 = arith.constant 128 : index
    %c0_25 = arith.constant 0 : index
    %83 = vector.load %arg3[%c128, %c0_25] : memref<400x16xf32, #tpu.memory_space<vmem>>, vector<32x16xf32>
    %cst_26 = arith.constant dense<0.000000e+00> : vector<64x16xf32>
    %84 = tpu.matmul %46, %83, %cst_26 {dimension_numbers = #tpu.dot_dimension_numbers<[1], [0], [0], [1], [0, 0, 1, 1], [], []>} : vector<64x32xf32>, vector<32x16xf32>, vector<64x16xf32> -> vector<64x16xf32>
    %85 = vector.extract_strided_slice %62 {offsets = [4, 0], sizes = [1, 16], strides = [1, 1]} : vector<8x16xf32> to vector<1x16xf32>
    %86 = vector.broadcast %85 : vector<1x16xf32> to vector<64x16xf32>
    %87 = arith.addf %84, %86 : vector<64x16xf32>
    %c160 = arith.constant 160 : index
    %c0_27 = arith.constant 0 : index
    %88 = vector.load %arg3[%c160, %c0_27] : memref<400x16xf32, #tpu.memory_space<vmem>>, vector<32x16xf32>
    %cst_28 = arith.constant dense<0.000000e+00> : vector<64x16xf32>
    %89 = tpu.matmul %46, %88, %cst_28 {dimension_numbers = #tpu.dot_dimension_numbers<[1], [0], [0], [1], [0, 0, 1, 1], [], []>} : vector<64x32xf32>, vector<32x16xf32>, vector<64x16xf32> -> vector<64x16xf32>
    %90 = vector.extract_strided_slice %62 {offsets = [5, 0], sizes = [1, 16], strides = [1, 1]} : vector<8x16xf32> to vector<1x16xf32>
    %91 = vector.broadcast %90 : vector<1x16xf32> to vector<64x16xf32>
    %92 = arith.addf %89, %91 : vector<64x16xf32>
    %93 = tpu.concatenate %67, %72 in 0 : vector<64x16xf32>, vector<64x16xf32> -> vector<128x16xf32>
    %94 = tpu.concatenate %77, %82 in 0 : vector<64x16xf32>, vector<64x16xf32> -> vector<128x16xf32>
    %95 = tpu.concatenate %87, %92 in 0 : vector<64x16xf32>, vector<64x16xf32> -> vector<128x16xf32>
    %cst_29 = arith.constant dense<0.000000e+00> : vector<128x128xf32>
    %96 = tpu.matmul %93, %94, %cst_29 {dimension_numbers = #tpu.dot_dimension_numbers<[1], [1], [0], [0], [0, 0, 1, 0], [], []>} : vector<128x16xf32>, vector<128x16xf32>, vector<128x128xf32> -> vector<128x128xf32>
    %97 = arith.addf %96, %61 : vector<128x128xf32>
    %cst_30 = arith.constant dense<0xFF800000> : vector<128xf32>
    %98 = vector.multi_reduction <maximumf>, %97, %cst_30 [1] : vector<128x128xf32> to vector<128xf32>
    %99 = vector.shape_cast %98 : vector<128xf32> to vector<128x1xf32>
    %100 = vector.broadcast %99 : vector<128x1xf32> to vector<128x128xf32>
    %101 = arith.subf %97, %100 : vector<128x128xf32>
    %102 = math.exp %101 : vector<128x128xf32>
    %cst_31 = arith.constant dense<0.000000e+00> : vector<128xf32>
    %103 = vector.multi_reduction <add>, %102, %cst_31 [1] : vector<128x128xf32> to vector<128xf32>
    %104 = vector.shape_cast %103 : vector<128xf32> to vector<128x1xf32>
    %105 = tpu.reciprocal %104 {approx = true} : vector<128x1xf32> -> vector<128x1xf32>
    %cst_32 = arith.constant dense<0.000000e+00> : vector<128x16xf32>
    %106 = tpu.matmul %102, %95, %cst_32 {dimension_numbers = #tpu.dot_dimension_numbers<[1], [0], [0], [1], [0, 0, 1, 1], [], []>} : vector<128x128xf32>, vector<128x16xf32>, vector<128x16xf32> -> vector<128x16xf32>
    %107 = vector.broadcast %105 : vector<128x1xf32> to vector<128x16xf32>
    %108 = arith.mulf %106, %107 : vector<128x16xf32>
    %c152 = arith.constant 152 : index
    %c0_33 = arith.constant 0 : index
    %109 = vector.load %arg2[%c152, %c0_33] : memref<424x32xf32, #tpu.memory_space<vmem>>, vector<8x32xf32>
    %110 = vector.extract_strided_slice %108 {offsets = [0, 0], sizes = [64, 16], strides = [1, 1]} : vector<128x16xf32> to vector<64x16xf32>
    %c168 = arith.constant 168 : index
    %c0_34 = arith.constant 0 : index
    %111 = vector.load %arg2[%c168, %c0_34] : memref<424x32xf32, #tpu.memory_space<vmem>>, vector<16x32xf32>
    %cst_35 = arith.constant dense<0.000000e+00> : vector<64x32xf32>
    %112 = tpu.matmul %110, %111, %cst_35 {dimension_numbers = #tpu.dot_dimension_numbers<[1], [0], [0], [1], [0, 0, 1, 1], [], []>} : vector<64x16xf32>, vector<16x32xf32>, vector<64x32xf32> -> vector<64x32xf32>
    %113 = vector.extract_strided_slice %108 {offsets = [64, 0], sizes = [64, 16], strides = [1, 1]} : vector<128x16xf32> to vector<64x16xf32>
    %c184 = arith.constant 184 : index
    %c0_36 = arith.constant 0 : index
    %114 = vector.load %arg2[%c184, %c0_36] : memref<424x32xf32, #tpu.memory_space<vmem>>, vector<16x32xf32>
    %cst_37 = arith.constant dense<0.000000e+00> : vector<64x32xf32>
    %115 = tpu.matmul %113, %114, %cst_37 {dimension_numbers = #tpu.dot_dimension_numbers<[1], [0], [0], [1], [0, 0, 1, 1], [], []>} : vector<64x16xf32>, vector<16x32xf32>, vector<64x32xf32> -> vector<64x32xf32>
    %116 = arith.addf %112, %115 : vector<64x32xf32>
    %117 = vector.extract_strided_slice %109 {offsets = [0, 0], sizes = [1, 32], strides = [1, 1]} : vector<8x32xf32> to vector<1x32xf32>
    %118 = vector.broadcast %117 : vector<1x32xf32> to vector<64x32xf32>
    %119 = arith.addf %116, %118 : vector<64x32xf32>
    %120 = arith.addf %119, %46 : vector<64x32xf32>
    %121 = vector.extract_strided_slice %109 {offsets = [1, 0], sizes = [1, 32], strides = [1, 1]} : vector<8x32xf32> to vector<1x32xf32>
    %122 = vector.extract_strided_slice %109 {offsets = [2, 0], sizes = [1, 32], strides = [1, 1]} : vector<8x32xf32> to vector<1x32xf32>
    %cst_38 = arith.constant dense<0.000000e+00> : vector<64xf32>
    %123 = vector.multi_reduction <add>, %120, %cst_38 [1] : vector<64x32xf32> to vector<64xf32>
    %124 = vector.shape_cast %123 : vector<64xf32> to vector<64x1xf32>
    %cst_39 = arith.constant 3.200000e+01 : f32
    %125 = vector.broadcast %cst_39 : f32 to vector<64x1xf32>
    %126 = arith.divf %124, %125 : vector<64x1xf32>
    %127 = vector.broadcast %126 : vector<64x1xf32> to vector<64x32xf32>
    %128 = arith.subf %120, %127 : vector<64x32xf32>
    %129 = arith.mulf %128, %128 : vector<64x32xf32>
    %cst_40 = arith.constant dense<0.000000e+00> : vector<64xf32>
    %130 = vector.multi_reduction <add>, %129, %cst_40 [1] : vector<64x32xf32> to vector<64xf32>
    %131 = vector.shape_cast %130 : vector<64xf32> to vector<64x1xf32>
    %cst_41 = arith.constant 3.200000e+01 : f32
    %132 = vector.broadcast %cst_41 : f32 to vector<64x1xf32>
    %133 = arith.divf %131, %132 : vector<64x1xf32>
    %134 = vector.broadcast %126 : vector<64x1xf32> to vector<64x32xf32>
    %135 = arith.subf %120, %134 : vector<64x32xf32>
    %cst_42 = arith.constant 9.99999996E-13 : f32
    %136 = vector.broadcast %cst_42 : f32 to vector<64x1xf32>
    %137 = arith.addf %133, %136 : vector<64x1xf32>
    %138 = math.rsqrt %137 : vector<64x1xf32>
    %139 = vector.broadcast %138 : vector<64x1xf32> to vector<64x32xf32>
    %140 = arith.mulf %135, %139 : vector<64x32xf32>
    %141 = vector.broadcast %121 : vector<1x32xf32> to vector<64x32xf32>
    %142 = arith.mulf %140, %141 : vector<64x32xf32>
    %143 = vector.broadcast %122 : vector<1x32xf32> to vector<64x32xf32>
    %144 = arith.addf %142, %143 : vector<64x32xf32>
    %c0_43 = arith.constant 0 : index
    %c0_44 = arith.constant 0 : index
    %145 = vector.load %arg4[%c0_43, %c0_44] : memref<80x64xf32, #tpu.memory_space<vmem>>, vector<32x64xf32>
    %cst_45 = arith.constant dense<0.000000e+00> : vector<64x64xf32>
    %146 = tpu.matmul %144, %145, %cst_45 {dimension_numbers = #tpu.dot_dimension_numbers<[1], [0], [0], [1], [0, 0, 1, 1], [], []>} : vector<64x32xf32>, vector<32x64xf32>, vector<64x64xf32> -> vector<64x64xf32>
    %c64_46 = arith.constant 64 : index
    %c0_47 = arith.constant 0 : index
    %147 = vector.load %arg4[%c64_46, %c0_47] : memref<80x64xf32, #tpu.memory_space<vmem>>, vector<1x64xf32>
    %148 = vector.broadcast %147 : vector<1x64xf32> to vector<64x64xf32>
    %149 = arith.addf %146, %148 : vector<64x64xf32>
    %cst_48 = arith.constant 5.000000e-01 : f32
    %150 = vector.broadcast %cst_48 : f32 to vector<64x64xf32>
    %151 = arith.mulf %150, %149 : vector<64x64xf32>
    %cst_49 = arith.constant 0.707106769 : f32
    %152 = vector.broadcast %cst_49 : f32 to vector<64x64xf32>
    %153 = arith.mulf %149, %152 : vector<64x64xf32>
    %154 = math.erf %153 : vector<64x64xf32>
    %cst_50 = arith.constant 1.000000e+00 : f32
    %155 = vector.broadcast %cst_50 : f32 to vector<64x64xf32>
    %156 = arith.addf %155, %154 : vector<64x64xf32>
    %157 = arith.mulf %151, %156 : vector<64x64xf32>
    %c232 = arith.constant 232 : index
    %c0_51 = arith.constant 0 : index
    %158 = vector.load %arg2[%c232, %c0_51] : memref<424x32xf32, #tpu.memory_space<vmem>>, vector<64x32xf32>
    %cst_52 = arith.constant dense<0.000000e+00> : vector<64x32xf32>
    %159 = tpu.matmul %157, %158, %cst_52 {dimension_numbers = #tpu.dot_dimension_numbers<[1], [0], [0], [1], [0, 0, 1, 1], [], []>} : vector<64x64xf32>, vector<64x32xf32>, vector<64x32xf32> -> vector<64x32xf32>
    %160 = vector.extract_strided_slice %109 {offsets = [3, 0], sizes = [1, 32], strides = [1, 1]} : vector<8x32xf32> to vector<1x32xf32>
    %161 = vector.broadcast %160 : vector<1x32xf32> to vector<64x32xf32>
    %162 = arith.addf %159, %161 : vector<64x32xf32>
    %163 = arith.addf %162, %144 : vector<64x32xf32>
    %164 = vector.extract_strided_slice %109 {offsets = [4, 0], sizes = [1, 32], strides = [1, 1]} : vector<8x32xf32> to vector<1x32xf32>
    %165 = vector.extract_strided_slice %109 {offsets = [5, 0], sizes = [1, 32], strides = [1, 1]} : vector<8x32xf32> to vector<1x32xf32>
    %cst_53 = arith.constant dense<0.000000e+00> : vector<64xf32>
    %166 = vector.multi_reduction <add>, %163, %cst_53 [1] : vector<64x32xf32> to vector<64xf32>
    %167 = vector.shape_cast %166 : vector<64xf32> to vector<64x1xf32>
    %cst_54 = arith.constant 3.200000e+01 : f32
    %168 = vector.broadcast %cst_54 : f32 to vector<64x1xf32>
    %169 = arith.divf %167, %168 : vector<64x1xf32>
    %170 = vector.broadcast %169 : vector<64x1xf32> to vector<64x32xf32>
    %171 = arith.subf %163, %170 : vector<64x32xf32>
    %172 = arith.mulf %171, %171 : vector<64x32xf32>
    %cst_55 = arith.constant dense<0.000000e+00> : vector<64xf32>
    %173 = vector.multi_reduction <add>, %172, %cst_55 [1] : vector<64x32xf32> to vector<64xf32>
    %174 = vector.shape_cast %173 : vector<64xf32> to vector<64x1xf32>
    %cst_56 = arith.constant 3.200000e+01 : f32
    %175 = vector.broadcast %cst_56 : f32 to vector<64x1xf32>
    %176 = arith.divf %174, %175 : vector<64x1xf32>
    %177 = vector.broadcast %169 : vector<64x1xf32> to vector<64x32xf32>
    %178 = arith.subf %163, %177 : vector<64x32xf32>
    %cst_57 = arith.constant 9.99999996E-13 : f32
    %179 = vector.broadcast %cst_57 : f32 to vector<64x1xf32>
    %180 = arith.addf %176, %179 : vector<64x1xf32>
    %181 = math.rsqrt %180 : vector<64x1xf32>
    %182 = vector.broadcast %181 : vector<64x1xf32> to vector<64x32xf32>
    %183 = arith.mulf %178, %182 : vector<64x32xf32>
    %184 = vector.broadcast %164 : vector<1x32xf32> to vector<64x32xf32>
    %185 = arith.mulf %183, %184 : vector<64x32xf32>
    %186 = vector.broadcast %165 : vector<1x32xf32> to vector<64x32xf32>
    %187 = arith.addf %185, %186 : vector<64x32xf32>
    %c392 = arith.constant 392 : index
    %c0_58 = arith.constant 0 : index
    %188 = vector.load %arg3[%c392, %c0_58] : memref<400x16xf32, #tpu.memory_space<vmem>>, vector<8x16xf32>
    %c200 = arith.constant 200 : index
    %c0_59 = arith.constant 0 : index
    %189 = vector.load %arg3[%c200, %c0_59] : memref<400x16xf32, #tpu.memory_space<vmem>>, vector<32x16xf32>
    %cst_60 = arith.constant dense<0.000000e+00> : vector<64x16xf32>
    %190 = tpu.matmul %187, %189, %cst_60 {dimension_numbers = #tpu.dot_dimension_numbers<[1], [0], [0], [1], [0, 0, 1, 1], [], []>} : vector<64x32xf32>, vector<32x16xf32>, vector<64x16xf32> -> vector<64x16xf32>
    %191 = vector.extract_strided_slice %188 {offsets = [0, 0], sizes = [1, 16], strides = [1, 1]} : vector<8x16xf32> to vector<1x16xf32>
    %192 = vector.broadcast %191 : vector<1x16xf32> to vector<64x16xf32>
    %193 = arith.addf %190, %192 : vector<64x16xf32>
    %c232_61 = arith.constant 232 : index
    %c0_62 = arith.constant 0 : index
    %194 = vector.load %arg3[%c232_61, %c0_62] : memref<400x16xf32, #tpu.memory_space<vmem>>, vector<32x16xf32>
    %cst_63 = arith.constant dense<0.000000e+00> : vector<64x16xf32>
    %195 = tpu.matmul %187, %194, %cst_63 {dimension_numbers = #tpu.dot_dimension_numbers<[1], [0], [0], [1], [0, 0, 1, 1], [], []>} : vector<64x32xf32>, vector<32x16xf32>, vector<64x16xf32> -> vector<64x16xf32>
    %196 = vector.extract_strided_slice %188 {offsets = [1, 0], sizes = [1, 16], strides = [1, 1]} : vector<8x16xf32> to vector<1x16xf32>
    %197 = vector.broadcast %196 : vector<1x16xf32> to vector<64x16xf32>
    %198 = arith.addf %195, %197 : vector<64x16xf32>
    %c264 = arith.constant 264 : index
    %c0_64 = arith.constant 0 : index
    %199 = vector.load %arg3[%c264, %c0_64] : memref<400x16xf32, #tpu.memory_space<vmem>>, vector<32x16xf32>
    %cst_65 = arith.constant dense<0.000000e+00> : vector<64x16xf32>
    %200 = tpu.matmul %187, %199, %cst_65 {dimension_numbers = #tpu.dot_dimension_numbers<[1], [0], [0], [1], [0, 0, 1, 1], [], []>} : vector<64x32xf32>, vector<32x16xf32>, vector<64x16xf32> -> vector<64x16xf32>
    %201 = vector.extract_strided_slice %188 {offsets = [2, 0], sizes = [1, 16], strides = [1, 1]} : vector<8x16xf32> to vector<1x16xf32>
    %202 = vector.broadcast %201 : vector<1x16xf32> to vector<64x16xf32>
    %203 = arith.addf %200, %202 : vector<64x16xf32>
    %c296 = arith.constant 296 : index
    %c0_66 = arith.constant 0 : index
    %204 = vector.load %arg3[%c296, %c0_66] : memref<400x16xf32, #tpu.memory_space<vmem>>, vector<32x16xf32>
    %cst_67 = arith.constant dense<0.000000e+00> : vector<64x16xf32>
    %205 = tpu.matmul %187, %204, %cst_67 {dimension_numbers = #tpu.dot_dimension_numbers<[1], [0], [0], [1], [0, 0, 1, 1], [], []>} : vector<64x32xf32>, vector<32x16xf32>, vector<64x16xf32> -> vector<64x16xf32>
    %206 = vector.extract_strided_slice %188 {offsets = [3, 0], sizes = [1, 16], strides = [1, 1]} : vector<8x16xf32> to vector<1x16xf32>
    %207 = vector.broadcast %206 : vector<1x16xf32> to vector<64x16xf32>
    %208 = arith.addf %205, %207 : vector<64x16xf32>
    %c328 = arith.constant 328 : index
    %c0_68 = arith.constant 0 : index
    %209 = vector.load %arg3[%c328, %c0_68] : memref<400x16xf32, #tpu.memory_space<vmem>>, vector<32x16xf32>
    %cst_69 = arith.constant dense<0.000000e+00> : vector<64x16xf32>
    %210 = tpu.matmul %187, %209, %cst_69 {dimension_numbers = #tpu.dot_dimension_numbers<[1], [0], [0], [1], [0, 0, 1, 1], [], []>} : vector<64x32xf32>, vector<32x16xf32>, vector<64x16xf32> -> vector<64x16xf32>
    %211 = vector.extract_strided_slice %188 {offsets = [4, 0], sizes = [1, 16], strides = [1, 1]} : vector<8x16xf32> to vector<1x16xf32>
    %212 = vector.broadcast %211 : vector<1x16xf32> to vector<64x16xf32>
    %213 = arith.addf %210, %212 : vector<64x16xf32>
    %c360 = arith.constant 360 : index
    %c0_70 = arith.constant 0 : index
    %214 = vector.load %arg3[%c360, %c0_70] : memref<400x16xf32, #tpu.memory_space<vmem>>, vector<32x16xf32>
    %cst_71 = arith.constant dense<0.000000e+00> : vector<64x16xf32>
    %215 = tpu.matmul %187, %214, %cst_71 {dimension_numbers = #tpu.dot_dimension_numbers<[1], [0], [0], [1], [0, 0, 1, 1], [], []>} : vector<64x32xf32>, vector<32x16xf32>, vector<64x16xf32> -> vector<64x16xf32>
    %216 = vector.extract_strided_slice %188 {offsets = [5, 0], sizes = [1, 16], strides = [1, 1]} : vector<8x16xf32> to vector<1x16xf32>
    %217 = vector.broadcast %216 : vector<1x16xf32> to vector<64x16xf32>
    %218 = arith.addf %215, %217 : vector<64x16xf32>
    %219 = tpu.concatenate %193, %198 in 0 : vector<64x16xf32>, vector<64x16xf32> -> vector<128x16xf32>
    %220 = tpu.concatenate %203, %208 in 0 : vector<64x16xf32>, vector<64x16xf32> -> vector<128x16xf32>
    %221 = tpu.concatenate %213, %218 in 0 : vector<64x16xf32>, vector<64x16xf32> -> vector<128x16xf32>
    %cst_72 = arith.constant dense<0.000000e+00> : vector<128x128xf32>
    %222 = tpu.matmul %219, %220, %cst_72 {dimension_numbers = #tpu.dot_dimension_numbers<[1], [1], [0], [0], [0, 0, 1, 0], [], []>} : vector<128x16xf32>, vector<128x16xf32>, vector<128x128xf32> -> vector<128x128xf32>
    %223 = arith.addf %222, %61 : vector<128x128xf32>
    %cst_73 = arith.constant dense<0xFF800000> : vector<128xf32>
    %224 = vector.multi_reduction <maximumf>, %223, %cst_73 [1] : vector<128x128xf32> to vector<128xf32>
    %225 = vector.shape_cast %224 : vector<128xf32> to vector<128x1xf32>
    %226 = vector.broadcast %225 : vector<128x1xf32> to vector<128x128xf32>
    %227 = arith.subf %223, %226 : vector<128x128xf32>
    %228 = math.exp %227 : vector<128x128xf32>
    %cst_74 = arith.constant dense<0.000000e+00> : vector<128xf32>
    %229 = vector.multi_reduction <add>, %228, %cst_74 [1] : vector<128x128xf32> to vector<128xf32>
    %230 = vector.shape_cast %229 : vector<128xf32> to vector<128x1xf32>
    %231 = tpu.reciprocal %230 {approx = true} : vector<128x1xf32> -> vector<128x1xf32>
    %cst_75 = arith.constant dense<0.000000e+00> : vector<128x16xf32>
    %232 = tpu.matmul %228, %221, %cst_75 {dimension_numbers = #tpu.dot_dimension_numbers<[1], [0], [0], [1], [0, 0, 1, 1], [], []>} : vector<128x128xf32>, vector<128x16xf32>, vector<128x16xf32> -> vector<128x16xf32>
    %233 = vector.broadcast %231 : vector<128x1xf32> to vector<128x16xf32>
    %234 = arith.mulf %232, %233 : vector<128x16xf32>
    %c160_76 = arith.constant 160 : index
    %c0_77 = arith.constant 0 : index
    %235 = vector.load %arg2[%c160_76, %c0_77] : memref<424x32xf32, #tpu.memory_space<vmem>>, vector<8x32xf32>
    %236 = vector.extract_strided_slice %234 {offsets = [0, 0], sizes = [64, 16], strides = [1, 1]} : vector<128x16xf32> to vector<64x16xf32>
    %c200_78 = arith.constant 200 : index
    %c0_79 = arith.constant 0 : index
    %237 = vector.load %arg2[%c200_78, %c0_79] : memref<424x32xf32, #tpu.memory_space<vmem>>, vector<16x32xf32>
    %cst_80 = arith.constant dense<0.000000e+00> : vector<64x32xf32>
    %238 = tpu.matmul %236, %237, %cst_80 {dimension_numbers = #tpu.dot_dimension_numbers<[1], [0], [0], [1], [0, 0, 1, 1], [], []>} : vector<64x16xf32>, vector<16x32xf32>, vector<64x32xf32> -> vector<64x32xf32>
    %239 = vector.extract_strided_slice %234 {offsets = [64, 0], sizes = [64, 16], strides = [1, 1]} : vector<128x16xf32> to vector<64x16xf32>
    %c216 = arith.constant 216 : index
    %c0_81 = arith.constant 0 : index
    %240 = vector.load %arg2[%c216, %c0_81] : memref<424x32xf32, #tpu.memory_space<vmem>>, vector<16x32xf32>
    %cst_82 = arith.constant dense<0.000000e+00> : vector<64x32xf32>
    %241 = tpu.matmul %239, %240, %cst_82 {dimension_numbers = #tpu.dot_dimension_numbers<[1], [0], [0], [1], [0, 0, 1, 1], [], []>} : vector<64x16xf32>, vector<16x32xf32>, vector<64x32xf32> -> vector<64x32xf32>
    %242 = arith.addf %238, %241 : vector<64x32xf32>
    %243 = vector.extract_strided_slice %235 {offsets = [0, 0], sizes = [1, 32], strides = [1, 1]} : vector<8x32xf32> to vector<1x32xf32>
    %244 = vector.broadcast %243 : vector<1x32xf32> to vector<64x32xf32>
    %245 = arith.addf %242, %244 : vector<64x32xf32>
    %246 = arith.addf %245, %187 : vector<64x32xf32>
    %247 = vector.extract_strided_slice %235 {offsets = [1, 0], sizes = [1, 32], strides = [1, 1]} : vector<8x32xf32> to vector<1x32xf32>
    %248 = vector.extract_strided_slice %235 {offsets = [2, 0], sizes = [1, 32], strides = [1, 1]} : vector<8x32xf32> to vector<1x32xf32>
    %cst_83 = arith.constant dense<0.000000e+00> : vector<64xf32>
    %249 = vector.multi_reduction <add>, %246, %cst_83 [1] : vector<64x32xf32> to vector<64xf32>
    %250 = vector.shape_cast %249 : vector<64xf32> to vector<64x1xf32>
    %cst_84 = arith.constant 3.200000e+01 : f32
    %251 = vector.broadcast %cst_84 : f32 to vector<64x1xf32>
    %252 = arith.divf %250, %251 : vector<64x1xf32>
    %253 = vector.broadcast %252 : vector<64x1xf32> to vector<64x32xf32>
    %254 = arith.subf %246, %253 : vector<64x32xf32>
    %255 = arith.mulf %254, %254 : vector<64x32xf32>
    %cst_85 = arith.constant dense<0.000000e+00> : vector<64xf32>
    %256 = vector.multi_reduction <add>, %255, %cst_85 [1] : vector<64x32xf32> to vector<64xf32>
    %257 = vector.shape_cast %256 : vector<64xf32> to vector<64x1xf32>
    %cst_86 = arith.constant 3.200000e+01 : f32
    %258 = vector.broadcast %cst_86 : f32 to vector<64x1xf32>
    %259 = arith.divf %257, %258 : vector<64x1xf32>
    %260 = vector.broadcast %252 : vector<64x1xf32> to vector<64x32xf32>
    %261 = arith.subf %246, %260 : vector<64x32xf32>
    %cst_87 = arith.constant 9.99999996E-13 : f32
    %262 = vector.broadcast %cst_87 : f32 to vector<64x1xf32>
    %263 = arith.addf %259, %262 : vector<64x1xf32>
    %264 = math.rsqrt %263 : vector<64x1xf32>
    %265 = vector.broadcast %264 : vector<64x1xf32> to vector<64x32xf32>
    %266 = arith.mulf %261, %265 : vector<64x32xf32>
    %267 = vector.broadcast %247 : vector<1x32xf32> to vector<64x32xf32>
    %268 = arith.mulf %266, %267 : vector<64x32xf32>
    %269 = vector.broadcast %248 : vector<1x32xf32> to vector<64x32xf32>
    %270 = arith.addf %268, %269 : vector<64x32xf32>
    %c32_88 = arith.constant 32 : index
    %c0_89 = arith.constant 0 : index
    %271 = vector.load %arg4[%c32_88, %c0_89] : memref<80x64xf32, #tpu.memory_space<vmem>>, vector<32x64xf32>
    %cst_90 = arith.constant dense<0.000000e+00> : vector<64x64xf32>
    %272 = tpu.matmul %270, %271, %cst_90 {dimension_numbers = #tpu.dot_dimension_numbers<[1], [0], [0], [1], [0, 0, 1, 1], [], []>} : vector<64x32xf32>, vector<32x64xf32>, vector<64x64xf32> -> vector<64x64xf32>
    %c72 = arith.constant 72 : index
    %c0_91 = arith.constant 0 : index
    %273 = vector.load %arg4[%c72, %c0_91] : memref<80x64xf32, #tpu.memory_space<vmem>>, vector<1x64xf32>
    %274 = vector.broadcast %273 : vector<1x64xf32> to vector<64x64xf32>
    %275 = arith.addf %272, %274 : vector<64x64xf32>
    %cst_92 = arith.constant 5.000000e-01 : f32
    %276 = vector.broadcast %cst_92 : f32 to vector<64x64xf32>
    %277 = arith.mulf %276, %275 : vector<64x64xf32>
    %cst_93 = arith.constant 0.707106769 : f32
    %278 = vector.broadcast %cst_93 : f32 to vector<64x64xf32>
    %279 = arith.mulf %275, %278 : vector<64x64xf32>
    %280 = math.erf %279 : vector<64x64xf32>
    %cst_94 = arith.constant 1.000000e+00 : f32
    %281 = vector.broadcast %cst_94 : f32 to vector<64x64xf32>
    %282 = arith.addf %281, %280 : vector<64x64xf32>
    %283 = arith.mulf %277, %282 : vector<64x64xf32>
    %c296_95 = arith.constant 296 : index
    %c0_96 = arith.constant 0 : index
    %284 = vector.load %arg2[%c296_95, %c0_96] : memref<424x32xf32, #tpu.memory_space<vmem>>, vector<64x32xf32>
    %cst_97 = arith.constant dense<0.000000e+00> : vector<64x32xf32>
    %285 = tpu.matmul %283, %284, %cst_97 {dimension_numbers = #tpu.dot_dimension_numbers<[1], [0], [0], [1], [0, 0, 1, 1], [], []>} : vector<64x64xf32>, vector<64x32xf32>, vector<64x32xf32> -> vector<64x32xf32>
    %286 = vector.extract_strided_slice %235 {offsets = [3, 0], sizes = [1, 32], strides = [1, 1]} : vector<8x32xf32> to vector<1x32xf32>
    %287 = vector.broadcast %286 : vector<1x32xf32> to vector<64x32xf32>
    %288 = arith.addf %285, %287 : vector<64x32xf32>
    %289 = arith.addf %288, %270 : vector<64x32xf32>
    %290 = vector.extract_strided_slice %235 {offsets = [4, 0], sizes = [1, 32], strides = [1, 1]} : vector<8x32xf32> to vector<1x32xf32>
    %291 = vector.extract_strided_slice %235 {offsets = [5, 0], sizes = [1, 32], strides = [1, 1]} : vector<8x32xf32> to vector<1x32xf32>
    %cst_98 = arith.constant dense<0.000000e+00> : vector<64xf32>
    %292 = vector.multi_reduction <add>, %289, %cst_98 [1] : vector<64x32xf32> to vector<64xf32>
    %293 = vector.shape_cast %292 : vector<64xf32> to vector<64x1xf32>
    %cst_99 = arith.constant 3.200000e+01 : f32
    %294 = vector.broadcast %cst_99 : f32 to vector<64x1xf32>
    %295 = arith.divf %293, %294 : vector<64x1xf32>
    %296 = vector.broadcast %295 : vector<64x1xf32> to vector<64x32xf32>
    %297 = arith.subf %289, %296 : vector<64x32xf32>
    %298 = arith.mulf %297, %297 : vector<64x32xf32>
    %cst_100 = arith.constant dense<0.000000e+00> : vector<64xf32>
    %299 = vector.multi_reduction <add>, %298, %cst_100 [1] : vector<64x32xf32> to vector<64xf32>
    %300 = vector.shape_cast %299 : vector<64xf32> to vector<64x1xf32>
    %cst_101 = arith.constant 3.200000e+01 : f32
    %301 = vector.broadcast %cst_101 : f32 to vector<64x1xf32>
    %302 = arith.divf %300, %301 : vector<64x1xf32>
    %303 = vector.broadcast %295 : vector<64x1xf32> to vector<64x32xf32>
    %304 = arith.subf %289, %303 : vector<64x32xf32>
    %cst_102 = arith.constant 9.99999996E-13 : f32
    %305 = vector.broadcast %cst_102 : f32 to vector<64x1xf32>
    %306 = arith.addf %302, %305 : vector<64x1xf32>
    %307 = math.rsqrt %306 : vector<64x1xf32>
    %308 = vector.broadcast %307 : vector<64x1xf32> to vector<64x32xf32>
    %309 = arith.mulf %304, %308 : vector<64x32xf32>
    %310 = vector.broadcast %290 : vector<1x32xf32> to vector<64x32xf32>
    %311 = arith.mulf %309, %310 : vector<64x32xf32>
    %312 = vector.broadcast %291 : vector<1x32xf32> to vector<64x32xf32>
    %313 = arith.addf %311, %312 : vector<64x32xf32>
    %314 = tpu.iota {dimensions = array<i32: 0>} : vector<8x64xi32>
    %315 = tpu.iota {dimensions = array<i32: 1>} : vector<8x64xi32>
    %c3_i32_103 = arith.constant 3 : i32
    %316 = vector.broadcast %c3_i32_103 : i32 to vector<8x64xi32>
    %317 = arith.shli %314, %316 : vector<8x64xi32>
    %318 = arith.cmpi eq, %315, %317 : vector<8x64xi32>
    %319 = arith.extui %318 : vector<8x64xi1> to vector<8x64xi32>
    %320 = arith.sitofp %319 : vector<8x64xi32> to vector<8x64xf32>
    %cst_104 = arith.constant dense<0.000000e+00> : vector<8x32xf32>
    %321 = tpu.matmul %320, %313, %cst_104 {dimension_numbers = #tpu.dot_dimension_numbers<[1], [0], [0], [1], [0, 0, 1, 1], [], []>} : vector<8x64xf32>, vector<64x32xf32>, vector<8x32xf32> -> vector<8x32xf32>
    %c360_105 = arith.constant 360 : index
    %c0_106 = arith.constant 0 : index
    %322 = vector.load %arg2[%c360_105, %c0_106] : memref<424x32xf32, #tpu.memory_space<vmem>>, vector<32x32xf32>
    %cst_107 = arith.constant dense<0.000000e+00> : vector<8x32xf32>
    %323 = tpu.matmul %321, %322, %cst_107 {dimension_numbers = #tpu.dot_dimension_numbers<[1], [0], [0], [1], [0, 0, 1, 1], [], []>} : vector<8x32xf32>, vector<32x32xf32>, vector<8x32xf32> -> vector<8x32xf32>
    %324 = vector.extract_strided_slice %22 {offsets = [2, 0], sizes = [1, 32], strides = [1, 1]} : vector<8x32xf32> to vector<1x32xf32>
    %325 = vector.broadcast %324 : vector<1x32xf32> to vector<8x32xf32>
    %326 = arith.addf %323, %325 : vector<8x32xf32>
    %327 = math.tanh %326 : vector<8x32xf32>
    %c392_108 = arith.constant 392 : index
    %c0_109 = arith.constant 0 : index
    %328 = vector.load %arg2[%c392_108, %c0_109] : memref<424x32xf32, #tpu.memory_space<vmem>>, vector<32x32xf32>
    %cst_110 = arith.constant dense<0.000000e+00> : vector<8x32xf32>
    %329 = tpu.matmul %327, %328, %cst_110 {dimension_numbers = #tpu.dot_dimension_numbers<[1], [0], [0], [1], [0, 0, 1, 1], [], []>} : vector<8x32xf32>, vector<32x32xf32>, vector<8x32xf32> -> vector<8x32xf32>
    %330 = vector.extract_strided_slice %22 {offsets = [3, 0], sizes = [1, 32], strides = [1, 1]} : vector<8x32xf32> to vector<1x32xf32>
    %331 = vector.broadcast %330 : vector<1x32xf32> to vector<8x32xf32>
    %332 = arith.addf %329, %331 : vector<8x32xf32>
    %333 = vector.extract_strided_slice %332 {offsets = [0, 0], sizes = [8, 1], strides = [1, 1]} : vector<8x32xf32> to vector<8x1xf32>
    %334 = tpu.iota {dimensions = array<i32: 0>} : vector<8x4xi32>
    %335 = tpu.iota {dimensions = array<i32: 1>} : vector<8x4xi32>
    %c3_i32_111 = arith.constant 3 : i32
    %336 = vector.broadcast %c3_i32_111 : i32 to vector<8x4xi32>
    %337 = arith.andi %334, %336 : vector<8x4xi32>
    %338 = arith.cmpi eq, %337, %335 : vector<8x4xi32>
    %339 = arith.extui %338 : vector<8x4xi1> to vector<8x4xi32>
    %340 = arith.sitofp %339 : vector<8x4xi32> to vector<8x4xf32>
    %341 = tpu.iota {dimensions = array<i32: 0>} : vector<2x8xi32>
    %342 = tpu.iota {dimensions = array<i32: 1>} : vector<2x8xi32>
    %c2_i32 = arith.constant 2 : i32
    %343 = vector.broadcast %c2_i32 : i32 to vector<2x8xi32>
    %344 = arith.shrsi %342, %343 : vector<2x8xi32>
    %345 = arith.cmpi eq, %344, %341 : vector<2x8xi32>
    %346 = arith.extui %345 : vector<2x8xi1> to vector<2x8xi32>
    %347 = arith.sitofp %346 : vector<2x8xi32> to vector<2x8xf32>
    %348 = vector.broadcast %333 : vector<8x1xf32> to vector<8x4xf32>
    %349 = arith.mulf %348, %340 : vector<8x4xf32>
    %cst_112 = arith.constant dense<0.000000e+00> : vector<2x4xf32>
    %350 = tpu.matmul %347, %349, %cst_112 {dimension_numbers = #tpu.dot_dimension_numbers<[1], [0], [0], [1], [0, 0, 1, 1], [], []>} : vector<2x8xf32>, vector<8x4xf32>, vector<2x4xf32> -> vector<2x4xf32>
    %c0_113 = arith.constant 0 : index
    %c0_114 = arith.constant 0 : index
    %351 = vector.load %arg6[%c0_113, %c0_114] : memref<2x4xf32, #tpu.memory_space<vmem>>, vector<2x4xf32>
    tpu.vector_store %arg6[%c0_113, %c0_114], %350 {strides = array<i32>} : memref<2x4xf32, #tpu.memory_space<vmem>>, vector<2x4xf32>,
    %352 = vector.extract_strided_slice %0 {offsets = [0, 2], sizes = [2, 1], strides = [1, 1]} : vector<64x4xi32> to vector<2x1xi32>
    %353 = tpu.iota {dimensions = array<i32: 1>} : vector<2x4xi32>
    %354 = vector.broadcast %352 : vector<2x1xi32> to vector<2x4xi32>
    %355 = arith.cmpi eq, %353, %354 : vector<2x4xi32>
    %356 = arith.extui %355 : vector<2x4xi1> to vector<2x4xi32>
    %357 = arith.sitofp %356 : vector<2x4xi32> to vector<2x4xf32>
    %cst_115 = arith.constant dense<0xFF800000> : vector<2xf32>
    %358 = vector.multi_reduction <maximumf>, %350, %cst_115 [1] : vector<2x4xf32> to vector<2xf32>
    %359 = vector.shape_cast %358 : vector<2xf32> to vector<2x1xf32>
    %360 = vector.broadcast %359 : vector<2x1xf32> to vector<2x4xf32>
    %361 = arith.subf %350, %360 : vector<2x4xf32>
    %362 = math.exp %361 : vector<2x4xf32>
    %cst_116 = arith.constant dense<0.000000e+00> : vector<2xf32>
    %363 = vector.multi_reduction <add>, %362, %cst_116 [1] : vector<2x4xf32> to vector<2xf32>
    %364 = vector.shape_cast %363 : vector<2xf32> to vector<2x1xf32>
    %365 = math.log %364 : vector<2x1xf32>
    %366 = arith.addf %359, %365 : vector<2x1xf32>
    %367 = arith.mulf %350, %357 : vector<2x4xf32>
    %cst_117 = arith.constant dense<0.000000e+00> : vector<2xf32>
    %368 = vector.multi_reduction <add>, %367, %cst_117 [1] : vector<2x4xf32> to vector<2xf32>
    %369 = vector.shape_cast %368 : vector<2xf32> to vector<2x1xf32>
    %370 = arith.subf %366, %369 : vector<2x1xf32>
    %371 = vector.shape_cast %370 : vector<2x1xf32> to vector<1x2x1xf32>
    %cst_118 = arith.constant dense<0.000000e+00> : vector<1xf32>
    %372 = vector.multi_reduction <add>, %371, %cst_118 [1, 2] : vector<1x2x1xf32> to vector<1xf32>
    %373 = vector.shape_cast %372 : vector<1xf32> to vector<1x1x1xf32>
    %374 = vector.extract %373[0, 0, 0] : f32 from vector<1x1x1xf32>
    %375 = vector.broadcast %374 : f32 to vector<1x1xf32>
    %cst_119 = arith.constant 2.000000e+00 : f32
    %376 = vector.broadcast %cst_119 : f32 to vector<1x1xf32>
    %377 = arith.divf %375, %376 : vector<1x1xf32>
    %c0_120 = arith.constant 0 : index
    %c0_121 = arith.constant 0 : index
    %378 = vector.load %arg5[%c0_120, %c0_121] : memref<1x1xf32, #tpu.memory_space<vmem>>, vector<1x1xf32>
    tpu.vector_store %arg5[%c0_120, %c0_121], %377 {strides = array<i32>} : memref<1x1xf32, #tpu.memory_space<vmem>>, vector<1x1xf32>,
    return
  }
}

</mosaic_0001>

<bundles_post_ra>
// kernel: bert_mc_forward.1
= control target key start
LH: loop header
LB: loop body
LE: loop exit
PB: predicated region body
PF: predicated region fallthrough
CT: control target
= control target key end

     0   :  { %12 = vsyncpa [#allocation3], 0  ;;  %s7031_s0 = inlined_call_operand.vmem [shape: s32[64,4], index: 0, kind: input, shape index: {}]   ;;  %s7032_s1 = inlined_call_operand.vmem [shape: f32[1,128], index: 1, kind: input, shape index: {}]   ;;  %s7033_s2 = inlined_call_operand.hbm [shape: f32[424,32], index: 2, kind: input, shape index: {}]   ;;  %s7034_s3 = inlined_call_operand.hbm [shape: f32[400,16], index: 3, kind: input, shape index: {}]   ;;  %s7035_s4 = inlined_call_operand.vmem [shape: f32[80,64], index: 4, kind: input, shape index: {}]   ;;  %s7036_s5 = inlined_call_operand.hbm [shape: f32[1,1], index: 5, kind: output, shape index: {0}]   ;;  %s7037_s6 = inlined_call_operand.hbm [shape: f32[2,4], index: 6, kind: output, shape index: {1}]  }
   0x1   :  { %13 = vsyncpa [#allocation6], 0 }
   0x2   :  { %14 = vsyncpa [#allocation4], 0 }
   0x3   :  { %15 = vsyncpa [#allocation9], 0  ;;  %s24_s23 = sshll.u32 %s7033_s2, 4  ;;  %s4980_s24 = smov [#allocation2]   ;;  %s25_s23 = int_to_ptr.hbm [resolvable:$true] %s24_s23 }
   0x4   :  { %s26_s25 = sshll.u32 %s4980_s24, 4  ;;  %s37_s28 = sshll.u32 %s7034_s3, 4  ;;  %s27_s25 = int_to_ptr.vmem [resolvable:$true] %s26_s25  ;;  %s38_s28 = int_to_ptr.hbm [resolvable:$true] %s37_s28 }
   0x5   :  { %s4981_s29 = smov 128   ;;  %s4982_s30 = smov 8  }
   0x6   :  { %32 = dma.hbm_to_vmem [thread:$0]  %s25_s23, 6784, %s27_s25, [#allocation3], %s4981_s29, %s4981_s29, %s4982_s30  }
   0x7   :  { %s4983_s7 = smov [#allocation5]  }
   0x8   :  { %s39_s8 = sshll.u32 %s4983_s7, 4  ;;  %s40_s8 = int_to_ptr.vmem [resolvable:$true] %s39_s8 }
   0x9   :  { %45 = dma.hbm_to_vmem [thread:$0]  %s38_s28, 6400, %s40_s8, [#allocation6], %s4981_s29, %s4981_s29, %s4982_s30  }
   0xa   :  { %4972 = dma.done.wait [#allocation3], 6784  }
   0xb   :  { %4973 = vsyncadd [#allocation3], 4294960512 }
   0xc   :  { %4974 = dma.done.wait [#allocation6], 6400  }
   0xd   :  { %4975 = vsyncadd [#allocation6], 4294960896  ;;  %v4984_v0 = vmov 0   ;;  %v57_v1 = vld [vmem:[%s7031_s0 + $0x8] sm:$0xff]  ;;  %v56_v2 = vld [vmem:[%s7031_s0] sm:$0xff]  ;;  %v4985_v7 = vmov 1   ;;  %v64_v36 = vlaneseq }
   0xe   :  { %4606 = vset.pattern.permute.xlu1 %v4984_v0  ;;  %4604 = vset.pattern.permute.xlu0 %v4984_v0  ;;  %v58_v3 = vld [vmem:[%s7031_s0 + $0x10] sm:$0xff]  ;;  %v133_v4 = vadd.s32 128, %v57_v1  ;;  %v132_v5 = vadd.s32 128, %v56_v2  ;;  %v59_v8 = vld [vmem:[%s7031_s0 + $0x18] sm:$0xff]  ;;  %v60_v12 = vld [vmem:[%s7031_s0 + $0x20] sm:$0xff]  ;;  %v4986_v53 = vmov 1.0  }
   0xf   :  { %4608 = vset.pattern.permute.xlu2 %v4984_v0  ;;  %96 = vperm.xlu1 %4606, %v57_v1   ;;  %v134_v6 = vadd.s32 128, %v58_v3  ;;  %v275_v9 = vld [vmem:[#allocation2 + $0x78] sm:$0xff]  ;;  %v135_v10 = vadd.s32 128, %v59_v8  ;;  %v274_v11 = vld [vmem:[#allocation2 + $0x70] sm:$0xff]  ;;  %v273_v13 = vld [vmem:[#allocation2 + $0x68] sm:$0xff]  ;;  %v136_v17 = vadd.s32 128, %v60_v12 }
  0x10   :  { %93 = vperm.xlu0 %4604, %v56_v2   ;;  %99 = vperm.xlu2 %4608, %v58_v3   ;;  %v62_v14 = vld [vmem:[%s7031_s0 + $0x30] sm:$0xff]  ;;  %v272_v15 = vld [vmem:[#allocation2 + $0x60] sm:$0xff]  ;;  %v271_v16 = vld [vmem:[#allocation2 + $0x58] sm:$0xff]  ;;  %v5067_v37 = vshrl.u32 %v64_v36, 7  ;;  %v5078_v44 = vand.u32 127, %v64_v36  ;;  %vm278_vm9 = vcmask 130048  }
  0x11   :  { %303 = vmatpush.msra.mxu0 %v275_v9  ;;  %v138_v18 = vadd.s32 128, %v62_v14  ;;  %v270_v19 = vld [vmem:[#allocation2 + $0x50] sm:$0xff]  ;;  %v269_v20 = vld [vmem:[#allocation2 + $0x48] sm:$0xff]  ;;  %v268_v22 = vld [vmem:[#allocation2 + $0x40] sm:$0xff]  ;;  %v7038_v54 = vmov 0.0   ;;  %s4286_s22 = sshll.u32 %s7037_s6, 4  ;;  %s4287_s22 = int_to_ptr.hbm [resolvable:$true] %s4286_s22 }
  0x12   :  { %v61_v21 = vld [vmem:[%s7031_s0 + $0x28] sm:$0xff]  ;;  %v267_v24 = vld [vmem:[#allocation2 + $0x38] sm:$0xff]  ;;  %v266_v25 = vld [vmem:[#allocation2 + $0x30] sm:$0xff]  ;;  %7048 = vst [vmem:[#allocation14_spill] sm:$0xff] %v5067_v37  ;;  %v5070_v39 = vadd.s32 8, %v5067_v37  ;;  %v5076_v43 = vadd.s32 16, %v5067_v37 }
  0x13   :  { %304 = vmatpush.msra.mxu0 %v274_v11  ;;  %v137_v23 = vadd.s32 128, %v61_v21  ;;  %v63_v26 = vld [vmem:[%s7031_s0 + $0x38] sm:$0xff]  ;;  %v265_v28 = vld [vmem:[#allocation2 + $0x28] sm:$0xff]  ;;  %v264_v29 = vld [vmem:[#allocation2 + $0x20] sm:$0xff]  ;;  %7049 = vst [vmem:[#allocation15_spill] sm:$0xff] %v5078_v44  ;;  %v5082_v48 = vadd.s32 128, %v5078_v44 }
  0x14   :  { %v139_v27 = vadd.s32 128, %v63_v26  ;;  %v263_v30 = vld [vmem:[#allocation2 + $0x18] sm:$0xff]  ;;  %v262_v31 = vld [vmem:[#allocation2 + $0x10] sm:$0xff]  ;;  %v261_v32 = vld [vmem:[#allocation2 + $0x8] sm:$0xff]  ;;  %v77_v42 = vand.u32 7, %v5070_v39  ;;  %v78_v47 = vand.u32 7, %v5076_v43 }
  0x15   :  { %305 = vmatpush.msra.mxu0 %v273_v13  ;;  %v260_v33 = vld [vmem:[#allocation2] sm:$0xff]  ;;  %v277_v34 = vld [vmem:[#allocation2 + $0x88] sm:$0xff]  ;;  %v5094_v52 = vadd.s32 24, %v5067_v37  ;;  %v5106_v60 = vadd.s32 32, %v5067_v37  ;;  %v5118_v3 = vadd.s32 40, %v5067_v37  ;;  %v5130_v9 = vadd.s32 48, %v5067_v37 }
  0x16   :  { %4582 = vmatpush.msra.mxu1 %v277_v34  ;;  %v276_v35 = vld [vmem:[#allocation2 + $0x80] sm:$0xff]  ;;  %v85_v45 = vadd.s32 136, %v77_v42  ;;  %v86_v51 = vadd.s32 136, %v78_v47  ;;  %s4993_s6 = smov [#allocation7]   ;;  %s4275_s25 = sshll.u32 %s7036_s5, 4  ;;  %s4276_s25 = int_to_ptr.hbm [resolvable:$true] %s4275_s25 }
  0x17   :  { %4607 = vset.pattern.permute.xlu1 %v4985_v7  ;;  %306 = vmatpush.msra.mxu0 %v272_v15  ;;  %v79_v56 = vand.u32 7, %v5094_v52  ;;  %v80_v62 = vand.u32 7, %v5106_v60  ;;  %v82_v11 = vand.u32 7, %v5130_v9  ;;  %v5142_v15 = vadd.s32 56, %v5067_v37  ;;  %s4273_s23 = sshll.u32 %s4993_s6, 4  ;;  %s4274_s23 = int_to_ptr.vmem [resolvable:$true] %s4273_s23 }
  0x18   :  { %4605 = vset.pattern.permute.xlu0 %v4985_v7  ;;  %144 = vperm.xlu1 %4607, %v133_v4   ;;  %vm199_vm4 = vcmp.eq.s32.totalorder %v5082_v48, %v85_v45  ;;  %vm201_vm12 = vcmp.eq.s32.totalorder %v5082_v48, %v86_v51 }
  0x19   :  { %141 = vperm.xlu0 %4605, %v132_v5   ;;  %4610 = vset.pattern.permute.xlu2 %v4985_v7  ;;  %v87_v59 = vadd.s32 136, %v79_v56  ;;  %v88_v2 = vadd.s32 136, %v80_v62 }
  0x1a   :  { %147 = vperm.xlu2 %4610, %v134_v6   ;;  %307 = vmatpush.msra.mxu0 %v271_v16  ;;  %v81_v6 = vand.u32 7, %v5118_v3 }
  0x1b   :  { %4583 = vmatpush.msra.mxu1 %v276_v35 }
  0x1c   :  { %308 = vmatpush.msra.mxu0 %v270_v19 }
  0x1e   :  { %309 = vmatpush.msra.mxu0 %v269_v20 }
  0x20   :  { %4609 = vset.pattern.permute.xlu1 %v4984_v0  ;;  %310 = vmatpush.msra.mxu0 %v268_v22 }
  0x21   :  { %4611 = vset.pattern.permute.xlu0 %v4984_v0  ;;  %102 = vperm.xlu1 %4609, %v59_v8   ;;  %v89_v8 = vadd.s32 136, %v81_v6 }
  0x22   :  { %105 = vperm.xlu0 %4611, %v60_v12   ;;  %150 = vperm.xlu2 %4610, %v135_v10  }
  0x23   :  { %311 = vmatpush.msra.mxu0 %v267_v24 }
  0x25   :  { %312 = vmatpush.msra.mxu0 %v266_v25 }
  0x27   :  { %313 = vmatpush.msra.mxu0 %v265_v28 }
  0x29   :  { %4612 = vset.pattern.permute.xlu1 %v4985_v7  ;;  %314 = vmatpush.msra.mxu0 %v264_v29 }
  0x2a   :  { %4614 = vset.pattern.permute.xlu0 %v4985_v7  ;;  %153 = vperm.xlu1 %4612, %v136_v17   ;;  %v83_v17 = vand.u32 7, %v5142_v15 }
  0x2b   :  { %159 = vperm.xlu0 %4614, %v138_v18   ;;  %4613 = vset.pattern.permute.xlu2 %v4984_v0 }
  0x2c   :  { %108 = vperm.xlu2 %4613, %v61_v21   ;;  %315 = vmatpush.msra.mxu0 %v263_v30  ;;  %v91_v20 = vadd.s32 136, %v83_v17 }
  0x2e   :  { %316 = vmatpush.msra.mxu0 %v262_v31 }
  0x30   :  { %317 = vmatpush.msra.mxu0 %v261_v32 }
  0x32   :  { %156 = vperm.xlu1 %4612, %v137_v23   ;;  %318 = vmatpush.msra.mxu0 %v260_v33  ;;  %v76_v23 = vand.u32 7, %v5067_v37 }
  0x33   :  { %4617 = vset.pattern.permute.xlu0 %v4984_v0 }
  0x34   :  { %111 = vperm.xlu2 %4613, %v62_v14   ;;  %358 = vmatpush.msrb.mxu0 %v277_v34  ;;  %v90_v14 = vadd.s32 136, %v82_v11  ;;  %v84_v24 = vadd.s32 136, %v76_v23 }
  0x36   :  { %359 = vmatpush.msrb.mxu0 %v276_v35 }
  0x3a   :  { %4615 = vset.pattern.permute.xlu1 %v4984_v0 }
  0x3b   :  { %114 = vperm.xlu1 %4615, %v63_v26  }
  0x3c   :  { %4616 = vset.pattern.permute.xlu2 %v4985_v7 }
  0x3d   :  { %162 = vperm.xlu2 %4616, %v139_v27  }
  0x6a   :  { %v100_v38 = vpop.permute.xlu2 %99 }
  0x6b   :  { %vm121_vm5 = vcmp.eq.s32.totalorder %v5082_v48, %v100_v38 }
  0x74   :  { %v148_v46 = vpop.permute.xlu2 %147 }
  0x75   :  { %vm169_vm7 = vcmp.eq.s32.totalorder %v5082_v48, %v148_v46 }
  0x76   :  { %vm185_vm11 = vmor %vm121_vm5, %vm169_vm7  ;;  %vm120_vm5 = vcmp.eq.s32.totalorder %v5078_v44, %v100_v38 }
  0x77   :  { %vm217_vm15 = vmor %vm185_vm11, %vm201_vm12 }
  0x78   :  { %v4307_v61 = vsel %vm217_vm15, 1.0, %v7038_v54 }
  0x7c   :  { %v151_v57 = vpop.permute.xlu2 %150 }
  0x7d   :  { %vm170_vm15 = vcmp.eq.s32.totalorder %v5078_v44, %v151_v57 }
  0x81   :  { %v97_v41 = vpop.permute.xlu1 %96 }
  0x82   :  { %v5072_v40 = vpop.permute.xlu0 %93  ;;  %vm119_vm0 = vcmp.eq.s32.totalorder %v5082_v48, %v97_v41  ;;  %vm118_vm13 = vcmp.eq.s32.totalorder %v5078_v44, %v97_v41 }
  0x83   :  { %vm116_vm3 = vcmp.eq.s32.totalorder %v5078_v44, %v5072_v40 }
  0x86   :  { %v109_v5 = vpop.permute.xlu2 %108 }
  0x8a   :  { %v145_v49 = vpop.permute.xlu1 %144 }
  0x8b   :  { %v5084_v50 = vpop.permute.xlu0 %141  ;;  %vm167_vm1 = vcmp.eq.s32.totalorder %v5082_v48, %v145_v49  ;;  %vm166_vm14 = vcmp.eq.s32.totalorder %v5078_v44, %v145_v49 }
  0x8c   :  { %vm164_vm2 = vcmp.eq.s32.totalorder %v5078_v44, %v5084_v50  ;;  %vm183_vm8 = vmor %vm119_vm0, %vm167_vm1  ;;  %vm171_vm1 = vcmp.eq.s32.totalorder %v5082_v48, %v151_v57 }
  0x8d   :  { %vm180_vm6 = vmor %vm116_vm3, %vm164_vm2 }
  0x8e   :  { %4318 = vmatmul.msk.f32.vlgmr.msra.gmra.mxu0 %vm180_vm6, %v4986_v53  ;;  %vm215_vm10 = vmor %vm183_vm8, %vm199_vm4  ;;  %vm203_vm4 = vcmp.eq.s32.totalorder %v5082_v48, %v87_v59  ;;  %vm168_vm6 = vcmp.eq.s32.totalorder %v5078_v44, %v148_v46  ;;  %v112_v12 = vpop.permute.xlu2 %111 }
  0x8f   :  { %v4305_v55 = vsel %vm215_vm10, 1.0, %v7038_v54  ;;  %vm182_vm0 = vmor %vm118_vm13, %vm166_vm14  ;;  %vm205_vm13 = vcmp.eq.s32.totalorder %v5082_v48, %v88_v2 }
  0x90   :  { %4327 = vmatmul.msk.f32.vlgmr.msra.gmra.mxu1 %vm278_vm9, %v4305_v55  ;;  %vm184_vm8 = vmor %vm120_vm5, %vm168_vm6 }
  0x93   :  { %v103_v58 = vpop.permute.xlu1 %102 }
  0x94   :  { %vm123_vm2 = vcmp.eq.s32.totalorder %v5082_v48, %v103_v58  ;;  %v106_v63 = vpop.permute.xlu0 %105  ;;  %vm122_vm14 = vcmp.eq.s32.totalorder %v5078_v44, %v103_v58  ;;  %v4988_v58 = vmov 32.0  }
  0x95   :  { %vm187_vm3 = vmor %vm123_vm2, %vm171_vm1  ;;  %vm125_vm11 = vcmp.eq.s32.totalorder %v5082_v48, %v106_v63  ;;  %vm127_vm2 = vcmp.eq.s32.totalorder %v5082_v48, %v109_v5  ;;  %4622 = vrcp.f32 %v4988_v58 }
  0x96   :  { %4319 = vmatmul.msk.f32.gmra.mxu0 %vm182_vm0, %v4986_v53  ;;  %vm219_vm7 = vmor %vm187_vm3, %vm203_vm4  ;;  %vm124_vm4 = vcmp.eq.s32.totalorder %v5078_v44, %v106_v63 }
  0x97   :  { %v4309_v4 = vsel %vm219_vm7, 1.0, %v7038_v54  ;;  %vm186_vm1 = vmor %vm122_vm14, %vm170_vm15  ;;  %vm207_vm7 = vcmp.eq.s32.totalorder %v5082_v48, %v89_v8  ;;  %vm209_vm14 = vcmp.eq.s32.totalorder %v5082_v48, %v90_v14  ;;  %vm126_vm15 = vcmp.eq.s32.totalorder %v5078_v44, %v109_v5  ;;  %v163_v18 = vpop.permute.xlu2 %162 }
  0x98   :  { %4328 = vmatmul.msk.f32.gmra.mxu1 %vm278_vm9, %v4307_v61 }
  0x9b   :  { %v4623_v59 = vpop.eup %4622 }
  0x9c   :  { %v154_v1 = vpop.permute.xlu1 %153  ;;  %v412_v61 = vmul.f32 32.0, %v4623_v59 }
  0x9d   :  { %vm173_vm10 = vcmp.eq.s32.totalorder %v5082_v48, %v154_v1  ;;  %vm172_vm5 = vcmp.eq.s32.totalorder %v5078_v44, %v154_v1  ;;  %v160_v13 = vpop.permute.xlu0 %159 }
  0x9e   :  { %4320 = vmatmul.msk.f32.gmra.mxu0 %vm184_vm8, %v4986_v53  ;;  %vm189_vm12 = vmor %vm125_vm11, %vm173_vm10  ;;  %vm129_vm11 = vcmp.eq.s32.totalorder %v5082_v48, %v112_v12  ;;  %v413_v62 = vsub.f32 1.0, %v412_v61  ;;  %v784_v61 = vld [vmem:[#allocation5 + $0x48] sm:$0xff] }
  0x9f   :  { %vm221_vm0 = vmor %vm189_vm12, %vm205_vm13  ;;  %vm177_vm12 = vcmp.eq.s32.totalorder %v5082_v48, %v160_v13 }
  0xa0   :  { %4329 = vmatmul.msk.f32.gmra.mxu1 %vm278_vm9, %v4309_v4  ;;  %v4311_v10 = vsel %vm221_vm0, 1.0, %v7038_v54  ;;  %vm188_vm8 = vmor %vm124_vm4, %vm172_vm5  ;;  %v414_v63 = vmul.f32 %v4623_v59, %v413_v62  ;;  %v922_v62 = vld [vmem:[#allocation5 + $0xa8] sm:$0xff] }
  0xa1   :  { %vm193_vm13 = vmor %vm129_vm11, %vm177_vm12 }
  0xa2   :  { %v415_v1 = vadd.f32 %v4623_v59, %v414_v63  ;;  %v667_v63 = vld [vmem:[#allocation5] sm:$0xff] }
  0xa4   :  { %v157_v7 = vpop.permute.xlu1 %156 }
  0xa5   :  { %vm175_vm3 = vcmp.eq.s32.totalorder %v5082_v48, %v157_v7  ;;  %vm174_vm0 = vcmp.eq.s32.totalorder %v5078_v44, %v157_v7 }
  0xa6   :  { %4321 = vmatmul.msk.f32.gmra.mxu0 %vm186_vm1, %v4986_v53  ;;  %vm191_vm6 = vmor %vm127_vm2, %vm175_vm3  ;;  %vm179_vm3 = vcmp.eq.s32.totalorder %v5082_v48, %v163_v18 }
  0xa7   :  { %vm223_vm10 = vmor %vm191_vm6, %vm207_vm7  ;;  %vm211_vm6 = vcmp.eq.s32.totalorder %v5082_v48, %v91_v20  ;;  %vm176_vm7 = vcmp.eq.s32.totalorder %v5078_v44, %v160_v13 }
  0xa8   :  { %4330 = vmatmul.msk.f32.gmra.mxu1 %vm278_vm9, %v4311_v10  ;;  %v4313_v16 = vsel %vm223_vm10, 1.0, %v7038_v54  ;;  %vm225_vm1 = vmor %vm193_vm13, %vm209_vm14  ;;  %vm178_vm13 = vcmp.eq.s32.totalorder %v5078_v44, %v163_v18 }
  0xa9   :  { %vm190_vm2 = vmor %vm126_vm15, %vm174_vm0  ;;  %v4315_v21 = vsel %vm225_vm1, 1.0, %v7038_v54  ;;  %vm165_vm15 = vcmp.eq.s32.totalorder %v5082_v48, %v5084_v50  ;;  %vm117_vm0 = vcmp.eq.s32.totalorder %v5082_v48, %v5072_v40 }
  0xaa   :  { %vm181_vm1 = vmor %vm117_vm0, %vm165_vm15 }
  0xad   :  { %v115_v19 = vpop.permute.xlu1 %114 }
  0xae   :  { %4322 = vmatmul.msk.f32.gmra.mxu0 %vm188_vm8, %v4986_v53  ;;  %vm131_vm4 = vcmp.eq.s32.totalorder %v5082_v48, %v115_v19  ;;  %vm128_vm8 = vcmp.eq.s32.totalorder %v5078_v44, %v112_v12  ;;  %vm130_vm12 = vcmp.eq.s32.totalorder %v5078_v44, %v115_v19 }
  0xaf   :  { %vm195_vm5 = vmor %vm131_vm4, %vm179_vm3  ;;  %vm386_vm4 = vcmask 261120  }
  0xb0   :  { %4331 = vmatmul.msk.f32.gmra.mxu1 %vm278_vm9, %v4313_v16  ;;  %vm227_vm10 = vmor %vm195_vm5, %vm211_vm6  ;;  %vm416_vm5 = vweird.f32 %v4623_v59 }
  0xb1   :  { %vm192_vm11 = vmor %vm128_vm8, %vm176_vm7  ;;  %v4317_v22 = vsel %vm227_vm10, 1.0, %v7038_v54  ;;  %v5181_v2 = vsel %vm416_vm5, %v4623_v59, %v415_v1  ;;  %v668_v59 = vld [vmem:[#allocation5 + $0x8] sm:$0xff]  ;;  %v783_v1 = vld [vmem:[#allocation5 + $0x40] sm:$0xff] }
  0xb2   :  { %vm194_vm14 = vmor %vm130_vm12, %vm178_vm13  ;;  %7050 = vst [vmem:[#allocation16_spill] sm:$0xff] %v5181_v2 }
  0xb6   :  { %4323 = vmatmul.msk.f32.gmra.mxu0 %vm190_vm2, %v4986_v53  ;;  %vm197_vm2 = vcmp.eq.s32.totalorder %v5082_v48, %v84_v24 }
  0xb7   :  { %vm213_vm3 = vmor %vm181_vm1, %vm197_vm2 }
  0xb8   :  { %4332 = vmatmul.msk.f32.gmra.mxu1 %vm278_vm9, %v4315_v21  ;;  %v4303_v25 = vsel %vm213_vm3, 1.0, %v7038_v54 }
  0xbe   :  { %4324 = vmatmul.msk.f32.gmra.mxu0 %vm192_vm11, %v4986_v53 }
  0xc0   :  { %4333 = vmatmul.msk.f32.gmra.mxu1 %vm278_vm9, %v4317_v22 }
  0xc6   :  { %4325 = vmatmul.msk.f32.gmra.mxu0 %vm194_vm14, %v4986_v53 }
  0xce   :  { %4326 = vmatmul.msk.f32.vlgmr.msrb.gmra.mxu0 %vm278_vm9, %v4303_v25 }
 0x10b   :  { %v320_v26 = vpop.f32.mrf.mxu0 }
 0x10d   :  { %v364_v27 = vpop.f32.mrf.mxu1 }
 0x113   :  { %v323_v28 = vpop.f32.mrf.mxu0 }
 0x114   :  { %v365_v29 = vadd.f32 %v364_v27, %v323_v28 }
 0x115   :  { %v367_v30 = vpop.f32.mrf.mxu1 }
 0x116   :  { %v390_v31 = vsel %vm386_vm4, %v365_v29, 0.0 }
 0x117   :  { %391 = vadd.xlane.f32.xlu2 %v390_v31 }
 0x11b   :  { %v326_v32 = vpop.f32.mrf.mxu0 }
 0x11c   :  { %v368_v33 = vadd.f32 %v367_v30, %v326_v32 }
 0x11d   :  { %v370_v35 = vpop.f32.mrf.mxu1 }
 0x11e   :  { %v393_v34 = vsel %vm386_vm4, %v368_v33, 0.0 }
 0x11f   :  { %394 = vadd.xlane.f32.xlu0 %v393_v34 }
 0x123   :  { %v329_v36 = vpop.f32.mrf.mxu0 }
 0x124   :  { %v371_v38 = vadd.f32 %v370_v35, %v329_v36 }
 0x125   :  { %v373_v41 = vpop.f32.mrf.mxu1 }
 0x126   :  { %v396_v40 = vsel %vm386_vm4, %v371_v38, 0.0 }
 0x127   :  { %397 = vadd.xlane.f32.xlu2 %v396_v40 }
 0x12b   :  { %v332_v42 = vpop.f32.mrf.mxu0 }
 0x12c   :  { %v374_v56 = vadd.f32 %v373_v41, %v332_v42 }
 0x12d   :  { %v376_v45 = vpop.f32.mrf.mxu1 }
 0x12e   :  { %v399_v57 = vsel %vm386_vm4, %v374_v56, 0.0 }
 0x133   :  { %v335_v46 = vpop.f32.mrf.mxu0 }
 0x134   :  { %v377_v47 = vadd.f32 %v376_v45, %v335_v46 }
 0x136   :  { %v402_v48 = vsel %vm386_vm4, %v377_v47, 0.0 }
 0x137   :  { %403 = vadd.xlane.f32.xlu2 %v402_v48 }
 0x13b   :  { %v338_v49 = vpop.f32.mrf.mxu0 }
 0x143   :  { %v341_v50 = vpop.f32.mrf.mxu0 }
 0x14b   :  { %v361_v51 = vpop.f32.mrf.mxu0 }
 0x14c   :  { %v362_v53 = vadd.f32 %v361_v51, %v320_v26 }
 0x14e   :  { %v387_v55 = vsel %vm386_vm4, %v362_v53, 0.0 }
 0x14f   :  { %388 = vadd.xlane.f32.xlu1 %v387_v55  ;;  %v786_v55 = vld [vmem:[#allocation5 + $0x58] sm:$0xff] }
 0x150   :  { %800 = vmatpush.msrb.mxu1 %v786_v55 }
 0x157   :  { %400 = vadd.xlane.f32.xlu1 %v399_v57  ;;  %v923_v57 = vld [vmem:[#allocation5 + $0xb0] sm:$0xff] }
 0x18a   :  { %v392_v4 = vpop.xlane.xlu2 %391 }
 0x18b   :  { %v419_v5 = vmul.f32 %v5181_v2, %v392_v4  ;;  %v921_v4 = vld [vmem:[#allocation5 + $0xa0] sm:$0xff] }
 0x18d   :  { %v5184_v6 = vsub.f32 %v365_v29, %v419_v5  ;;  %v379_v29 = vpop.f32.mrf.mxu1 }
 0x18e   :  { %v5219_v40 = vadd.f32 %v379_v29, %v338_v49  ;;  %v924_v49 = vld [vmem:[#allocation5 + $0xb8] sm:$0xff] }
 0x18f   :  { %v435_v7 = vmul.f32 %v5184_v6, %v5184_v6  ;;  %938 = vmatpush.msra.mxu0 %v924_v49 }
 0x190   :  { %v405_v42 = vsel %vm386_vm4, %v5219_v40, 0.0 }
 0x191   :  { %v445_v8 = vsel %vm386_vm4, %v435_v7, 0.0  ;;  %939 = vmatpush.msra.mxu0 %v923_v57 }
 0x192   :  { %446 = vadd.xlane.f32.xlu1 %v445_v8  ;;  %v395_v10 = vpop.xlane.xlu0 %394 }
 0x193   :  { %v420_v11 = vmul.f32 %v5181_v2, %v395_v10  ;;  %940 = vmatpush.msra.mxu0 %v922_v62 }
 0x195   :  { %v5190_v12 = vsub.f32 %v368_v33, %v420_v11  ;;  %941 = vmatpush.msra.mxu0 %v921_v4 }
 0x197   :  { %v436_v13 = vmul.f32 %v5190_v12, %v5190_v12 }
 0x199   :  { %v448_v14 = vsel %vm386_vm4, %v436_v13, 0.0 }
 0x19a   :  { %449 = vadd.xlane.f32.xlu2 %v448_v14  ;;  %v398_v16 = vpop.xlane.xlu2 %397 }
 0x19b   :  { %v421_v24 = vmul.f32 %v5181_v2, %v398_v16 }
 0x19d   :  { %v5207_v27 = vsub.f32 %v371_v38, %v421_v24  ;;  %v382_v38 = vpop.f32.mrf.mxu1 }
 0x19e   :  { %v5221_v41 = vadd.f32 %v382_v38, %v341_v50  ;;  %v669_v50 = vld [vmem:[#allocation5 + $0x10] sm:$0xff] }
 0x19f   :  { %v437_v33 = vmul.f32 %v5207_v27, %v5207_v27 }
 0x1a0   :  { %v408_v45 = vsel %vm386_vm4, %v5221_v41, 0.0 }
 0x1a1   :  { %v451_v35 = vsel %vm386_vm4, %v437_v33, 0.0 }
 0x1aa   :  { %v404_v17 = vpop.xlane.xlu2 %403 }
 0x1ab   :  { %v423_v18 = vmul.f32 %v5181_v2, %v404_v17 }
 0x1ad   :  { %v5196_v19 = vsub.f32 %v377_v47, %v423_v18 }
 0x1af   :  { %v439_v20 = vmul.f32 %v5196_v19, %v5196_v19 }
 0x1b1   :  { %v457_v21 = vsel %vm386_vm4, %v439_v20, 0.0 }
 0x1b2   :  { %458 = vadd.xlane.f32.xlu2 %v457_v21 }
 0x1c2   :  { %v389_v22 = vpop.xlane.xlu1 %388 }
 0x1c3   :  { %v418_v23 = vmul.f32 %v5181_v2, %v389_v22 }
 0x1c5   :  { %v5203_v25 = vsub.f32 %v362_v53, %v418_v23  ;;  %v670_v53 = vld [vmem:[#allocation5 + $0x18] sm:$0xff] }
 0x1c6   :  { %708 = vmatpush.msra.mxu2 %v670_v53  ;;  %4584 = vmatpush.msra.mxu3 %v670_v53 }
 0x1c7   :  { %v434_v26 = vmul.f32 %v5203_v25, %v5203_v25 }
 0x1c8   :  { %709 = vmatpush.msra.mxu2 %v669_v50  ;;  %4585 = vmatpush.msra.mxu3 %v669_v50 }
 0x1c9   :  { %v442_v28 = vsel %vm386_vm4, %v434_v26, 0.0 }
 0x1ca   :  { %443 = vadd.xlane.f32.xlu0 %v442_v28  ;;  %v401_v30 = vpop.xlane.xlu1 %400  ;;  %710 = vmatpush.msra.mxu2 %v668_v59 }
 0x1cb   :  { %v422_v31 = vmul.f32 %v5181_v2, %v401_v30  ;;  %4586 = vmatpush.msra.mxu3 %v668_v59 }
 0x1cc   :  { %711 = vmatpush.msra.mxu2 %v667_v63 }
 0x1cd   :  { %v5211_v32 = vsub.f32 %v374_v56, %v422_v31  ;;  %v785_v56 = vld [vmem:[#allocation5 + $0x50] sm:$0xff]  ;;  %4587 = vmatpush.msra.mxu3 %v667_v63 }
 0x1ce   :  { %801 = vmatpush.msrb.mxu1 %v785_v56 }
 0x1cf   :  { %v438_v34 = vmul.f32 %v5211_v32, %v5211_v32 }
 0x1d0   :  { %802 = vmatpush.msrb.mxu1 %v784_v61 }
 0x1d1   :  { %v454_v36 = vsel %vm386_vm4, %v438_v34, 0.0 }
 0x1d2   :  { %452 = vadd.xlane.f32.xlu0 %v451_v35  ;;  %455 = vadd.xlane.f32.xlu1 %v454_v36 }
 0x1d3   :  { %803 = vmatpush.msrb.mxu1 %v783_v1 }
 0x1da   :  { %406 = vadd.xlane.f32.xlu0 %v405_v42  ;;  %409 = vadd.xlane.f32.xlu1 %v408_v45 }
 0x205   :  { %v447_v46 = vpop.xlane.xlu1 %446 }
 0x206   :  { %v467_v47 = vmul.f32 %v447_v46, %v5181_v2 }
 0x208   :  { %v5228_v48 = vadd.f32 1e-12, %v467_v47  ;;  %v385_v47 = vld [vmem:[#allocation2 + $0x90] sm:$0xff] }
 0x209   :  { %v5267_v61 = vperm.slane %v385_v47, 0 }
 0x20a   :  { %4624 = vrsqrt.f32 %v5228_v48  ;;  %vm498_vm11 = vweird.f32 %v5228_v48 }
 0x20d   :  { %v450_v51 = vpop.xlane.xlu2 %449 }
 0x20e   :  { %v468_v58 = vmul.f32 %v450_v51, %v5181_v2 }
 0x210   :  { %v5232_v5 = vadd.f32 1e-12, %v468_v58  ;;  %v4625_v8 = vpop.eup %4624 }
 0x211   :  { %v493_v13 = vmul.f32 %v4625_v8, %v5228_v48  ;;  %vm499_vm6 = vweird.f32 %v4625_v8 }
 0x212   :  { %4626 = vrsqrt.f32 %v5232_v5  ;;  %vm500_vm12 = vmor %vm498_vm11, %vm499_vm6  ;;  %vm508_vm14 = vweird.f32 %v5232_v5 }
 0x213   :  { %v494_v14 = vmul.f32 %v4625_v8, %v493_v13 }
 0x215   :  { %v495_v24 = vmul.f32 0.5, %v494_v14  ;;  %v5277_v14 = vperm.slane %v385_v47, 1 }
 0x217   :  { %v496_v33 = vsub.f32 1.5, %v495_v24 }
 0x218   :  { %v5237_v18 = vpop.eup %4626 }
 0x219   :  { %v503_v26 = vmul.f32 %v5237_v18, %v5232_v5  ;;  %v497_v50 = vmul.f32 %v4625_v8, %v496_v33  ;;  %vm509_vm13 = vweird.f32 %v5237_v18 }
 0x21a   :  { %vm510_vm15 = vmor %vm508_vm14, %vm509_vm13 }
 0x21b   :  { %v504_v34 = vmul.f32 %v5237_v18, %v503_v26 }
 0x21d   :  { %v505_v56 = vmul.f32 0.5, %v504_v34 }
 0x225   :  { %v459_v30 = vpop.xlane.xlu2 %458 }
 0x226   :  { %v471_v51 = vmul.f32 %v459_v30, %v5181_v2 }
 0x228   :  { %v5271_v62 = vadd.f32 1e-12, %v471_v51 }
 0x23d   :  { %v444_v7 = vpop.xlane.xlu0 %443 }
 0x23e   :  { %v466_v10 = vmul.f32 %v444_v7, %v5181_v2  ;;  %v501_v7 = vsel %vm500_vm12, %v4625_v8, %v497_v50 }
 0x240   :  { %v474_v11 = vadd.f32 1e-12, %v466_v10  ;;  %v506_v10 = vsub.f32 1.5, %v505_v56 }
 0x242   :  { %4628 = vrsqrt.f32 %v474_v11  ;;  %vm488_vm8 = vweird.f32 %v474_v11 }
 0x245   :  { %v456_v16 = vpop.xlane.xlu1 %455  ;;  %v453_v17 = vpop.xlane.xlu0 %452 }
 0x246   :  { %v469_v20 = vmul.f32 %v453_v17, %v5181_v2  ;;  %v470_v22 = vmul.f32 %v456_v16, %v5181_v2  ;;  %v563_v16 = vmul.f32 %v501_v7, %v5184_v6  ;;  %v507_v17 = vmul.f32 %v5237_v18, %v506_v10 }
 0x248   :  { %v4629_v21 = vpop.eup %4628  ;;  %v5241_v23 = vadd.f32 1e-12, %v469_v20  ;;  %v5246_v31 = vadd.f32 1e-12, %v470_v22  ;;  %v572_v6 = vmul.f32 %v5267_v61, %v563_v16 }
 0x249   :  { %v483_v28 = vmul.f32 %v4629_v21, %v474_v11  ;;  %vm489_vm7 = vweird.f32 %v4629_v21 }
 0x24a   :  { %4630 = vrsqrt.f32 %v5241_v23  ;;  %vm490_vm10 = vmor %vm488_vm8, %vm489_vm7  ;;  %vm518_vm1 = vweird.f32 %v5241_v23  ;;  %vm528_vm5 = vweird.f32 %v5246_v31  ;;  %vm538_vm8 = vweird.f32 %v5271_v62 }
 0x24b   :  { %v484_v29 = vmul.f32 %v4629_v21, %v483_v28  ;;  %4632 = vrsqrt.f32 %v5246_v31  ;;  %v5298_v28 = vadd.f32 %v5277_v14, %v572_v6 }
 0x24c   :  { %4634 = vrsqrt.f32 %v5271_v62 }
 0x24d   :  { %v485_v35 = vmul.f32 0.5, %v484_v29  ;;  %v410_v36 = vpop.xlane.xlu1 %409  ;;  %v407_v38 = vpop.xlane.xlu0 %406 }
 0x24e   :  { %v425_v42 = vmul.f32 %v5181_v2, %v410_v36  ;;  %v424_v45 = vmul.f32 %v5181_v2, %v407_v38 }
 0x24f   :  { %v486_v46 = vsub.f32 1.5, %v485_v35 }
 0x250   :  { %v5254_v53 = vsub.f32 %v5221_v41, %v425_v42  ;;  %v5257_v55 = vsub.f32 %v5219_v40, %v424_v45  ;;  %v5259_v49 = vpop.eup %4630  ;;  %v830_v42 = vld [vmem:[#allocation5 + $0x68] sm:$0xff] }
 0x251   :  { %v487_v57 = vmul.f32 %v4629_v21, %v486_v46  ;;  %v513_v58 = vmul.f32 %v5259_v49, %v5241_v23  ;;  %v4633_v13 = vpop.eup %4632  ;;  %vm519_vm0 = vweird.f32 %v5259_v49  ;;  %v829_v46 = vld [vmem:[#allocation5 + $0x60] sm:$0xff] }
 0x252   :  { %v441_v59 = vmul.f32 %v5254_v53, %v5254_v53  ;;  %v440_v41 = vmul.f32 %v5257_v55, %v5257_v55  ;;  %v523_v8 = vmul.f32 %v4633_v13, %v5246_v31  ;;  %v4635_v26 = vpop.eup %4634  ;;  %vm520_vm2 = vmor %vm518_vm1, %vm519_vm0  ;;  %vm529_vm3 = vweird.f32 %v4633_v13 }
 0x253   :  { %v491_v40 = vsel %vm490_vm10, %v4629_v21, %v487_v57  ;;  %v514_v11 = vmul.f32 %v5259_v49, %v513_v58  ;;  %v511_v21 = vsel %vm510_vm15, %v5237_v18, %v507_v17  ;;  %v533_v30 = vmul.f32 %v4635_v26, %v5271_v62  ;;  %v832_v18 = vld [vmem:[#allocation5 + $0x78] sm:$0xff]  ;;  %vm530_vm6 = vmor %vm528_vm5, %vm529_vm3  ;;  %v737_v17 = vld [vmem:[#allocation5 + $0x20] sm:$0xff] }
 0x254   :  { %v562_v63 = vmul.f32 %v491_v40, %v5203_v25  ;;  %v463_v1 = vsel %vm386_vm4, %v441_v59, 0.0  ;;  %v460_v4 = vsel %vm386_vm4, %v440_v41, 0.0  ;;  %v524_v22 = vmul.f32 %v4633_v13, %v523_v8  ;;  %846 = vmatpush.msrb.mxu2 %v832_v18 }
 0x255   :  { %464 = vadd.xlane.f32.xlu0 %v463_v1  ;;  %461 = vadd.xlane.f32.xlu2 %v460_v4  ;;  %v515_v20 = vmul.f32 0.5, %v514_v11  ;;  %v564_v29 = vmul.f32 %v511_v21, %v5190_v12  ;;  %v831_v12 = vld [vmem:[#allocation5 + $0x70] sm:$0xff]  ;;  %v534_v35 = vmul.f32 %v4635_v26, %v533_v30  ;;  %vm539_vm7 = vweird.f32 %v4635_v26  ;;  %v740_v11 = vld [vmem:[#allocation5 + $0x38] sm:$0xff] }
 0x256   :  { %v571_v48 = vmul.f32 %v5267_v61, %v562_v63  ;;  %v525_v33 = vmul.f32 0.5, %v524_v22  ;;  %847 = vmatpush.msrb.mxu2 %v831_v12  ;;  %vm540_vm10 = vmor %vm538_vm8, %vm539_vm7  ;;  %754 = vmatpush.msrb.mxu3 %v740_v11 }
 0x257   :  { %v516_v24 = vsub.f32 1.5, %v515_v20  ;;  %v573_v34 = vmul.f32 %v5267_v61, %v564_v29  ;;  %v535_v47 = vmul.f32 0.5, %v534_v35 }
 0x258   :  { %v5283_v25 = vadd.f32 %v5277_v14, %v571_v48  ;;  %v526_v36 = vsub.f32 1.5, %v525_v33  ;;  %848 = vmatpush.msrb.mxu2 %v830_v42  ;;  %v738_v48 = vld [vmem:[#allocation5 + $0x28] sm:$0xff] }
 0x259   :  { %v517_v5 = vmul.f32 %v5259_v49, %v516_v24  ;;  %v5314_v45 = vadd.f32 %v5277_v14, %v573_v34 }
 0x25a   :  { %4334 = vmatmul.msk.f32.vlgmr.msra.gmra.mxu2 %vm386_vm4, %v5283_v25  ;;  %4350 = vmatmul.msk.f32.vlgmr.msrb.gmra.mxu1 %vm386_vm4, %v5283_v25  ;;  %v527_v51 = vmul.f32 %v4633_v13, %v526_v36 }
 0x25b   :  { %4374 = vmatmul.msk.f32.vlgmr.msra.gmra.mxu0 %vm386_vm4, %v5283_v25  ;;  %v521_v38 = vsel %vm520_vm2, %v5259_v49, %v517_v5  ;;  %849 = vmatpush.msrb.mxu2 %v829_v46  ;;  %v536_v49 = vsub.f32 1.5, %v535_v47  ;;  %v877_v46 = vld [vmem:[#allocation5 + $0x90] sm:$0xff]  ;;  %v876_v47 = vld [vmem:[#allocation5 + $0x88] sm:$0xff] }
 0x25c   :  { %v565_v23 = vmul.f32 %v521_v38, %v5207_v27  ;;  %v531_v50 = vsel %vm530_vm6, %v4633_v13, %v527_v51  ;;  %v739_v13 = vld [vmem:[#allocation5 + $0x30] sm:$0xff] }
 0x25d   :  { %v566_v56 = vmul.f32 %v531_v50, %v5211_v32  ;;  %v537_v58 = vmul.f32 %v4635_v26, %v536_v49  ;;  %755 = vmatpush.msrb.mxu3 %v739_v13 }
 0x25e   :  { %v574_v27 = vmul.f32 %v5267_v61, %v565_v23  ;;  %v878_v23 = vld [vmem:[#allocation5 + $0x98] sm:$0xff] }
 0x25f   :  { %v575_v31 = vmul.f32 %v5267_v61, %v566_v56  ;;  %v541_v32 = vsel %vm540_vm10, %v4635_v26, %v537_v58  ;;  %756 = vmatpush.msrb.mxu3 %v738_v48 }
 0x260   :  { %v5327_v57 = vadd.f32 %v5277_v14, %v574_v27  ;;  %v567_v59 = vmul.f32 %v541_v32, %v5196_v19  ;;  %v875_v27 = vld [vmem:[#allocation5 + $0x80] sm:$0xff] }
 0x261   :  { %v5339_v41 = vadd.f32 %v5277_v14, %v575_v31  ;;  %757 = vmatpush.msrb.mxu3 %v737_v17  ;;  %v5449_v17 = vld [vmem:[#allocation5 + $0xc0] sm:$0xff] }
 0x262   :  { %4335 = vmatmul.msk.f32.gmra.mxu2 %vm386_vm4, %v5298_v28  ;;  %4351 = vmatmul.msk.f32.gmra.mxu1 %vm386_vm4, %v5298_v28  ;;  %v576_v40 = vmul.f32 %v5267_v61, %v567_v59 }
 0x263   :  { %4375 = vmatmul.msk.f32.gmra.mxu0 %vm386_vm4, %v5298_v28 }
 0x264   :  { %v5349_v62 = vadd.f32 %v5277_v14, %v576_v40 }
 0x26a   :  { %4336 = vmatmul.msk.f32.gmra.mxu2 %vm386_vm4, %v5314_v45  ;;  %4352 = vmatmul.msk.f32.gmra.mxu1 %vm386_vm4, %v5314_v45 }
 0x26b   :  { %4376 = vmatmul.msk.f32.gmra.mxu0 %vm386_vm4, %v5314_v45 }
 0x272   :  { %4337 = vmatmul.msk.f32.gmra.mxu2 %vm386_vm4, %v5327_v57  ;;  %4353 = vmatmul.msk.f32.gmra.mxu1 %vm386_vm4, %v5327_v57 }
 0x273   :  { %4377 = vmatmul.msk.f32.gmra.mxu0 %vm386_vm4, %v5327_v57 }
 0x27a   :  { %4338 = vmatmul.msk.f32.gmra.mxu2 %vm386_vm4, %v5339_v41  ;;  %4354 = vmatmul.msk.f32.gmra.mxu1 %vm386_vm4, %v5339_v41 }
 0x27b   :  { %4378 = vmatmul.msk.f32.gmra.mxu0 %vm386_vm4, %v5339_v41 }
 0x282   :  { %4339 = vmatmul.msk.f32.gmra.mxu2 %vm386_vm4, %v5349_v62  ;;  %4355 = vmatmul.msk.f32.gmra.mxu1 %vm386_vm4, %v5349_v62 }
 0x283   :  { %4379 = vmatmul.msk.f32.gmra.mxu0 %vm386_vm4, %v5349_v62 }
 0x28a   :  { %4358 = vmatmul.msk.f32.vlgmr.msrb.gmra.mxu2 %vm386_vm4, %v5283_v25 }
 0x292   :  { %4359 = vmatmul.msk.f32.gmra.mxu2 %vm386_vm4, %v5298_v28 }
 0x29a   :  { %4360 = vmatmul.msk.f32.gmra.mxu2 %vm386_vm4, %v5314_v45 }
 0x2a2   :  { %4361 = vmatmul.msk.f32.gmra.mxu2 %vm386_vm4, %v5327_v57 }
 0x2aa   :  { %4362 = vmatmul.msk.f32.gmra.mxu2 %vm386_vm4, %v5339_v41 }
 0x2b2   :  { %4363 = vmatmul.msk.f32.gmra.mxu2 %vm386_vm4, %v5349_v62 }
 0x2c8   :  { %v462_v19 = vpop.xlane.xlu2 %461  ;;  %v465_v63 = vpop.xlane.xlu0 %464 }
 0x2c9   :  { %v472_v1 = vmul.f32 %v462_v19, %v5181_v2  ;;  %v473_v4 = vmul.f32 %v465_v63, %v5181_v2 }
 0x2cb   :  { %v480_v7 = vadd.f32 1e-12, %v472_v1  ;;  %v481_v10 = vadd.f32 1e-12, %v473_v4 }
 0x2cd   :  { %4636 = vrsqrt.f32 %v480_v7  ;;  %vm548_vm12 = vweird.f32 %v480_v7  ;;  %vm558_vm15 = vweird.f32 %v481_v10 }
 0x2ce   :  { %4638 = vrsqrt.f32 %v481_v10 }
 0x2d3   :  { %v4637_v16 = vpop.eup %4636 }
 0x2d4   :  { %v4639_v8 = vpop.eup %4638  ;;  %v543_v20 = vmul.f32 %v4637_v16, %v480_v7  ;;  %vm549_vm11 = vweird.f32 %v4637_v16 }
 0x2d5   :  { %v553_v6 = vmul.f32 %v4639_v8, %v481_v10  ;;  %vm559_vm13 = vweird.f32 %v4639_v8  ;;  %vm550_vm14 = vmor %vm548_vm12, %vm549_vm11 }
 0x2d6   :  { %v544_v21 = vmul.f32 %v4637_v16, %v543_v20  ;;  %vm560_vm0 = vmor %vm558_vm15, %vm559_vm13 }
 0x2d7   :  { %v554_v22 = vmul.f32 %v4639_v8, %v553_v6  ;;  %v5435_v63 = vpop.f32.mrf.mxu1 }
 0x2d8   :  { %v545_v24 = vmul.f32 0.5, %v544_v21  ;;  %v943_v56 = vpop.f32.mrf.mxu0  ;;  %v925_v21 = vperm.slane %v5449_v17, 5 }
 0x2d9   :  { %v555_v26 = vmul.f32 0.5, %v554_v22 }
 0x2da   :  { %v546_v29 = vsub.f32 1.5, %v545_v24 }
 0x2db   :  { %v556_v30 = vsub.f32 1.5, %v555_v26 }
 0x2dc   :  { %v547_v33 = vmul.f32 %v4637_v16, %v546_v29 }
 0x2dd   :  { %v557_v5 = vmul.f32 %v4639_v8, %v556_v30  ;;  %v833_v30 = vperm.slane %v5449_v17, 3 }
 0x2de   :  { %v551_v18 = vsel %vm550_vm14, %v4637_v16, %v547_v33 }
 0x2df   :  { %v568_v12 = vmul.f32 %v551_v18, %v5257_v55  ;;  %v561_v34 = vsel %vm560_vm0, %v4639_v8, %v557_v5  ;;  %v5439_v7 = vpop.f32.mrf.mxu1 }
 0x2e0   :  { %v569_v38 = vmul.f32 %v561_v34, %v5254_v53  ;;  %v5397_v53 = vpop.f32.mrf.mxu2  ;;  %v946_v31 = vpop.f32.mrf.mxu0 }
 0x2e1   :  { %v577_v35 = vmul.f32 %v5267_v61, %v568_v12 }
 0x2e2   :  { %v578_v55 = vmul.f32 %v5267_v61, %v569_v38 }
 0x2e3   :  { %v5374_v36 = vadd.f32 %v5277_v14, %v577_v35 }
 0x2e4   :  { %v5387_v42 = vadd.f32 %v5277_v14, %v578_v55 }
 0x2e5   :  { %4340 = vmatmul.msk.f32.vlgmr.msra.gmra.mxu3 %vm386_vm4, %v5374_v36  ;;  %4356 = vmatmul.msk.f32.gmra.mxu1 %vm386_vm4, %v5374_v36 }
 0x2e6   :  { %4364 = vmatmul.msk.f32.gmra.mxu2 %vm386_vm4, %v5374_v36  ;;  %4380 = vmatmul.msk.f32.gmra.mxu0 %vm386_vm4, %v5374_v36 }
 0x2e7   :  { %892 = vmatpush.msra.mxu3 %v878_v23  ;;  %v5445_v13 = vpop.f32.mrf.mxu1  ;;  %v947_v23 = vadd.f32 %v946_v31, %v925_v21 }
 0x2e8   :  { %v5401_v61 = vpop.f32.mrf.mxu2  ;;  %v949_v59 = vpop.f32.mrf.mxu0 }
 0x2e9   :  { %893 = vmatpush.msra.mxu3 %v877_v46  ;;  %v950_v38 = vadd.f32 %v949_v59, %v925_v21 }
 0x2eb   :  { %894 = vmatpush.msra.mxu3 %v876_v47  ;;  %v944_v47 = vadd.f32 %v943_v56, %v925_v21 }
 0x2ed   :  { %4341 = vmatmul.msk.f32.gmra.mxu3 %vm386_vm4, %v5387_v42  ;;  %4357 = vmatmul.msk.f32.gmra.mxu1 %vm386_vm4, %v5387_v42 }
 0x2ee   :  { %4365 = vmatmul.msk.f32.gmra.mxu2 %vm386_vm4, %v5387_v42  ;;  %4381 = vmatmul.msk.f32.gmra.mxu0 %vm386_vm4, %v5387_v42 }
 0x2ef   :  { %895 = vmatpush.msra.mxu3 %v875_v27  ;;  %v814_v20 = vpop.f32.mrf.mxu1 }
 0x2f0   :  { %v5407_v14 = vpop.f32.mrf.mxu2  ;;  %v952_v19 = vpop.f32.mrf.mxu0 }
 0x2f1   :  { %v953_v35 = vadd.f32 %v952_v19, %v925_v21 }
 0x2f5   :  { %4342 = vmatmul.msk.f32.vlgmr.msrb.gmra.mxu3 %vm386_vm4, %v5283_v25 }
 0x2f7   :  { %v817_v34 = vpop.f32.mrf.mxu1 }
 0x2f8   :  { %v5411_v51 = vpop.f32.mrf.mxu2  ;;  %v955_v4 = vpop.f32.mrf.mxu0 }
 0x2f9   :  { %v956_v18 = vadd.f32 %v955_v4, %v925_v21 }
 0x2fd   :  { %4343 = vmatmul.msk.f32.gmra.mxu3 %vm386_vm4, %v5298_v28 }
 0x2ff   :  { %v820_v4 = vpop.f32.mrf.mxu1 }
 0x300   :  { %v5415_v49 = vpop.f32.mrf.mxu2  ;;  %v958_v11 = vpop.f32.mrf.mxu0 }
 0x301   :  { %v959_v29 = vadd.f32 %v958_v11, %v925_v21 }
 0x305   :  { %4344 = vmatmul.msk.f32.gmra.mxu3 %vm386_vm4, %v5314_v45 }
 0x308   :  { %v5419_v50 = vpop.f32.mrf.mxu2 }
 0x30d   :  { %4345 = vmatmul.msk.f32.gmra.mxu3 %vm386_vm4, %v5327_v57 }
 0x310   :  { %v5425_v58 = vpop.f32.mrf.mxu2 }
 0x315   :  { %4346 = vmatmul.msk.f32.gmra.mxu3 %vm386_vm4, %v5339_v41 }
 0x318   :  { %v5429_v32 = vpop.f32.mrf.mxu2 }
 0x319   :  { %v855_v56 = vadd.f32 %v5429_v32, %v833_v30 }
 0x31d   :  { %4347 = vmatmul.msk.f32.gmra.mxu3 %vm386_vm4, %v5349_v62 }
 0x320   :  { %v857_v40 = vpop.f32.mrf.mxu2 }
 0x325   :  { %4348 = vmatmul.msk.f32.gmra.mxu3 %vm386_vm4, %v5374_v36 }
 0x328   :  { %v860_v1 = vpop.f32.mrf.mxu2 }
 0x329   :  { %v861_v59 = vadd.f32 %v860_v1, %v833_v30 }
 0x32d   :  { %4349 = vmatmul.msk.f32.gmra.mxu3 %vm386_vm4, %v5387_v42 }
 0x330   :  { %v863_v10 = vpop.f32.mrf.mxu2 }
 0x331   :  { %v864_v19 = vadd.f32 %v863_v10, %v833_v30 }
 0x335   :  { %4366 = vmatmul.msk.f32.vlgmr.msra.gmra.mxu3 %vm386_vm4, %v5283_v25 }
 0x338   :  { %v866_v48 = vpop.f32.mrf.mxu2 }
 0x339   :  { %v867_v27 = vadd.f32 %v866_v48, %v833_v30  ;;  %v852_v48 = vadd.f32 %v5425_v58, %v833_v30 }
 0x33d   :  { %4367 = vmatmul.msk.f32.gmra.mxu3 %vm386_vm4, %v5298_v28 }
 0x345   :  { %4368 = vmatmul.msk.f32.gmra.mxu3 %vm386_vm4, %v5314_v45 }
 0x34d   :  { %4369 = vmatmul.msk.f32.gmra.mxu3 %vm386_vm4, %v5327_v57 }
 0x355   :  { %4370 = vmatmul.msk.f32.gmra.mxu3 %vm386_vm4, %v5339_v41 }
 0x35d   :  { %4371 = vmatmul.msk.f32.gmra.mxu3 %vm386_vm4, %v5349_v62 }
 0x362   :  { %v823_v31 = vpop.f32.mrf.mxu1 }
 0x363   :  { %v961_v16 = vpop.f32.mrf.mxu0 }
 0x364   :  { %v962_v26 = vadd.f32 %v961_v16, %v925_v21  ;;  %v858_v16 = vadd.f32 %v857_v40, %v833_v30 }
 0x365   :  { %4372 = vmatmul.msk.f32.gmra.mxu3 %vm386_vm4, %v5374_v36 }
 0x368   :  { %v5451_v8 = vpop.f32.mrf.mxu3 }
 0x369   :  { %v869_v6 = vpop.f32.mrf.mxu2 }
 0x36a   :  { %v870_v55 = vadd.f32 %v869_v6, %v833_v30  ;;  %v826_v10 = vpop.f32.mrf.mxu1 }
 0x36b   :  { %v964_v22 = vpop.f32.mrf.mxu0 }
 0x36c   :  { %v965_v24 = vadd.f32 %v964_v22, %v925_v21  ;;  %v787_v21 = vperm.slane %v5449_v17, 2 }
 0x36d   :  { %4373 = vmatmul.msk.f32.gmra.mxu3 %vm386_vm4, %v5387_v42 }
 0x36e   :  { %1256 = vmatpush.msra.mxu2 %v965_v24  ;;  %v827_v22 = vadd.f32 %v826_v10, %v787_v21  ;;  %v824_v40 = vadd.f32 %v823_v31, %v787_v21  ;;  %v821_v32 = vadd.f32 %v820_v4, %v787_v21 }
 0x370   :  { %1257 = vmatpush.msra.mxu2 %v962_v26  ;;  %v5457_v33 = vpop.f32.mrf.mxu3  ;;  %v818_v26 = vadd.f32 %v817_v34, %v787_v21  ;;  %v806_v34 = vadd.f32 %v5435_v63, %v787_v21 }
 0x371   :  { %v872_v5 = vpop.f32.mrf.mxu2 }
 0x372   :  { %v873_v12 = vadd.f32 %v872_v5, %v833_v30  ;;  %1258 = vmatpush.msra.mxu2 %v959_v29  ;;  %v815_v29 = vadd.f32 %v814_v20, %v787_v21  ;;  %v812_v30 = vadd.f32 %v5445_v13, %v787_v21 }
 0x374   :  { %4382 = vmatpush.xpose.msk.msra.mxu1 %vm278_vm9, %v873_v12  ;;  %1259 = vmatpush.msra.mxu2 %v956_v18  ;;  %v809_v18 = vadd.f32 %v5439_v7, %v787_v21  ;;  %v671_v12 = vperm.slane %v5449_v17, 0 }
 0x376   :  { %1260 = vmatpush.msra.mxu2 %v953_v35  ;;  %v714_v20 = vadd.f32 %v5397_v53, %v671_v12  ;;  %v723_v63 = vadd.f32 %v5411_v51, %v671_v12  ;;  %v726_v53 = vadd.f32 %v5415_v49, %v671_v12  ;;  %v735_v51 = vadd.f32 %v5457_v33, %v671_v12 }
 0x377   :  { %v879_v49 = vperm.slane %v5449_v17, 4 }
 0x378   :  { %4383 = vmatpush.xpose.msk.msra.mxu1 %vm278_vm9, %v870_v55  ;;  %1261 = vmatpush.msra.mxu2 %v950_v38  ;;  %v5461_v46 = vpop.f32.mrf.mxu3  ;;  %v717_v38 = vadd.f32 %v5401_v61, %v671_v12  ;;  %v720_v55 = vadd.f32 %v5407_v14, %v671_v12  ;;  %v729_v61 = vadd.f32 %v5419_v50, %v671_v12 }
 0x379   :  { %v732_v14 = vadd.f32 %v5451_v8, %v671_v12 }
 0x37a   :  { %1262 = vmatpush.msra.mxu2 %v947_v23 }
 0x37c   :  { %4384 = vmatpush.xpose.msk.msra.mxu1 %vm278_vm9, %v867_v27  ;;  %1263 = vmatpush.msra.mxu2 %v944_v47 }
 0x380   :  { %4385 = vmatpush.xpose.msk.msra.mxu1 %vm278_vm9, %v864_v19  ;;  %v5465_v11 = vpop.f32.mrf.mxu3 }
 0x384   :  { %4386 = vmatpush.xpose.msk.msra.mxu1 %vm278_vm9, %v861_v59  ;;  %v741_v59 = vperm.slane %v5449_v17, 1 }
 0x386   :  { %v763_v33 = vadd.f32 %v5465_v11, %v741_v59 }
 0x388   :  { %4387 = vmatpush.xpose.msk.msra.mxu1 %vm278_vm9, %v858_v16  ;;  %v5469_v6 = vpop.f32.mrf.mxu3  ;;  %v760_v16 = vadd.f32 %v5461_v46, %v741_v59 }
 0x38c   :  { %4388 = vmatpush.xpose.msk.msra.mxu1 %vm278_vm9, %v855_v56 }
 0x390   :  { %4389 = vmatpush.xpose.msk.msra.mxu1 %vm278_vm9, %v852_v48  ;;  %v5476_v1 = vpop.f32.mrf.mxu3 }
 0x394   :  { %4390 = vmatpush.xpose.msk.msra.mxu1 %vm278_vm9, %v827_v22  ;;  %v766_v22 = vadd.f32 %v5469_v6, %v741_v59 }
 0x398   :  { %4391 = vmatpush.xpose.msk.msra.mxu1 %vm278_vm9, %v824_v40  ;;  %v5480_v24 = vpop.f32.mrf.mxu3  ;;  %v769_v40 = vadd.f32 %v5476_v1, %v741_v59 }
 0x399   :  { %v772_v11 = vadd.f32 %v5480_v24, %v741_v59  ;;  %v596_v24 = vshra.s32 %v5067_v37, 3 }
 0x39c   :  { %4392 = vmatpush.xpose.msk.msra.mxu1 %vm278_vm9, %v821_v32 }
 0x3a0   :  { %4393 = vmatpush.xpose.msk.msra.mxu1 %vm278_vm9, %v818_v26  ;;  %v5484_v58 = vpop.f32.mrf.mxu3  ;;  %v629_v26 = vld [vmem:[%s7032_s1] sm:$0x1] }
 0x3a1   :  { %v775_v32 = vadd.f32 %v5484_v58, %v741_v59  ;;  %vm630_vm1 = vcmp.gt.f32.partialorder %v629_v26, 0.5 }
 0x3a2   :  { %v631_v6 = vsel %vm630_vm1, 1, %v4984_v0  ;;  %v597_v0 = vshra.s32 %v5070_v39, 3 }
 0x3a3   :  { %v632_v1 = vperm.slane %v631_v6, 0 }
 0x3a4   :  { %4394 = vmatpush.xpose.msk.msra.mxu1 %vm278_vm9, %v815_v29 }
 0x3a5   :  { %vm5538_vm2 = vcmp.eq.s32.totalorder %v632_v1, 1 }
 0x3a8   :  { %4395 = vmatpush.xpose.msk.msra.mxu1 %vm278_vm9, %v812_v30  ;;  %v5489_v5 = vpop.f32.mrf.mxu3  ;;  %v5536_v30 = vshra.s32 %v5078_v44, 3 }
 0x3a9   :  { %v778_v29 = vadd.f32 %v5489_v5, %v741_v59  ;;  %v4989_v5 = vmov -1e+30  }
 0x3aa   :  { %vm613_vm3 = vcmp.eq.s32.totalorder %v596_v24, %v5536_v30  ;;  %vm614_vm6 = vcmp.eq.s32.totalorder %v597_v0, %v5536_v30  ;;  %v592_v24 = vadd.s32 96, %v5067_v37 }
 0x3ab   :  { %vm634_vm5 = vmand %vm613_vm3, %vm5538_vm2 }
 0x3ac   :  { %4396 = vmatpush.xpose.msk.msra.mxu1 %vm278_vm9, %v809_v18  ;;  %v5549_v12 = vsel %vm634_vm5, 0.0, %v4989_v5  ;;  %vm635_vm7 = vmand %vm614_vm6, %vm5538_vm2  ;;  %v608_v0 = vshra.s32 %v592_v24, 3 }
 0x3b0   :  { %4397 = vmatpush.xpose.msk.msra.mxu1 %vm278_vm9, %v806_v34  ;;  %v5496_v35 = vpop.f32.mrf.mxu3 }
 0x3b1   :  { %v781_v18 = vadd.f32 %v5496_v35, %v741_v59  ;;  %v598_v35 = vshra.s32 %v5076_v43, 3  ;;  %v603_v59 = vshra.s32 %v5142_v15, 3 }
 0x3b3   :  { %4398 = vmatmul.msk.f32.vlgmr.msra.gmra.mxu1 %vm278_vm9, %v714_v20  ;;  %vm615_vm8 = vcmp.eq.s32.totalorder %v598_v35, %v5536_v30  ;;  %vm620_vm5 = vcmp.eq.s32.totalorder %v603_v59, %v5536_v30 }
 0x3b4   :  { %vm636_vm10 = vmand %vm615_vm8, %vm5538_vm2 }
 0x3b5   :  { %vm641_vm6 = vmand %vm620_vm5, %vm5538_vm2 }
 0x3b8   :  { %v897_v13 = vpop.f32.mrf.mxu3 }
 0x3b9   :  { %v898_v46 = vadd.f32 %v897_v13, %v879_v49  ;;  %v5560_v13 = vsel %vm635_vm7, 0.0, %v4989_v5 }
 0x3bb   :  { %4399 = vmatmul.msk.f32.gmra.mxu1 %vm278_vm9, %v717_v38 }
 0x3c0   :  { %v900_v7 = vpop.f32.mrf.mxu3 }
 0x3c1   :  { %v901_v17 = vadd.f32 %v900_v7, %v879_v49  ;;  %v599_v7 = vshra.s32 %v5094_v52, 3 }
 0x3c3   :  { %4400 = vmatmul.msk.f32.gmra.mxu1 %vm278_vm9, %v720_v55  ;;  %v5571_v55 = vsel %vm636_vm10, 0.0, %v4989_v5  ;;  %vm616_vm11 = vcmp.eq.s32.totalorder %v599_v7, %v5536_v30 }
 0x3c4   :  { %vm637_vm12 = vmand %vm616_vm11, %vm5538_vm2 }
 0x3c8   :  { %v903_v23 = vpop.f32.mrf.mxu3 }
 0x3c9   :  { %v904_v21 = vadd.f32 %v903_v23, %v879_v49 }
 0x3cb   :  { %4401 = vmatmul.msk.f32.gmra.mxu1 %vm278_vm9, %v723_v63  ;;  %v600_v63 = vshra.s32 %v5106_v60, 3 }
 0x3cd   :  { %vm617_vm13 = vcmp.eq.s32.totalorder %v600_v63, %v5536_v30 }
 0x3ce   :  { %vm638_vm14 = vmand %vm617_vm13, %vm5538_vm2 }
 0x3d0   :  { %v906_v47 = vpop.f32.mrf.mxu3 }
 0x3d1   :  { %v907_v10 = vadd.f32 %v906_v47, %v879_v49  ;;  %v5582_v47 = vsel %vm637_vm12, 0.0, %v4989_v5 }
 0x3d3   :  { %4402 = vmatmul.msk.f32.gmra.mxu1 %vm278_vm9, %v726_v53 }
 0x3d8   :  { %v909_v27 = vpop.f32.mrf.mxu3 }
 0x3d9   :  { %v910_v48 = vadd.f32 %v909_v27, %v879_v49  ;;  %v601_v27 = vshra.s32 %v5118_v3, 3 }
 0x3db   :  { %4403 = vmatmul.msk.f32.gmra.mxu1 %vm278_vm9, %v729_v61  ;;  %v5593_v61 = vsel %vm638_vm14, 0.0, %v4989_v5  ;;  %vm618_vm15 = vcmp.eq.s32.totalorder %v601_v27, %v5536_v30  ;;  %v594_v27 = vadd.s32 112, %v5067_v37 }
 0x3dc   :  { %vm639_vm0 = vmand %vm618_vm15, %vm5538_vm2 }
 0x3e0   :  { %v912_v4 = vpop.f32.mrf.mxu3 }
 0x3e1   :  { %v913_v8 = vadd.f32 %v912_v4, %v879_v49 }
 0x3e3   :  { %4404 = vmatmul.msk.f32.gmra.mxu1 %vm278_vm9, %v732_v14  ;;  %v602_v14 = vshra.s32 %v5130_v9, 3 }
 0x3e5   :  { %vm619_vm1 = vcmp.eq.s32.totalorder %v602_v14, %v5536_v30  ;;  %v610_v14 = vshra.s32 %v594_v27, 3 }
 0x3e6   :  { %vm640_vm3 = vmand %vm619_vm1, %vm5538_vm2 }
 0x3e8   :  { %v915_v19 = vpop.f32.mrf.mxu3 }
 0x3e9   :  { %v916_v56 = vadd.f32 %v915_v19, %v879_v49  ;;  %v5604_v19 = vsel %vm639_vm0, 0.0, %v4989_v5  ;;  %vm625_vm0 = vcmp.eq.s32.totalorder %v608_v0, %v5536_v30 }
 0x3ea   :  { %vm646_vm1 = vmand %vm625_vm0, %vm5538_vm2 }
 0x3eb   :  { %4405 = vmatmul.msk.f32.gmra.mxu1 %vm278_vm9, %v735_v51  ;;  %v5681_v63 = vsel %vm646_vm1, 0.0, %v4989_v5 }
 0x3f0   :  { %v918_v31 = vpop.f32.mrf.mxu3 }
 0x3f1   :  { %v919_v50 = vadd.f32 %v918_v31, %v879_v49  ;;  %v5615_v49 = vsel %vm640_vm3, 0.0, %v4989_v5  ;;  %v588_v31 = vadd.s32 64, %v5067_v37 }
 0x3f3   :  { %4406 = vmatmul.msk.f32.gmra.mxu1 %vm278_vm9, %v760_v16  ;;  %1264 = vmatpush.msra.mxu2 %v919_v50  ;;  %v604_v50 = vshra.s32 %v588_v31, 3 }
 0x3f5   :  { %1265 = vmatpush.msra.mxu2 %v916_v56  ;;  %v5626_v56 = vsel %vm641_vm6, 0.0, %v4989_v5  ;;  %vm621_vm7 = vcmp.eq.s32.totalorder %v604_v50, %v5536_v30  ;;  %vm627_vm6 = vcmp.eq.s32.totalorder %v610_v14, %v5536_v30 }
 0x3f6   :  { %vm642_vm8 = vmand %vm621_vm7, %vm5538_vm2 }
 0x3f7   :  { %1266 = vmatpush.msra.mxu2 %v913_v8  ;;  %v589_v8 = vadd.s32 72, %v5067_v37  ;;  %vm648_vm7 = vmand %vm627_vm6, %vm5538_vm2 }
 0x3f9   :  { %1267 = vmatpush.msra.mxu2 %v910_v48 }
 0x3fb   :  { %4407 = vmatmul.msk.f32.gmra.mxu1 %vm278_vm9, %v763_v33  ;;  %1268 = vmatpush.msra.mxu2 %v907_v10  ;;  %v605_v33 = vshra.s32 %v589_v8, 3  ;;  %v5637_v10 = vsel %vm642_vm8, 0.0, %v4989_v5 }
 0x3fd   :  { %1269 = vmatpush.msra.mxu2 %v904_v21  ;;  %vm622_vm10 = vcmp.eq.s32.totalorder %v605_v33, %v5536_v30 }
 0x3fe   :  { %vm643_vm11 = vmand %vm622_vm10, %vm5538_vm2 }
 0x3ff   :  { %1270 = vmatpush.msra.mxu2 %v901_v17  ;;  %v590_v17 = vadd.s32 80, %v5067_v37 }
 0x401   :  { %1271 = vmatpush.msra.mxu2 %v898_v46 }
 0x403   :  { %4408 = vmatmul.msk.f32.gmra.mxu1 %vm278_vm9, %v766_v22  ;;  %v606_v22 = vshra.s32 %v590_v17, 3 }
 0x405   :  { %vm623_vm12 = vcmp.eq.s32.totalorder %v606_v22, %v5536_v30 }
 0x406   :  { %vm644_vm13 = vmand %vm623_vm12, %vm5538_vm2 }
 0x40b   :  { %4409 = vmatmul.msk.f32.gmra.mxu1 %vm278_vm9, %v769_v40  ;;  %v5648_v40 = vsel %vm643_vm11, 0.0, %v4989_v5 }
 0x413   :  { %4410 = vmatmul.msk.f32.gmra.mxu1 %vm278_vm9, %v772_v11 }
 0x41b   :  { %4411 = vmatmul.msk.f32.gmra.mxu1 %vm278_vm9, %v775_v32  ;;  %v591_v32 = vadd.s32 88, %v5067_v37 }
 0x41d   :  { %v607_v6 = vshra.s32 %v591_v32, 3 }
 0x41f   :  { %vm624_vm14 = vcmp.eq.s32.totalorder %v607_v6, %v5536_v30 }
 0x420   :  { %vm645_vm15 = vmand %vm624_vm14, %vm5538_vm2 }
 0x423   :  { %4412 = vmatmul.msk.f32.gmra.mxu1 %vm278_vm9, %v778_v29  ;;  %v5659_v29 = vsel %vm644_vm13, 0.0, %v4989_v5 }
 0x42b   :  { %4413 = vmatmul.msk.f32.gmra.mxu1 %vm278_vm9, %v781_v18 }
 0x430   :  { %v1080_v34 = vpop.f32.mrf.mxu1 }
 0x431   :  { %v5553_v20 = vadd.f32 %v1080_v34, %v5549_v12  ;;  %v5670_v34 = vsel %vm645_vm15, 0.0, %v4989_v5 }
 0x433   :  { %1128 = vmax.xlane.f32.xlu1 %v5553_v20 }
 0x438   :  { %v1083_v39 = vpop.f32.mrf.mxu1 }
 0x439   :  { %v5564_v38 = vadd.f32 %v1083_v39, %v5560_v13  ;;  %v593_v39 = vadd.s32 104, %v5067_v37 }
 0x43b   :  { %1130 = vmax.xlane.f32.xlu2 %v5564_v38 }
 0x440   :  { %v1086_v43 = vpop.f32.mrf.mxu1 }
 0x441   :  { %v5575_v23 = vadd.f32 %v1086_v43, %v5571_v55  ;;  %v609_v43 = vshra.s32 %v593_v39, 3 }
 0x443   :  { %1132 = vmax.xlane.f32.xlu0 %v5575_v23  ;;  %vm626_vm3 = vcmp.eq.s32.totalorder %v609_v43, %v5536_v30 }
 0x444   :  { %vm647_vm5 = vmand %vm626_vm3, %vm5538_vm2 }
 0x448   :  { %v1089_v52 = vpop.f32.mrf.mxu1 }
 0x449   :  { %v5586_v53 = vadd.f32 %v1089_v52, %v5582_v47 }
 0x44b   :  { %1134 = vmax.xlane.f32.xlu1 %v5586_v53 }
 0x450   :  { %v1092_v60 = vpop.f32.mrf.mxu1 }
 0x451   :  { %v5597_v4 = vadd.f32 %v1092_v60, %v5593_v61 }
 0x453   :  { %1136 = vmax.xlane.f32.xlu2 %v5597_v4 }
 0x458   :  { %v1095_v3 = vpop.f32.mrf.mxu1 }
 0x459   :  { %v5608_v51 = vadd.f32 %v1095_v3, %v5604_v19  ;;  %v5692_v3 = vsel %vm647_vm5, 0.0, %v4989_v5 }
 0x45b   :  { %1138 = vmax.xlane.f32.xlu0 %v5608_v51 }
 0x460   :  { %v1098_v9 = vpop.f32.mrf.mxu1 }
 0x461   :  { %v5620_v16 = vadd.f32 %v1098_v9, %v5615_v49  ;;  %v595_v9 = vadd.s32 120, %v5067_v37 }
 0x463   :  { %1140 = vmax.xlane.f32.xlu1 %v5620_v16  ;;  %v611_v50 = vshra.s32 %v595_v9, 3 }
 0x465   :  { %vm628_vm8 = vcmp.eq.s32.totalorder %v611_v50, %v5536_v30 }
 0x466   :  { %vm649_vm10 = vmand %vm628_vm8, %vm5538_vm2 }
 0x467   :  { %v5713_v17 = vsel %vm649_vm10, 0.0, %v4989_v5 }
 0x468   :  { %v1101_v15 = vpop.f32.mrf.mxu1 }
 0x469   :  { %v5631_v48 = vadd.f32 %v1101_v15, %v5626_v56  ;;  %v5703_v15 = vsel %vm648_vm7, 0.0, %v4989_v5 }
 0x46b   :  { %1142 = vmax.xlane.f32.xlu2 %v5631_v48 }
 0x470   :  { %v1104_v21 = vpop.f32.mrf.mxu1 }
 0x471   :  { %v5642_v46 = vadd.f32 %v1104_v21, %v5637_v10 }
 0x473   :  { %1144 = vmax.xlane.f32.xlu0 %v5642_v46 }
 0x478   :  { %v1107_v11 = vpop.f32.mrf.mxu1 }
 0x479   :  { %v5653_v26 = vadd.f32 %v1107_v11, %v5648_v40 }
 0x47b   :  { %1146 = vmax.xlane.f32.xlu1 %v5653_v26 }
 0x480   :  { %v1110_v1 = vpop.f32.mrf.mxu1 }
 0x481   :  { %v5664_v18 = vadd.f32 %v1110_v1, %v5659_v29 }
 0x483   :  { %1148 = vmax.xlane.f32.xlu2 %v5664_v18 }
 0x488   :  { %v1113_v35 = vpop.f32.mrf.mxu1 }
 0x489   :  { %v5675_v7 = vadd.f32 %v1113_v35, %v5670_v34 }
 0x48b   :  { %1150 = vmax.xlane.f32.xlu0 %v5675_v7 }
 0x490   :  { %v1116_v52 = vpop.f32.mrf.mxu1 }
 0x491   :  { %v5686_v60 = vadd.f32 %v1116_v52, %v5681_v63 }
 0x493   :  { %1152 = vmax.xlane.f32.xlu1 %v5686_v60 }
 0x498   :  { %v1119_v59 = vpop.f32.mrf.mxu1 }
 0x499   :  { %v5697_v31 = vadd.f32 %v1119_v59, %v5692_v3 }
 0x49b   :  { %1154 = vmax.xlane.f32.xlu2 %v5697_v31 }
 0x4a0   :  { %v1122_v8 = vpop.f32.mrf.mxu1 }
 0x4a1   :  { %v5707_v33 = vadd.f32 %v1122_v8, %v5703_v15 }
 0x4a3   :  { %1156 = vmax.xlane.f32.xlu0 %v5707_v33 }
 0x4a6   :  { %v1129_v21 = vpop.xlane.xlu1 %1128 }
 0x4a7   :  { %v1160_v22 = vsub.f32 %v5553_v20, %v1129_v21 }
 0x4a8   :  { %v1125_v11 = vpop.f32.mrf.mxu1 }
 0x4a9   :  { %v1176_v32 = vmul.f32 1.442695, %v1160_v22  ;;  %v5717_v6 = vadd.f32 %v1125_v11, %v5713_v17 }
 0x4ab   :  { %4640 = vpow2.f32 %v1176_v32  ;;  %1158 = vmax.xlane.f32.xlu1 %v5717_v6 }
 0x4ae   :  { %v1131_v30 = vpop.xlane.xlu2 %1130 }
 0x4af   :  { %v1161_v1 = vsub.f32 %v5564_v38, %v1131_v30 }
 0x4b1   :  { %v4641_v24 = vpop.eup %4640  ;;  %v1178_v58 = vmul.f32 1.442695, %v1161_v1 }
 0x4b2   :  { %1272 = vmatmul.f32.vlgmr.msra.gmra.mxu2 %v4641_v24  ;;  %1208 = vadd.xlane.f32.xlu0 %v4641_v24 }
 0x4b3   :  { %4642 = vpow2.f32 %v1178_v58 }
 0x4b6   :  { %v1133_v5 = vpop.xlane.xlu0 %1132 }
 0x4b7   :  { %v1162_v0 = vsub.f32 %v5575_v23, %v1133_v5 }
 0x4b9   :  { %v4643_v20 = vpop.eup %4642  ;;  %v1180_v35 = vmul.f32 1.442695, %v1162_v0 }
 0x4ba   :  { %1275 = vmatmul.f32.gmra.mxu2 %v4643_v20 }
 0x4bb   :  { %4644 = vpow2.f32 %v1180_v35 }
 0x4be   :  { %v1135_v39 = vpop.xlane.xlu1 %1134 }
 0x4bf   :  { %v1163_v43 = vsub.f32 %v5586_v53, %v1135_v39 }
 0x4c1   :  { %v4645_v52 = vpop.eup %4644  ;;  %v1182_v27 = vmul.f32 1.442695, %v1163_v43 }
 0x4c2   :  { %1278 = vmatmul.f32.gmra.mxu2 %v4645_v52 }
 0x4c3   :  { %4646 = vpow2.f32 %v1182_v27 }
 0x4c6   :  { %v1137_v38 = vpop.xlane.xlu2 %1136 }
 0x4c7   :  { %v1164_v14 = vsub.f32 %v5597_v4, %v1137_v38 }
 0x4c9   :  { %v4647_v59 = vpop.eup %4646  ;;  %v1184_v9 = vmul.f32 1.442695, %v1164_v14 }
 0x4ca   :  { %1281 = vmatmul.f32.gmra.mxu2 %v4647_v59 }
 0x4cb   :  { %4648 = vpow2.f32 %v1184_v9 }
 0x4ce   :  { %v1139_v50 = vpop.xlane.xlu0 %1138 }
 0x4cf   :  { %v1165_v23 = vsub.f32 %v5608_v51, %v1139_v50 }
 0x4d1   :  { %v4649_v8 = vpop.eup %4648  ;;  %v1186_v21 = vmul.f32 1.442695, %v1165_v23 }
 0x4d2   :  { %1284 = vmatmul.f32.gmra.mxu2 %v4649_v8 }
 0x4d3   :  { %4650 = vpow2.f32 %v1186_v21 }
 0x4d6   :  { %v1141_v22 = vpop.xlane.xlu1 %1140 }
 0x4d7   :  { %v1166_v53 = vsub.f32 %v5620_v16, %v1141_v22 }
 0x4d9   :  { %v4651_v11 = vpop.eup %4650  ;;  %v1188_v32 = vmul.f32 1.442695, %v1166_v53 }
 0x4da   :  { %1287 = vmatmul.f32.gmra.mxu2 %v4651_v11 }
 0x4db   :  { %4652 = vpow2.f32 %v1188_v32 }
 0x4de   :  { %v1143_v30 = vpop.xlane.xlu2 %1142 }
 0x4df   :  { %v1167_v4 = vsub.f32 %v5631_v48, %v1143_v30  ;;  %v1339_v30 = vld [vmem:[#allocation2 + $0xb0] sm:$0xff] }
 0x4e0   :  { %1445 = vmatpush.msrb.mxu0 %v1339_v30 }
 0x4e1   :  { %v5727_v1 = vpop.eup %4652  ;;  %v1190_v24 = vmul.f32 1.442695, %v1167_v4  ;;  %v1338_v4 = vld [vmem:[#allocation2 + $0xa8] sm:$0xff] }
 0x4e2   :  { %1290 = vmatmul.f32.gmra.mxu2 %v5727_v1  ;;  %1446 = vmatpush.msrb.mxu0 %v1338_v4 }
 0x4e3   :  { %4654 = vpow2.f32 %v1190_v24 }
 0x4e6   :  { %v1145_v51 = vpop.xlane.xlu0 %1144 }
 0x4e7   :  { %v1168_v58 = vsub.f32 %v5642_v46, %v1145_v51 }
 0x4e9   :  { %v5731_v5 = vpop.eup %4654  ;;  %v1192_v0 = vmul.f32 1.442695, %v1168_v58 }
 0x4ea   :  { %1293 = vmatmul.f32.gmra.mxu2 %v5731_v5 }
 0x4eb   :  { %4656 = vpow2.f32 %v1192_v0 }
 0x4ee   :  { %v1147_v16 = vpop.xlane.xlu1 %1146 }
 0x4ef   :  { %v1169_v35 = vsub.f32 %v5653_v26, %v1147_v16 }
 0x4f1   :  { %v4657_v39 = vpop.eup %4656  ;;  %v1194_v48 = vmul.f32 1.442695, %v1169_v35 }
 0x4f2   :  { %1224 = vadd.xlane.f32.xlu2 %v4657_v39  ;;  %1296 = vmatmul.f32.gmra.mxu2 %v4657_v39 }
 0x4f3   :  { %4658 = vpow2.f32 %v1194_v48 }
 0x4f6   :  { %v1149_v43 = vpop.xlane.xlu2 %1148 }
 0x4f7   :  { %v1170_v27 = vsub.f32 %v5664_v18, %v1149_v43  ;;  %v1341_v43 = vld [vmem:[#allocation2 + $0xc0] sm:$0xff] }
 0x4f8   :  { %1380 = vmatpush.msrb.mxu3 %v1341_v43 }
 0x4f9   :  { %v4659_v38 = vpop.eup %4658  ;;  %v1196_v14 = vmul.f32 1.442695, %v1170_v27  ;;  %v1340_v27 = vld [vmem:[#allocation2 + $0xb8] sm:$0xff] }
 0x4fa   :  { %1226 = vadd.xlane.f32.xlu1 %v4659_v38  ;;  %1210 = vadd.xlane.f32.xlu2 %v4643_v20 }
 0x4fb   :  { %4660 = vpow2.f32 %v1196_v14  ;;  %1299 = vmatmul.f32.gmra.mxu2 %v4659_v38  ;;  %1381 = vmatpush.msrb.mxu3 %v1340_v27 }
 0x4fe   :  { %v1151_v46 = vpop.xlane.xlu0 %1150 }
 0x4ff   :  { %v1171_v9 = vsub.f32 %v5675_v7, %v1151_v46 }
 0x501   :  { %v4661_v50 = vpop.eup %4660  ;;  %v1198_v23 = vmul.f32 1.442695, %v1171_v9 }
 0x502   :  { %1212 = vadd.xlane.f32.xlu1 %v4645_v52  ;;  %1228 = vadd.xlane.f32.xlu0 %v4661_v50 }
 0x503   :  { %4662 = vpow2.f32 %v1198_v23  ;;  %1302 = vmatmul.f32.gmra.mxu2 %v4661_v50 }
 0x506   :  { %v1153_v26 = vpop.xlane.xlu1 %1152 }
 0x507   :  { %v1172_v21 = vsub.f32 %v5686_v60, %v1153_v26 }
 0x509   :  { %v4663_v22 = vpop.eup %4662  ;;  %v1200_v18 = vmul.f32 1.442695, %v1172_v21 }
 0x50a   :  { %1230 = vadd.xlane.f32.xlu2 %v4663_v22  ;;  %1214 = vadd.xlane.f32.xlu0 %v4647_v59 }
 0x50b   :  { %4664 = vpow2.f32 %v1200_v18  ;;  %1305 = vmatmul.f32.gmra.mxu2 %v4663_v22 }
 0x50e   :  { %v1155_v20 = vpop.xlane.xlu2 %1154 }
 0x50f   :  { %v1173_v53 = vsub.f32 %v5697_v31, %v1155_v20 }
 0x511   :  { %v4665_v32 = vpop.eup %4664  ;;  %v1202_v7 = vmul.f32 1.442695, %v1173_v53 }
 0x512   :  { %1232 = vadd.xlane.f32.xlu1 %v4665_v32  ;;  %1216 = vadd.xlane.f32.xlu2 %v4649_v8 }
 0x513   :  { %4666 = vpow2.f32 %v1202_v7  ;;  %1308 = vmatmul.f32.gmra.mxu2 %v4665_v32 }
 0x516   :  { %v1157_v52 = vpop.xlane.xlu0 %1156 }
 0x517   :  { %v1174_v60 = vsub.f32 %v5707_v33, %v1157_v52 }
 0x519   :  { %v4667_v24 = vpop.eup %4666  ;;  %v1204_v51 = vmul.f32 1.442695, %v1174_v60 }
 0x51a   :  { %1218 = vadd.xlane.f32.xlu1 %v4651_v11  ;;  %1234 = vadd.xlane.f32.xlu0 %v4667_v24 }
 0x51b   :  { %4668 = vpow2.f32 %v1204_v51  ;;  %1311 = vmatmul.f32.gmra.mxu2 %v4667_v24 }
 0x51e   :  { %v1159_v31 = vpop.xlane.xlu1 %1158 }
 0x51f   :  { %v1175_v59 = vsub.f32 %v5717_v6, %v1159_v31 }
 0x521   :  { %v4669_v58 = vpop.eup %4668  ;;  %v1206_v8 = vmul.f32 1.442695, %v1175_v59 }
 0x522   :  { %1236 = vadd.xlane.f32.xlu2 %v4669_v58  ;;  %1220 = vadd.xlane.f32.xlu0 %v5727_v1 }
 0x523   :  { %4670 = vpow2.f32 %v1206_v8  ;;  %1314 = vmatmul.f32.gmra.mxu2 %v4669_v58 }
 0x525   :  { %v1209_v33 = vpop.xlane.xlu0 %1208 }
 0x526   :  { %4672 = vrcp.f32 %v1209_v33 }
 0x529   :  { %v4671_v0 = vpop.eup %4670 }
 0x52a   :  { %1238 = vadd.xlane.f32.xlu1 %v4671_v0  ;;  %1222 = vadd.xlane.f32.xlu2 %v5731_v5 }
 0x52b   :  { %1317 = vmatmul.f32.gmra.mxu2 %v4671_v0 }
 0x52c   :  { %v4673_v11 = vpop.eup %4672 }
 0x535   :  { %v1273_v16 = vpop.f32.mrf.mxu2 }
 0x536   :  { %v1321_v35 = vmul.f32 %v4673_v11, %v1273_v16 }
 0x538   :  { %4422 = vmatmul.msk.f32.vlgmr.msrb.gmra.mxu0 %vm278_vm9, %v1321_v35 }
 0x53d   :  { %v1276_v6 = vpop.f32.mrf.mxu2 }
 0x545   :  { %v1279_v39 = vpop.f32.mrf.mxu2 }
 0x54d   :  { %v1282_v48 = vpop.f32.mrf.mxu2 }
 0x555   :  { %v1285_v1 = vpop.f32.mrf.mxu2 }
 0x55d   :  { %v1288_v38 = vpop.f32.mrf.mxu2 }
 0x565   :  { %v5744_v14 = vpop.f32.mrf.mxu2  ;;  %v1225_v5 = vpop.xlane.xlu2 %1224 }
 0x566   :  { %4674 = vrcp.f32 %v1225_v5 }
 0x56c   :  { %v4675_v23 = vpop.eup %4674 }
 0x56d   :  { %v1227_v46 = vpop.xlane.xlu1 %1226  ;;  %v5746_v9 = vpop.f32.mrf.mxu2 }
 0x56e   :  { %v1211_v50 = vpop.xlane.xlu2 %1210 }
 0x56f   :  { %4676 = vrcp.f32 %v1211_v50 }
 0x575   :  { %v4677_v26 = vpop.eup %4676  ;;  %v1213_v21 = vpop.xlane.xlu1 %1212 }
 0x576   :  { %v1297_v22 = vpop.f32.mrf.mxu2  ;;  %4678 = vrcp.f32 %v1213_v21  ;;  %v1229_v20 = vpop.xlane.xlu0 %1228  ;;  %v1322_v53 = vmul.f32 %v4677_v26, %v1276_v6 }
 0x577   :  { %v1329_v18 = vmul.f32 %v4675_v23, %v1297_v22  ;;  %4680 = vrcp.f32 %v1227_v46 }
 0x578   :  { %4423 = vmatmul.msk.f32.gmra.mxu0 %vm278_vm9, %v1322_v53 }
 0x579   :  { %4414 = vmatmul.msk.f32.vlgmr.msrb.gmra.mxu3 %vm278_vm9, %v1329_v18 }
 0x57c   :  { %v4679_v32 = vpop.eup %4678 }
 0x57d   :  { %v1231_v7 = vpop.xlane.xlu2 %1230  ;;  %v1323_v52 = vmul.f32 %v4679_v32, %v1279_v39  ;;  %v4681_v30 = vpop.eup %4680 }
 0x57e   :  { %v1300_v4 = vpop.f32.mrf.mxu2  ;;  %v1215_v60 = vpop.xlane.xlu0 %1214 }
 0x57f   :  { %v1330_v24 = vmul.f32 %v4681_v30, %v1300_v4  ;;  %4682 = vrcp.f32 %v1215_v60 }
 0x580   :  { %4684 = vrcp.f32 %v1229_v20  ;;  %4424 = vmatmul.msk.f32.gmra.mxu0 %vm278_vm9, %v1323_v52 }
 0x581   :  { %4415 = vmatmul.msk.f32.gmra.mxu3 %vm278_vm9, %v1330_v24 }
 0x585   :  { %v4683_v51 = vpop.eup %4682  ;;  %v1233_v31 = vpop.xlane.xlu1 %1232 }
 0x586   :  { %v1217_v59 = vpop.xlane.xlu2 %1216  ;;  %v4685_v58 = vpop.eup %4684  ;;  %v1324_v0 = vmul.f32 %v4683_v51, %v1282_v48 }
 0x587   :  { %v1303_v8 = vpop.f32.mrf.mxu2  ;;  %4686 = vrcp.f32 %v1217_v59  ;;  %v5765_v59 = vld [vmem:[#allocation2 + $0x98] sm:$0xff] }
 0x588   :  { %v1331_v33 = vmul.f32 %v4685_v58, %v1303_v8  ;;  %4688 = vrcp.f32 %v1231_v7  ;;  %4425 = vmatmul.msk.f32.gmra.mxu0 %vm278_vm9, %v1324_v0  ;;  %v1472_v8 = vperm.slane %v5765_v59, 0 }
 0x58a   :  { %4416 = vmatmul.msk.f32.gmra.mxu3 %vm278_vm9, %v1331_v33 }
 0x58d   :  { %v4687_v11 = vpop.eup %4686  ;;  %v1219_v16 = vpop.xlane.xlu1 %1218 }
 0x58e   :  { %v1235_v35 = vpop.xlane.xlu0 %1234  ;;  %v4689_v6 = vpop.eup %4688  ;;  %4690 = vrcp.f32 %v1219_v16  ;;  %v1325_v43 = vmul.f32 %v4687_v11, %v1285_v1 }
 0x58f   :  { %v1306_v39 = vpop.f32.mrf.mxu2  ;;  %4692 = vrcp.f32 %v1233_v31 }
 0x590   :  { %v1332_v27 = vmul.f32 %v4689_v6, %v1306_v39  ;;  %4426 = vmatmul.msk.f32.gmra.mxu0 %vm278_vm9, %v1325_v43 }
 0x592   :  { %4417 = vmatmul.msk.f32.gmra.mxu3 %vm278_vm9, %v1332_v27 }
 0x594   :  { %v4691_v48 = vpop.eup %4690 }
 0x595   :  { %v1237_v46 = vpop.xlane.xlu2 %1236  ;;  %v1326_v50 = vmul.f32 %v4691_v48, %v1288_v38  ;;  %v4693_v23 = vpop.eup %4692 }
 0x596   :  { %v1221_v5 = vpop.xlane.xlu0 %1220 }
 0x597   :  { %v1309_v26 = vpop.f32.mrf.mxu2  ;;  %4694 = vrcp.f32 %v1221_v5 }
 0x598   :  { %v1333_v21 = vmul.f32 %v4693_v23, %v1309_v26  ;;  %4696 = vrcp.f32 %v1235_v35  ;;  %4427 = vmatmul.msk.f32.gmra.mxu0 %vm278_vm9, %v1326_v50 }
 0x59a   :  { %4418 = vmatmul.msk.f32.gmra.mxu3 %vm278_vm9, %v1333_v21 }
 0x59d   :  { %v4695_v1 = vpop.eup %4694  ;;  %v1223_v22 = vpop.xlane.xlu2 %1222 }
 0x59e   :  { %v1327_v18 = vmul.f32 %v4695_v1, %v5744_v14  ;;  %v4697_v20 = vpop.eup %4696  ;;  %4698 = vrcp.f32 %v1223_v22  ;;  %v1239_v7 = vpop.xlane.xlu1 %1238 }
 0x59f   :  { %v1312_v53 = vpop.f32.mrf.mxu2  ;;  %4700 = vrcp.f32 %v1237_v46 }
 0x5a0   :  { %v1334_v32 = vmul.f32 %v4697_v20, %v1312_v53  ;;  %4428 = vmatmul.msk.f32.gmra.mxu0 %vm278_vm9, %v1327_v18  ;;  %4702 = vrcp.f32 %v1239_v7 }
 0x5a2   :  { %4419 = vmatmul.msk.f32.gmra.mxu3 %vm278_vm9, %v1334_v32 }
 0x5a4   :  { %v4699_v38 = vpop.eup %4698 }
 0x5a5   :  { %v4701_v52 = vpop.eup %4700  ;;  %v1328_v4 = vmul.f32 %v4699_v38, %v5746_v9 }
 0x5a6   :  { %v4703_v14 = vpop.eup %4702 }
 0x5a7   :  { %v1315_v30 = vpop.f32.mrf.mxu2 }
 0x5a8   :  { %v1335_v60 = vmul.f32 %v4701_v52, %v1315_v30  ;;  %4429 = vmatmul.msk.f32.gmra.mxu0 %vm278_vm9, %v1328_v4 }
 0x5aa   :  { %4420 = vmatmul.msk.f32.gmra.mxu3 %vm278_vm9, %v1335_v60 }
 0x5af   :  { %v1318_v24 = vpop.f32.mrf.mxu2 }
 0x5b0   :  { %v1336_v51 = vmul.f32 %v4703_v14, %v1318_v24 }
 0x5b2   :  { %4421 = vmatmul.msk.f32.gmra.mxu3 %vm278_vm9, %v1336_v51 }
 0x5b5   :  { %v1448_v31 = vpop.f32.mrf.mxu0 }
 0x5f5   :  { %v1451_v58 = vpop.f32.mrf.mxu0 }
 0x5fc   :  { %v1383_v0 = vpop.f32.mrf.mxu3 }
 0x5fd   :  { %v1449_v33 = vadd.f32 %v1448_v31, %v1383_v0  ;;  %v1454_v35 = vpop.f32.mrf.mxu0 }
 0x5ff   :  { %v1473_v9 = vadd.f32 %v1472_v8, %v1449_v33 }
 0x601   :  { %v1481_v11 = vadd.f32 %v1473_v9, %v5283_v25 }
 0x603   :  { %v1489_v16 = vsel %vm386_vm4, %v1481_v11, 0.0 }
 0x604   :  { %1490 = vadd.xlane.f32.xlu0 %v1489_v16  ;;  %v1386_v6 = vpop.f32.mrf.mxu3 }
 0x605   :  { %v1452_v39 = vadd.f32 %v1451_v58, %v1386_v6  ;;  %v1457_v50 = vpop.f32.mrf.mxu0 }
 0x607   :  { %v1474_v43 = vadd.f32 %v1472_v8, %v1452_v39 }
 0x609   :  { %v1482_v27 = vadd.f32 %v1474_v43, %v5298_v28 }
 0x60b   :  { %v1492_v48 = vsel %vm386_vm4, %v1482_v27, 0.0 }
 0x60c   :  { %1493 = vadd.xlane.f32.xlu1 %v1492_v48 }
 0x60d   :  { %v1389_v5 = vpop.f32.mrf.mxu3  ;;  %v1460_v18 = vpop.f32.mrf.mxu0 }
 0x60e   :  { %v1455_v46 = vadd.f32 %v1454_v35, %v1389_v5 }
 0x610   :  { %v1475_v23 = vadd.f32 %v1472_v8, %v1455_v46 }
 0x612   :  { %v1483_v26 = vadd.f32 %v1475_v23, %v5314_v45 }
 0x614   :  { %v1495_v25 = vsel %vm386_vm4, %v1483_v26, 0.0 }
 0x615   :  { %1496 = vadd.xlane.f32.xlu2 %v1495_v25  ;;  %v1392_v21 = vpop.f32.mrf.mxu3  ;;  %v1463_v52 = vpop.f32.mrf.mxu0 }
 0x616   :  { %v1458_v1 = vadd.f32 %v1457_v50, %v1392_v21 }
 0x618   :  { %v1476_v22 = vadd.f32 %v1472_v8, %v1458_v1 }
 0x61a   :  { %v1484_v20 = vadd.f32 %v1476_v22, %v5327_v57 }
 0x61c   :  { %v1498_v28 = vsel %vm386_vm4, %v1484_v20, 0.0 }
 0x61d   :  { %1499 = vadd.xlane.f32.xlu0 %v1498_v28  ;;  %v1395_v53 = vpop.f32.mrf.mxu3  ;;  %v1466_v57 = vpop.f32.mrf.mxu0 }
 0x61e   :  { %v1461_v32 = vadd.f32 %v1460_v18, %v1395_v53 }
 0x620   :  { %v1477_v38 = vadd.f32 %v1472_v8, %v1461_v32 }
 0x622   :  { %v1485_v7 = vadd.f32 %v1477_v38, %v5339_v41 }
 0x624   :  { %v1501_v45 = vsel %vm386_vm4, %v1485_v7, 0.0 }
 0x625   :  { %v1398_v30 = vpop.f32.mrf.mxu3  ;;  %1502 = vadd.xlane.f32.xlu1 %v1501_v45  ;;  %v1469_v35 = vpop.f32.mrf.mxu0 }
 0x626   :  { %v1464_v4 = vadd.f32 %v1463_v52, %v1398_v30 }
 0x628   :  { %v1478_v60 = vadd.f32 %v1472_v8, %v1464_v4 }
 0x62a   :  { %v1486_v14 = vadd.f32 %v1478_v60, %v5349_v62 }
 0x62c   :  { %v1504_v24 = vsel %vm386_vm4, %v1486_v14, 0.0 }
 0x62d   :  { %1505 = vadd.xlane.f32.xlu2 %v1504_v24  ;;  %v1401_v51 = vpop.f32.mrf.mxu3 }
 0x62e   :  { %v1467_v31 = vadd.f32 %v1466_v57, %v1401_v51 }
 0x630   :  { %v1479_v58 = vadd.f32 %v1472_v8, %v1467_v31 }
 0x632   :  { %v1487_v0 = vadd.f32 %v1479_v58, %v5374_v36 }
 0x634   :  { %v1507_v41 = vsel %vm386_vm4, %v1487_v0, 0.0 }
 0x635   :  { %1508 = vadd.xlane.f32.xlu1 %v1507_v41  ;;  %v1404_v33 = vpop.f32.mrf.mxu3 }
 0x636   :  { %v1470_v6 = vadd.f32 %v1469_v35, %v1404_v33  ;;  %v1685_v33 = vld [vmem:[%s7035_s4 + $0x10] sm:$0xff] }
 0x638   :  { %v1480_v43 = vadd.f32 %v1472_v8, %v1470_v6 }
 0x63a   :  { %v1488_v46 = vadd.f32 %v1480_v43, %v5387_v42 }
 0x677   :  { %v1491_v9 = vpop.xlane.xlu0 %1490 }
 0x678   :  { %v1513_v16 = vmul.f32 %v1491_v9, %v5181_v2  ;;  %v1683_v9 = vld [vmem:[%s7035_s4] sm:$0xff] }
 0x67a   :  { %v5783_v39 = vsub.f32 %v1481_v11, %v1513_v16  ;;  %v1510_v11 = vsel %vm386_vm4, %v1488_v46, 0.0 }
 0x67c   :  { %v1529_v62 = vmul.f32 %v5783_v39, %v5783_v39 }
 0x67e   :  { %v1537_v48 = vsel %vm386_vm4, %v1529_v62, 0.0 }
 0x67f   :  { %1538 = vadd.xlane.f32.xlu0 %v1537_v48  ;;  %v1494_v5 = vpop.xlane.xlu1 %1493 }
 0x680   :  { %v1514_v36 = vmul.f32 %v1494_v5, %v5181_v2 }
 0x682   :  { %v5790_v50 = vsub.f32 %v1482_v27, %v1514_v36 }
 0x684   :  { %v1530_v23 = vmul.f32 %v5790_v50, %v5790_v50 }
 0x686   :  { %v1540_v25 = vsel %vm386_vm4, %v1530_v23, 0.0 }
 0x687   :  { %1511 = vadd.xlane.f32.xlu0 %v1510_v11  ;;  %1541 = vadd.xlane.f32.xlu2 %v1540_v25 }
 0x688   :  { %v1497_v8 = vpop.xlane.xlu2 %1496 }
 0x689   :  { %v1515_v21 = vmul.f32 %v1497_v8, %v5181_v2 }
 0x68b   :  { %v5797_v1 = vsub.f32 %v1483_v26, %v1515_v21 }
 0x68d   :  { %v1531_v22 = vmul.f32 %v5797_v1, %v5797_v1 }
 0x68f   :  { %v1543_v42 = vsel %vm386_vm4, %v1531_v22, 0.0 }
 0x690   :  { %v1500_v27 = vpop.xlane.xlu0 %1499  ;;  %1544 = vadd.xlane.f32.xlu1 %v1543_v42 }
 0x691   :  { %v1516_v18 = vmul.f32 %v1500_v27, %v5181_v2 }
 0x693   :  { %v5803_v28 = vsub.f32 %v1484_v20, %v1516_v18 }
 0x695   :  { %v1532_v53 = vmul.f32 %v5803_v28, %v5803_v28 }
 0x697   :  { %v1546_v32 = vsel %vm386_vm4, %v1532_v53, 0.0 }
 0x698   :  { %1547 = vadd.xlane.f32.xlu2 %v1546_v32  ;;  %v1503_v38 = vpop.xlane.xlu1 %1502 }
 0x699   :  { %v1517_v26 = vmul.f32 %v1503_v38, %v5181_v2 }
 0x69b   :  { %v5809_v52 = vsub.f32 %v1485_v7, %v1517_v26  ;;  %v5848_v26 = vperm.slane %v5765_v59, 1 }
 0x69d   :  { %v1533_v45 = vmul.f32 %v5809_v52, %v5809_v52 }
 0x69f   :  { %v1549_v30 = vsel %vm386_vm4, %v1533_v45, 0.0 }
 0x6a0   :  { %1550 = vadd.xlane.f32.xlu0 %v1549_v30  ;;  %v1506_v4 = vpop.xlane.xlu2 %1505 }
 0x6a1   :  { %v1518_v20 = vmul.f32 %v1506_v4, %v5181_v2  ;;  %v5851_v4 = vperm.slane %v5765_v59, 2 }
 0x6a3   :  { %v5815_v60 = vsub.f32 %v1486_v14, %v1518_v20  ;;  %v1686_v14 = vld [vmem:[%s7035_s4 + $0x18] sm:$0xff] }
 0x6a4   :  { %1725 = vmatpush.msra.mxu3 %v1686_v14 }
 0x6a5   :  { %v1534_v24 = vmul.f32 %v5815_v60, %v5815_v60 }
 0x6a6   :  { %1726 = vmatpush.msra.mxu3 %v1685_v33 }
 0x6a7   :  { %v1552_v57 = vsel %vm386_vm4, %v1534_v24, 0.0 }
 0x6a8   :  { %v1509_v51 = vpop.xlane.xlu1 %1508  ;;  %1553 = vadd.xlane.f32.xlu1 %v1552_v57 }
 0x6a9   :  { %v1519_v7 = vmul.f32 %v1509_v51, %v5181_v2 }
 0x6ab   :  { %v5821_v31 = vsub.f32 %v1487_v0, %v1519_v7  ;;  %v1684_v0 = vld [vmem:[%s7035_s4 + $0x8] sm:$0xff] }
 0x6ac   :  { %1727 = vmatpush.msra.mxu3 %v1684_v0 }
 0x6ad   :  { %v1535_v58 = vmul.f32 %v5821_v31, %v5821_v31 }
 0x6ae   :  { %1728 = vmatpush.msra.mxu3 %v1683_v9 }
 0x6af   :  { %v1555_v41 = vsel %vm386_vm4, %v1535_v58, 0.0 }
 0x6b0   :  { %1556 = vadd.xlane.f32.xlu2 %v1555_v41 }
 0x6f2   :  { %v1539_v16 = vpop.xlane.xlu0 %1538 }
 0x6f3   :  { %v1561_v35 = vmul.f32 %v1539_v16, %v5181_v2 }
 0x6f5   :  { %v1569_v6 = vadd.f32 1e-12, %v1561_v35 }
 0x6f7   :  { %4704 = vrsqrt.f32 %v1569_v6  ;;  %vm1583_vm11 = vweird.f32 %v1569_v6 }
 0x6fa   :  { %v1512_v62 = vpop.xlane.xlu0 %1511  ;;  %v1542_v48 = vpop.xlane.xlu2 %1541 }
 0x6fb   :  { %v1520_v43 = vmul.f32 %v1512_v62, %v5181_v2  ;;  %v1562_v5 = vmul.f32 %v1542_v48, %v5181_v2 }
 0x6fd   :  { %v4705_v36 = vpop.eup %4704  ;;  %v5841_v23 = vsub.f32 %v1488_v46, %v1520_v43  ;;  %v1570_v25 = vadd.f32 1e-12, %v1562_v5 }
 0x6fe   :  { %v1578_v11 = vmul.f32 %v4705_v36, %v1569_v6  ;;  %vm1584_vm2 = vweird.f32 %v4705_v36 }
 0x6ff   :  { %v1536_v8 = vmul.f32 %v5841_v23, %v5841_v23  ;;  %4706 = vrsqrt.f32 %v1570_v25  ;;  %vm1585_vm12 = vmor %vm1583_vm11, %vm1584_vm2  ;;  %vm1593_vm14 = vweird.f32 %v1570_v25 }
 0x700   :  { %v1579_v21 = vmul.f32 %v4705_v36, %v1578_v11 }
 0x701   :  { %v1558_v22 = vsel %vm386_vm4, %v1536_v8, 0.0 }
 0x702   :  { %v1580_v42 = vmul.f32 0.5, %v1579_v21  ;;  %1559 = vadd.xlane.f32.xlu0 %v1558_v22 }
 0x703   :  { %v1545_v27 = vpop.xlane.xlu1 %1544 }
 0x704   :  { %v1581_v18 = vsub.f32 1.5, %v1580_v42  ;;  %v1563_v53 = vmul.f32 %v1545_v27, %v5181_v2 }
 0x705   :  { %v4707_v32 = vpop.eup %4706 }
 0x706   :  { %v1582_v38 = vmul.f32 %v4705_v36, %v1581_v18  ;;  %v1571_v46 = vadd.f32 1e-12, %v1563_v53  ;;  %v1588_v45 = vmul.f32 %v4707_v32, %v1570_v25  ;;  %vm1594_vm13 = vweird.f32 %v4707_v32 }
 0x707   :  { %vm1595_vm15 = vmor %vm1593_vm14, %vm1594_vm13 }
 0x708   :  { %v1586_v30 = vsel %vm1585_vm12, %v4705_v36, %v1582_v38  ;;  %4708 = vrsqrt.f32 %v1571_v46  ;;  %v1589_v24 = vmul.f32 %v4707_v32, %v1588_v45  ;;  %vm1603_vm1 = vweird.f32 %v1571_v46 }
 0x709   :  { %v1657_v20 = vmul.f32 %v1586_v30, %v5783_v39 }
 0x70a   :  { %v1590_v51 = vmul.f32 0.5, %v1589_v24 }
 0x70b   :  { %v1666_v57 = vmul.f32 %v5848_v26, %v1657_v20  ;;  %v1548_v7 = vpop.xlane.xlu2 %1547 }
 0x70c   :  { %v1564_v58 = vmul.f32 %v1548_v7, %v5181_v2  ;;  %v1591_v14 = vsub.f32 1.5, %v1590_v51 }
 0x70d   :  { %v5857_v41 = vadd.f32 %v5851_v4, %v1666_v57 }
 0x70e   :  { %v4709_v33 = vpop.eup %4708  ;;  %v1572_v0 = vadd.f32 1e-12, %v1564_v58  ;;  %v1592_v9 = vmul.f32 %v4707_v32, %v1591_v14 }
 0x70f   :  { %v1598_v59 = vmul.f32 %v4709_v33, %v1571_v46  ;;  %4430 = vmatmul.msk.f32.vlgmr.msra.gmra.mxu3 %vm386_vm4, %v5857_v41  ;;  %vm1604_vm0 = vweird.f32 %v4709_v33 }
 0x710   :  { %4710 = vrsqrt.f32 %v1572_v0  ;;  %v1596_v39 = vsel %vm1595_vm15, %v4707_v32, %v1592_v9  ;;  %vm1605_vm3 = vmor %vm1603_vm1, %vm1604_vm0  ;;  %vm1613_vm6 = vweird.f32 %v1572_v0 }
 0x711   :  { %v1599_v16 = vmul.f32 %v4709_v33, %v1598_v59  ;;  %v1658_v35 = vmul.f32 %v1596_v39, %v5790_v50 }
 0x713   :  { %v1600_v6 = vmul.f32 0.5, %v1599_v16  ;;  %v1551_v62 = vpop.xlane.xlu0 %1550  ;;  %v1667_v48 = vmul.f32 %v5848_v26, %v1658_v35 }
 0x714   :  { %v1565_v43 = vmul.f32 %v1551_v62, %v5181_v2 }
 0x715   :  { %v1601_v5 = vsub.f32 1.5, %v1600_v6  ;;  %v5865_v25 = vadd.f32 %v5851_v4, %v1667_v48 }
 0x716   :  { %v4711_v36 = vpop.eup %4710  ;;  %v1573_v11 = vadd.f32 1e-12, %v1565_v43 }
 0x717   :  { %v1602_v8 = vmul.f32 %v4709_v33, %v1601_v5  ;;  %v1608_v21 = vmul.f32 %v4711_v36, %v1572_v0  ;;  %4431 = vmatmul.msk.f32.gmra.mxu3 %vm386_vm4, %v5865_v25  ;;  %vm1614_vm5 = vweird.f32 %v4711_v36 }
 0x718   :  { %4712 = vrsqrt.f32 %v1573_v11  ;;  %vm1615_vm7 = vmor %vm1613_vm6, %vm1614_vm5  ;;  %vm1623_vm10 = vweird.f32 %v1573_v11 }
 0x719   :  { %v1606_v50 = vsel %vm1605_vm3, %v4709_v33, %v1602_v8  ;;  %v1609_v22 = vmul.f32 %v4711_v36, %v1608_v21 }
 0x71a   :  { %v1659_v42 = vmul.f32 %v1606_v50, %v5797_v1 }
 0x71b   :  { %v1610_v27 = vmul.f32 0.5, %v1609_v22  ;;  %v1554_v18 = vpop.xlane.xlu1 %1553 }
 0x71c   :  { %v1566_v53 = vmul.f32 %v1554_v18, %v5181_v2  ;;  %v1668_v32 = vmul.f32 %v5848_v26, %v1659_v42 }
 0x71d   :  { %v1611_v38 = vsub.f32 1.5, %v1610_v27 }
 0x71e   :  { %v4713_v45 = vpop.eup %4712  ;;  %v1574_v46 = vadd.f32 1e-12, %v1566_v53  ;;  %v5873_v30 = vadd.f32 %v5851_v4, %v1668_v32 }
 0x71f   :  { %v1612_v20 = vmul.f32 %v4711_v36, %v1611_v38  ;;  %v1618_v24 = vmul.f32 %v4713_v45, %v1573_v11  ;;  %vm1624_vm8 = vweird.f32 %v4713_v45 }
 0x720   :  { %4714 = vrsqrt.f32 %v1574_v46  ;;  %4432 = vmatmul.msk.f32.gmra.mxu3 %vm386_vm4, %v5873_v30  ;;  %vm1625_vm2 = vmor %vm1623_vm10, %vm1624_vm8  ;;  %vm1633_vm12 = vweird.f32 %v1574_v46 }
 0x721   :  { %v1616_v1 = vsel %vm1615_vm7, %v4711_v36, %v1612_v20  ;;  %v1619_v57 = vmul.f32 %v4713_v45, %v1618_v24 }
 0x722   :  { %v1660_v51 = vmul.f32 %v1616_v1, %v5803_v28 }
 0x723   :  { %v1620_v7 = vmul.f32 0.5, %v1619_v57  ;;  %v1557_v58 = vpop.xlane.xlu2 %1556 }
 0x724   :  { %v1567_v14 = vmul.f32 %v1557_v58, %v5181_v2  ;;  %v1669_v33 = vmul.f32 %v5848_v26, %v1660_v51 }
 0x725   :  { %v1621_v9 = vsub.f32 1.5, %v1620_v7 }
 0x726   :  { %v4715_v59 = vpop.eup %4714  ;;  %v1575_v0 = vadd.f32 1e-12, %v1567_v14  ;;  %v5881_v39 = vadd.f32 %v5851_v4, %v1669_v33 }
 0x727   :  { %v1622_v16 = vmul.f32 %v4713_v45, %v1621_v9  ;;  %v1628_v35 = vmul.f32 %v4715_v59, %v1574_v46  ;;  %vm1634_vm11 = vweird.f32 %v4715_v59 }
 0x728   :  { %4716 = vrsqrt.f32 %v1575_v0  ;;  %4433 = vmatmul.msk.f32.gmra.mxu3 %vm386_vm4, %v5881_v39  ;;  %vm1635_vm13 = vmor %vm1633_vm12, %vm1634_vm11  ;;  %vm1643_vm15 = vweird.f32 %v1575_v0  ;;  %vm2115_vm12 = vcmask 523264  }
 0x729   :  { %v1626_v28 = vsel %vm1625_vm2, %v4713_v45, %v1622_v16  ;;  %v1629_v6 = vmul.f32 %v4715_v59, %v1628_v35 }
 0x72a   :  { %v1661_v62 = vmul.f32 %v1626_v28, %v5809_v52 }
 0x72b   :  { %v1630_v43 = vmul.f32 0.5, %v1629_v6 }
 0x72c   :  { %v1670_v48 = vmul.f32 %v5848_v26, %v1661_v62 }
 0x72d   :  { %v1631_v5 = vsub.f32 1.5, %v1630_v43 }
 0x72e   :  { %v4717_v36 = vpop.eup %4716  ;;  %v5888_v8 = vadd.f32 %v5851_v4, %v1670_v48 }
 0x72f   :  { %v1632_v11 = vmul.f32 %v4715_v59, %v1631_v5  ;;  %v1638_v21 = vmul.f32 %v4717_v36, %v1575_v0  ;;  %vm1644_vm14 = vweird.f32 %v4717_v36  ;;  %v5912_v0 = vld [vmem:[%s7035_s4 + $0x40] ss:$0 sm:$0xff] }
 0x730   :  { %4434 = vmatmul.msk.f32.gmra.mxu3 %vm386_vm4, %v5888_v8  ;;  %vm1645_vm0 = vmor %vm1643_vm15, %vm1644_vm14 }
 0x731   :  { %v1636_v50 = vsel %vm1635_vm13, %v4715_v59, %v1632_v11  ;;  %v1639_v22 = vmul.f32 %v4717_v36, %v1638_v21 }
 0x732   :  { %v1662_v52 = vmul.f32 %v1636_v50, %v5815_v60 }
 0x733   :  { %v1640_v42 = vmul.f32 0.5, %v1639_v22 }
 0x734   :  { %v1671_v27 = vmul.f32 %v5848_v26, %v1662_v52 }
 0x735   :  { %v1641_v18 = vsub.f32 1.5, %v1640_v42 }
 0x736   :  { %v5895_v53 = vadd.f32 %v5851_v4, %v1671_v27 }
 0x737   :  { %v1642_v32 = vmul.f32 %v4717_v36, %v1641_v18 }
 0x738   :  { %4435 = vmatmul.msk.f32.gmra.mxu3 %vm386_vm4, %v5895_v53 }
 0x739   :  { %v1646_v38 = vsel %vm1645_vm0, %v4717_v36, %v1642_v32 }
 0x73a   :  { %v1663_v45 = vmul.f32 %v1646_v38, %v5821_v31 }
 0x73c   :  { %v1672_v46 = vmul.f32 %v5848_v26, %v1663_v45  ;;  %v2113_v45 = vld [vmem:[#allocation2 + $0x120] sm:$0xff] }
 0x73d   :  { %2148 = vmatpush.msra.mxu0 %v2113_v45 }
 0x73e   :  { %v5902_v60 = vadd.f32 %v5851_v4, %v1672_v46 }
 0x740   :  { %4436 = vmatmul.msk.f32.gmra.mxu3 %vm386_vm4, %v5902_v60 }
 0x775   :  { %v1560_v20 = vpop.xlane.xlu0 %1559 }
 0x776   :  { %v1568_v24 = vmul.f32 %v1560_v20, %v5181_v2 }
 0x778   :  { %v1576_v1 = vadd.f32 1e-12, %v1568_v24 }
 0x77a   :  { %4718 = vrsqrt.f32 %v1576_v1  ;;  %vm1653_vm3 = vweird.f32 %v1576_v1 }
 0x780   :  { %v4719_v57 = vpop.eup %4718 }
 0x781   :  { %v1648_v51 = vmul.f32 %v4719_v57, %v1576_v1  ;;  %vm1654_vm1 = vweird.f32 %v4719_v57 }
 0x782   :  { %vm1655_vm5 = vmor %vm1653_vm3, %vm1654_vm1 }
 0x783   :  { %v1649_v7 = vmul.f32 %v4719_v57, %v1648_v51 }
 0x785   :  { %v1650_v58 = vmul.f32 0.5, %v1649_v7 }
 0x787   :  { %v1651_v14 = vsub.f32 1.5, %v1650_v58 }
 0x789   :  { %v1652_v31 = vmul.f32 %v4719_v57, %v1651_v14 }
 0x78b   :  { %v1656_v33 = vsel %vm1655_vm5, %v4719_v57, %v1652_v31 }
 0x78c   :  { %v1664_v9 = vmul.f32 %v1656_v33, %v5841_v23 }
 0x78e   :  { %v1673_v59 = vmul.f32 %v5848_v26, %v1664_v9 }
 0x790   :  { %v5915_v16 = vadd.f32 %v5851_v4, %v1673_v59 }
 0x792   :  { %v1730_v35 = vpop.f32.mrf.mxu3  ;;  %4437 = vmatmul.msk.f32.gmra.mxu3 %vm386_vm4, %v5915_v16 }
 0x793   :  { %v5920_v28 = vadd.f32 %v5912_v0, %v1730_v35 }
 0x795   :  { %v5923_v6 = vmul.f32 0.70710677, %v5920_v28 }
 0x797   :  { %v1770_v23 = vmul.f32 %v5923_v6, %v5923_v6 }
 0x799   :  { %v1771_v26 = vmin.f32 %v1770_v23, 16.0  ;;  %v2112_v23 = vld [vmem:[#allocation2 + $0x118] sm:$0xff] }
 0x79a   :  { %v1733_v48 = vpop.f32.mrf.mxu3  ;;  %2149 = vmatpush.msra.mxu0 %v2112_v23 }
 0x79b   :  { %v1772_v62 = vmul.f32 2.1237322e-06, %v1771_v26  ;;  %v1783_v43 = vmul.f32 3.8918573e-05, %v1771_v26  ;;  %v5928_v4 = vadd.f32 %v5912_v0, %v1733_v48 }
 0x79d   :  { %v1773_v5 = vadd.f32 0.00028619796, %v1772_v62  ;;  %v1784_v36 = vadd.f32 0.001143296, %v1783_v43  ;;  %v5931_v11 = vmul.f32 0.70710677, %v5928_v4 }
 0x79f   :  { %v1774_v21 = vmul.f32 %v1773_v5, %v1771_v26  ;;  %v1785_v50 = vmul.f32 %v1784_v36, %v1771_v26  ;;  %v1810_v22 = vmul.f32 %v5931_v11, %v5931_v11 }
 0x7a1   :  { %v1775_v52 = vadd.f32 0.0036580483, %v1774_v21  ;;  %v1786_v42 = vadd.f32 0.014752088, %v1785_v50  ;;  %v5935_v27 = vmin.f32 %v1810_v22, 16.0  ;;  %v2111_v21 = vld [vmem:[#allocation2 + $0x110] sm:$0xff] }
 0x7a2   :  { %2150 = vmatpush.msra.mxu0 %v2111_v21 }
 0x7a3   :  { %v1776_v18 = vmul.f32 %v1775_v52, %v1771_v26  ;;  %v1787_v32 = vmul.f32 %v1786_v42, %v1771_v26  ;;  %v1736_v38 = vpop.f32.mrf.mxu3  ;;  %v1812_v46 = vmul.f32 2.1237322e-06, %v5935_v27  ;;  %v1823_v20 = vmul.f32 3.8918573e-05, %v5935_v27 }
 0x7a4   :  { %v5940_v24 = vadd.f32 %v5912_v0, %v1736_v38  ;;  %v2110_v38 = vld [vmem:[#allocation2 + $0x108] sm:$0xff] }
 0x7a5   :  { %v1777_v1 = vadd.f32 0.05243302, %v1776_v18  ;;  %v1788_v57 = vadd.f32 0.112945676, %v1787_v32  ;;  %v1813_v51 = vadd.f32 0.00028619796, %v1812_v46  ;;  %2151 = vmatpush.msra.mxu0 %v2110_v38 }
 0x7a6   :  { %v1824_v7 = vadd.f32 0.001143296, %v1823_v20  ;;  %v5943_v14 = vmul.f32 0.70710677, %v5940_v24 }
 0x7a7   :  { %v1789_v58 = vmul.f32 %v1788_v57, %v1771_v26  ;;  %v1814_v31 = vmul.f32 %v1813_v51, %v5935_v27  ;;  %v1778_v9 = vmul.f32 %v1777_v1, %v1771_v26  ;;  %v2109_v1 = vld [vmem:[#allocation2 + $0x100] sm:$0xff] }
 0x7a8   :  { %v1825_v33 = vmul.f32 %v1824_v7, %v5935_v27  ;;  %v1850_v35 = vmul.f32 %v5943_v14, %v5943_v14  ;;  %2152 = vmatpush.msra.mxu0 %v2109_v1 }
 0x7a9   :  { %v1790_v59 = vadd.f32 0.4994258, %v1789_v58  ;;  %v1815_v62 = vadd.f32 0.0036580483, %v1814_v31  ;;  %v1779_v52 = vadd.f32 0.18741608, %v1778_v9 }
 0x7aa   :  { %v1826_v43 = vadd.f32 0.014752088, %v1825_v33  ;;  %v5949_v5 = vmin.f32 %v1850_v35, 16.0 }
 0x7ab   :  { %v1791_v48 = vmul.f32 %v1790_v59, %v1771_v26  ;;  %v1739_v36 = vpop.f32.mrf.mxu3  ;;  %v1816_v50 = vmul.f32 %v1815_v62, %v5935_v27  ;;  %v1780_v58 = vmul.f32 %v1779_v52, %v1771_v26 }
 0x7ac   :  { %v1827_v22 = vmul.f32 %v1826_v43, %v5935_v27  ;;  %v1852_v18 = vmul.f32 2.1237322e-06, %v5949_v5  ;;  %v5957_v32 = vadd.f32 %v5912_v0, %v1739_v36  ;;  %v1863_v20 = vmul.f32 3.8918573e-05, %v5949_v5 }
 0x7ad   :  { %v5953_v42 = vadd.f32 1.0, %v1791_v48  ;;  %v1817_v45 = vadd.f32 0.05243302, %v1816_v50  ;;  %v2108_v48 = vld [vmem:[#allocation2 + $0xf8] sm:$0xff]  ;;  %v1781_v50 = vadd.f32 1.1283791, %v1780_v58 }
 0x7ae   :  { %v1828_v46 = vadd.f32 0.112945676, %v1827_v22  ;;  %v1853_v7 = vadd.f32 0.00028619796, %v1852_v18  ;;  %v1864_v31 = vadd.f32 0.001143296, %v1863_v20  ;;  %2153 = vmatpush.msra.mxu0 %v2108_v48 }
 0x7af   :  { %4720 = vrcp.f32 %v5953_v42  ;;  %v1818_v57 = vmul.f32 %v1817_v45, %v5935_v27  ;;  %v5964_v33 = vmul.f32 0.70710677, %v5957_v32  ;;  %v2107_v18 = vld [vmem:[#allocation2 + $0xf0] sm:$0xff]  ;;  %v2106_v58 = vld [vmem:[#allocation2 + $0xe8] sm:$0xff]  ;;  %v1782_v48 = vmul.f32 %v1781_v50, %v5923_v6 }
 0x7b0   :  { %v1829_v51 = vmul.f32 %v1828_v46, %v5935_v27  ;;  %v1854_v35 = vmul.f32 %v1853_v7, %v5949_v5  ;;  %v1865_v23 = vmul.f32 %v1864_v31, %v5949_v5  ;;  %2154 = vmatpush.msra.mxu0 %v2107_v18  ;;  %vm1798_vm7 = vweird.f32 %v5953_v42 }
 0x7b1   :  { %v1819_v9 = vadd.f32 0.18741608, %v1818_v57  ;;  %v1890_v62 = vmul.f32 %v5964_v33, %v5964_v33 }
 0x7b2   :  { %v1830_v59 = vadd.f32 0.4994258, %v1829_v51  ;;  %v1855_v21 = vadd.f32 0.0036580483, %v1854_v35  ;;  %v1866_v22 = vadd.f32 0.014752088, %v1865_v23  ;;  %2155 = vmatpush.msra.mxu0 %v2106_v58 }
 0x7b3   :  { %v1742_v43 = vpop.f32.mrf.mxu3  ;;  %v5971_v52 = vmin.f32 %v1890_v62, 16.0  ;;  %v1820_v45 = vmul.f32 %v1819_v9, %v5935_v27  ;;  %v1804_v9 = vand.u32 2147483648, %v5953_v42 }
 0x7b4   :  { %v1831_v36 = vmul.f32 %v1830_v59, %v5935_v27  ;;  %v5978_v20 = vadd.f32 %v5912_v0, %v1742_v43  ;;  %v1856_v1 = vmul.f32 %v1855_v21, %v5949_v5  ;;  %v1867_v57 = vmul.f32 %v1866_v22, %v5949_v5 }
 0x7b5   :  { %v4721_v26 = vpop.eup %4720  ;;  %v1892_v51 = vmul.f32 2.1237322e-06, %v5971_v52  ;;  %v1903_v7 = vmul.f32 3.8918573e-05, %v5971_v52  ;;  %v1802_v27 = vand.u32 2147483647, %v5953_v42 }
 0x7b6   :  { %v1794_v38 = vmul.f32 %v4721_v26, %v5953_v42  ;;  %v5975_v46 = vadd.f32 1.0, %v1831_v36  ;;  %vm1799_vm6 = vweird.f32 %v4721_v26  ;;  %v1857_v59 = vadd.f32 0.05243302, %v1856_v1 }
 0x7b7   :  { %v1868_v23 = vadd.f32 0.112945676, %v1867_v57  ;;  %v1893_v62 = vadd.f32 0.00028619796, %v1892_v51  ;;  %v1904_v43 = vadd.f32 0.001143296, %v1903_v7  ;;  %vm1800_vm8 = vmor %vm1798_vm7, %vm1799_vm6 }
 0x7b8   :  { %v1795_v31 = vsub.f32 1.0, %v1794_v38  ;;  %4722 = vrcp.f32 %v5975_v46  ;;  %v1821_v36 = vadd.f32 1.1283791, %v1820_v45  ;;  %v5990_v21 = vmul.f32 0.70710677, %v5978_v20 }
 0x7b9   :  { %v1869_v18 = vmul.f32 %v1868_v23, %v5949_v5  ;;  %v1894_v38 = vmul.f32 %v1893_v62, %v5971_v52  ;;  %v1905_v58 = vmul.f32 %v1904_v43, %v5971_v52  ;;  %vm1803_vm10 = vcmp.eq.f32.partialorder %v1802_v27, 8.507059e+37 }
 0x7ba   :  { %v1796_v35 = vmul.f32 %v4721_v26, %v1795_v31  ;;  %v1805_v1 = vor.u32 1.1754944e-38, %v1804_v9  ;;  %v1858_v57 = vmul.f32 %v1857_v59, %v5949_v5  ;;  %v1930_v6 = vmul.f32 %v5990_v21, %v5990_v21 }
 0x7bb   :  { %v1870_v45 = vadd.f32 0.4994258, %v1869_v18  ;;  %v1895_v51 = vadd.f32 0.0036580483, %v1894_v38  ;;  %v1906_v7 = vadd.f32 0.014752088, %v1905_v58  ;;  %v1822_v23 = vmul.f32 %v1821_v36, %v5931_v11  ;;  %v1745_v54 = vpop.f32.mrf.mxu3 }
 0x7bc   :  { %v1797_v22 = vadd.f32 %v4721_v26, %v1796_v35  ;;  %v1754_v31 = vmul.f32 0.5, %v5920_v28  ;;  %v1842_v27 = vand.u32 2147483647, %v5975_v46  ;;  %v6007_v18 = vmin.f32 %v1930_v6, 16.0 }
 0x7bd   :  { %v1871_v9 = vmul.f32 %v1870_v45, %v5949_v5  ;;  %v1907_v59 = vmul.f32 %v1906_v7, %v5971_v52  ;;  %v1859_v38 = vadd.f32 0.18741608, %v1858_v57  ;;  %vm1838_vm11 = vweird.f32 %v5975_v46 }
 0x7be   :  { %v4723_v42 = vpop.eup %4722  ;;  %v1801_v50 = vsel %vm1800_vm8, %v4721_v26, %v1797_v22  ;;  %v1844_v26 = vand.u32 2147483648, %v5975_v46  ;;  %v1896_v22 = vmul.f32 %v1895_v51, %v5971_v52  ;;  %v1932_v58 = vmul.f32 2.1237322e-06, %v6007_v18 }
 0x7bf   :  { %v1806_v35 = vsel %vm1803_vm10, %v1805_v1, %v1801_v50  ;;  %v1834_v62 = vmul.f32 %v4723_v42, %v5975_v46  ;;  %v6009_v11 = vadd.f32 1.0, %v1871_v9  ;;  %v1908_v36 = vadd.f32 0.112945676, %v1907_v59 }
 0x7c0   :  { %v1807_v43 = vmul.f32 %v1806_v35, %v1782_v48  ;;  %vm1839_vm2 = vweird.f32 %v4723_v42  ;;  %v1943_v1 = vmul.f32 3.8918573e-05, %v6007_v18  ;;  %v6016_v45 = vadd.f32 %v5912_v0, %v1745_v54 }
 0x7c1   :  { %v1835_v44 = vsub.f32 1.0, %v1834_v62  ;;  %4724 = vrcp.f32 %v6009_v11  ;;  %v1897_v51 = vadd.f32 0.05243302, %v1896_v22  ;;  %v1909_v57 = vmul.f32 %v1908_v36, %v5971_v52  ;;  %vm1840_vm13 = vmor %vm1838_vm11, %vm1839_vm2 }
 0x7c2   :  { %v4438_v28 = vclamps-f32 %v1807_v43, 1.0  ;;  %v1933_v35 = vadd.f32 0.00028619796, %v1932_v58  ;;  %v1944_v62 = vadd.f32 0.001143296, %v1943_v1  ;;  %vm1843_vm14 = vcmp.eq.f32.partialorder %v1842_v27, 8.507059e+37 }
 0x7c3   :  { %v1836_v48 = vmul.f32 %v4723_v42, %v1835_v44  ;;  %v1845_v44 = vor.u32 1.1754944e-38, %v1844_v26  ;;  %v1860_v9 = vmul.f32 %v1859_v38, %v5949_v5  ;;  %v1910_v46 = vadd.f32 0.4994258, %v1909_v57  ;;  %v1748_v38 = vpop.f32.mrf.mxu3 }
 0x7c4   :  { %v2090_v50 = vadd.f32 1.0, %v4438_v28  ;;  %v1934_v28 = vmul.f32 %v1933_v35, %v6007_v18  ;;  %v1945_v54 = vmul.f32 %v1944_v62, %v6007_v18  ;;  %v6023_v22 = vmul.f32 0.70710677, %v6016_v45 }
 0x7c5   :  { %v1837_v6 = vadd.f32 %v4723_v42, %v1836_v48  ;;  %v1898_v26 = vmul.f32 %v1897_v51, %v5971_v52  ;;  %v1911_v36 = vmul.f32 %v1910_v46, %v5971_v52  ;;  %v1755_v48 = vmul.f32 0.5, %v5928_v4 }
 0x7c6   :  { %v2098_v7 = vmul.f32 %v2090_v50, %v1754_v31  ;;  %v1946_v27 = vadd.f32 0.014752088, %v1945_v54  ;;  %v1970_v5 = vmul.f32 %v6023_v22, %v6023_v22  ;;  %v1935_v50 = vadd.f32 0.0036580483, %v1934_v28 }
 0x7c7   :  { %v1841_v43 = vsel %vm1840_vm13, %v4723_v42, %v1837_v6  ;;  %v4725_v42 = vpop.eup %4724  ;;  %v1861_v6 = vadd.f32 1.1283791, %v1860_v9  ;;  %v6032_v57 = vadd.f32 1.0, %v1911_v36  ;;  %v1899_v35 = vadd.f32 0.18741608, %v1898_v26 }
 0x7c8   :  { %v1846_v59 = vsel %vm1843_vm14, %v1845_v44, %v1841_v43  ;;  %4446 = vmatmul.msk.f32.vlgmr.msra.gmra.mxu0 %vm2115_vm12, %v2098_v7  ;;  %v1874_v1 = vmul.f32 %v4725_v42, %v6009_v11  ;;  %v6035_v51 = vmin.f32 %v1970_v5, 16.0  ;;  %v6038_v62 = vadd.f32 %v5912_v0, %v1748_v38 }
 0x7c9   :  { %v1847_v31 = vmul.f32 %v1846_v59, %v1822_v23  ;;  %v1947_v23 = vmul.f32 %v1946_v27, %v6007_v18  ;;  %vm1879_vm15 = vweird.f32 %v4725_v42  ;;  %v1882_v4 = vand.u32 2147483647, %v6009_v11 }
 0x7ca   :  { %v1875_v44 = vsub.f32 1.0, %v1874_v1  ;;  %v1884_v43 = vand.u32 2147483648, %v6009_v11  ;;  %4726 = vrcp.f32 %v6032_v57  ;;  %v1936_v59 = vmul.f32 %v1935_v50, %v6007_v18 }
 0x7cb   :  { %v4439_v58 = vclamps-f32 %v1847_v31, 1.0  ;;  %v1948_v28 = vadd.f32 0.112945676, %v1947_v23  ;;  %v1862_v54 = vmul.f32 %v1861_v6, %v5943_v14  ;;  %vm1878_vm0 = vweird.f32 %v6009_v11 }
 0x7cc   :  { %v1876_v46 = vmul.f32 %v4725_v42, %v1875_v44  ;;  %v1972_v31 = vmul.f32 2.1237322e-06, %v6035_v51  ;;  %v1983_v26 = vmul.f32 3.8918573e-05, %v6035_v51  ;;  %v1900_v27 = vmul.f32 %v1899_v35, %v5971_v52  ;;  %vm1880_vm1 = vmor %vm1878_vm0, %vm1879_vm15 }
 0x7cd   :  { %v2091_v7 = vadd.f32 1.0, %v4439_v58  ;;  %v1949_v5 = vmul.f32 %v1948_v28, %v6007_v18  ;;  %v6051_v38 = vmul.f32 0.70710677, %v6038_v62  ;;  %vm1883_vm3 = vcmp.eq.f32.partialorder %v1882_v4, 8.507059e+37 }
 0x7ce   :  { %v1877_v36 = vadd.f32 %v4725_v42, %v1876_v46  ;;  %v1885_v14 = vor.u32 1.1754944e-38, %v1884_v43  ;;  %v1984_v11 = vadd.f32 0.001143296, %v1983_v26  ;;  %v1937_v1 = vadd.f32 0.05243302, %v1936_v59 }
 0x7cf   :  { %v2099_v9 = vmul.f32 %v2091_v7, %v1755_v48  ;;  %v1973_v48 = vadd.f32 0.00028619796, %v1972_v31  ;;  %v1950_v50 = vadd.f32 0.4994258, %v1949_v5  ;;  %v2010_v6 = vmul.f32 %v6051_v38, %v6051_v38 }
 0x7d0   :  { %v1881_v58 = vsel %vm1880_vm1, %v4725_v42, %v1877_v36  ;;  %v4727_v52 = vpop.eup %4726  ;;  %v1985_v44 = vmul.f32 %v1984_v11, %v6035_v51  ;;  %v1756_v35 = vmul.f32 0.5, %v5940_v24  ;;  %v1901_v46 = vadd.f32 1.1283791, %v1900_v27 }
 0x7d1   :  { %4447 = vmatmul.msk.f32.gmra.mxu0 %vm2115_vm12, %v2099_v9  ;;  %v1886_v23 = vsel %vm1883_vm3, %v1885_v14, %v1881_v58  ;;  %v1974_v7 = vmul.f32 %v1973_v48, %v6035_v51  ;;  %v1914_v4 = vmul.f32 %v4727_v52, %v6032_v57  ;;  %v1922_v43 = vand.u32 2147483647, %v6032_v57 }
 0x7d2   :  { %v1887_v9 = vmul.f32 %v1886_v23, %v1862_v54  ;;  %v1951_v42 = vmul.f32 %v1950_v50, %v6007_v18  ;;  %v1986_v59 = vadd.f32 0.014752088, %v1985_v44  ;;  %v6063_v28 = vmin.f32 %v2010_v6, 16.0 }
 0x7d3   :  { %v1915_v26 = vsub.f32 1.0, %v1914_v4  ;;  %v1924_v36 = vand.u32 2147483648, %v6032_v57  ;;  %v1938_v5 = vmul.f32 %v1937_v1, %v6007_v18  ;;  %v1975_v48 = vadd.f32 0.0036580483, %v1974_v7 }
 0x7d4   :  { %v4440_v31 = vclamps-f32 %v1887_v9, 1.0  ;;  %v1952_v14 = vadd.f32 1.0, %v1951_v42  ;;  %v1987_v24 = vmul.f32 %v1986_v59, %v6035_v51  ;;  %v2012_v54 = vmul.f32 2.1237322e-06, %v6063_v28 }
 0x7d5   :  { %v1916_v11 = vmul.f32 %v4727_v52, %v1915_v26  ;;  %vm1919_vm5 = vweird.f32 %v4727_v52  ;;  %v2023_v58 = vmul.f32 3.8918573e-05, %v6063_v28  ;;  %vm1918_vm6 = vweird.f32 %v6032_v57 }
 0x7d6   :  { %v2092_v27 = vadd.f32 1.0, %v4440_v31  ;;  %4728 = vrcp.f32 %v1952_v14  ;;  %v1939_v23 = vadd.f32 0.18741608, %v1938_v5  ;;  %v1988_v44 = vadd.f32 0.112945676, %v1987_v24  ;;  %vm1920_vm7 = vmor %vm1918_vm6, %vm1919_vm5 }
 0x7d7   :  { %v1917_v6 = vadd.f32 %v4727_v52, %v1916_v11  ;;  %v1925_v1 = vor.u32 1.1754944e-38, %v1924_v36  ;;  %v1976_v7 = vmul.f32 %v1975_v48, %v6035_v51  ;;  %v2013_v9 = vadd.f32 0.00028619796, %v2012_v54 }
 0x7d8   :  { %v2100_v50 = vmul.f32 %v2092_v27, %v1756_v35  ;;  %v2024_v4 = vadd.f32 0.001143296, %v2023_v58  ;;  %v1902_v42 = vmul.f32 %v1901_v46, %v5964_v33  ;;  %vm1923_vm8 = vcmp.eq.f32.partialorder %v1922_v43, 8.507059e+37 }
 0x7d9   :  { %v1921_v59 = vsel %vm1920_vm7, %v4727_v52, %v1917_v6  ;;  %v1989_v31 = vmul.f32 %v1988_v44, %v6035_v51  ;;  %v2014_v35 = vmul.f32 %v2013_v9, %v6063_v28  ;;  %v1940_v36 = vmul.f32 %v1939_v23, %v6007_v18 }
 0x7da   :  { %4448 = vmatmul.msk.f32.gmra.mxu0 %vm2115_vm12, %v2100_v50  ;;  %v1926_v57 = vsel %vm1923_vm8, %v1925_v1, %v1921_v59  ;;  %v2025_v26 = vmul.f32 %v2024_v4, %v6063_v28  ;;  %v1977_v54 = vadd.f32 0.05243302, %v1976_v7  ;;  %v1757_v58 = vmul.f32 0.5, %v5957_v32 }
 0x7db   :  { %v1927_v5 = vmul.f32 %v1926_v57, %v1902_v42  ;;  %v1990_v24 = vadd.f32 0.4994258, %v1989_v31  ;;  %v2015_v46 = vadd.f32 0.0036580483, %v2014_v35  ;;  %v1941_v6 = vadd.f32 1.1283791, %v1940_v36 }
 0x7dc   :  { %v4729_v48 = vpop.eup %4728  ;;  %v2026_v27 = vadd.f32 0.014752088, %v2025_v26  ;;  %v1964_v1 = vand.u32 2147483648, %v1952_v14  ;;  %v1978_v9 = vmul.f32 %v1977_v54, %v6035_v51  ;;  %v1962_v42 = vand.u32 2147483647, %v1952_v14 }
 0x7dd   :  { %v4441_v11 = vclamps-f32 %v1927_v5, 1.0  ;;  %v1954_v33 = vmul.f32 %v4729_v48, %v1952_v14  ;;  %v1991_v52 = vmul.f32 %v1990_v24, %v6035_v51  ;;  %vm1959_vm10 = vweird.f32 %v4729_v48 }
 0x7de   :  { %v2027_v43 = vmul.f32 %v2026_v27, %v6063_v28  ;;  %v2016_v59 = vmul.f32 %v2015_v46, %v6063_v28  ;;  %vm1958_vm2 = vweird.f32 %v1952_v14  ;;  %v1965_v32 = vor.u32 1.1754944e-38, %v1964_v1 }
 0x7df   :  { %v2093_v50 = vadd.f32 1.0, %v4441_v11  ;;  %v1955_v44 = vsub.f32 1.0, %v1954_v33  ;;  %v1992_v18 = vadd.f32 1.0, %v1991_v52  ;;  %vm1960_vm11 = vmor %vm1958_vm2, %vm1959_vm10  ;;  %v1979_v35 = vadd.f32 0.18741608, %v1978_v9 }
 0x7e0   :  { %v2028_v23 = vadd.f32 0.112945676, %v2027_v43  ;;  %v1942_v26 = vmul.f32 %v1941_v6, %v5990_v21  ;;  %vm1963_vm13 = vcmp.eq.f32.partialorder %v1962_v42, 8.507059e+37  ;;  %v2017_v54 = vadd.f32 0.05243302, %v2016_v59 }
 0x7e1   :  { %v2101_v4 = vmul.f32 %v2093_v50, %v1757_v58  ;;  %v1956_v7 = vmul.f32 %v4729_v48, %v1955_v44  ;;  %4730 = vrcp.f32 %v1992_v18  ;;  %v1980_v14 = vmul.f32 %v1979_v35, %v6035_v51 }
 0x7e2   :  { %v2029_v57 = vmul.f32 %v2028_v23, %v6063_v28  ;;  %v2018_v43 = vmul.f32 %v2017_v54, %v6063_v28  ;;  %v1758_v50 = vmul.f32 0.5, %v5978_v20  ;;  %v2004_v6 = vand.u32 2147483648, %v1992_v18 }
 0x7e3   :  { %v1957_v31 = vadd.f32 %v4729_v48, %v1956_v7  ;;  %4449 = vmatmul.msk.f32.gmra.mxu0 %vm2115_vm12, %v2101_v4  ;;  %v2002_v23 = vand.u32 2147483647, %v1992_v18  ;;  %vm1998_vm15 = vweird.f32 %v1992_v18 }
 0x7e4   :  { %v2030_v36 = vadd.f32 0.4994258, %v2029_v57  ;;  %v2019_v4 = vadd.f32 0.18741608, %v2018_v43  ;;  %v2005_v51 = vor.u32 1.1754944e-38, %v2004_v6 }
 0x7e5   :  { %v1961_v5 = vsel %vm1960_vm11, %v4729_v48, %v1957_v31  ;;  %v1981_v48 = vadd.f32 1.1283791, %v1980_v14  ;;  %vm2003_vm1 = vcmp.eq.f32.partialorder %v2002_v23, 8.507059e+37 }
 0x7e6   :  { %v1966_v24 = vsel %vm1963_vm13, %v1965_v32, %v1961_v5  ;;  %v2031_v11 = vmul.f32 %v2030_v36, %v6063_v28  ;;  %v2020_v57 = vmul.f32 %v2019_v4, %v6063_v28  ;;  %v1759_v36 = vmul.f32 0.5, %v6016_v45 }
 0x7e7   :  { %v1967_v27 = vmul.f32 %v1966_v24, %v1942_v26  ;;  %v4731_v33 = vpop.eup %4730  ;;  %v1982_v42 = vmul.f32 %v1981_v48, %v6023_v22 }
 0x7e8   :  { %v1994_v46 = vmul.f32 %v4731_v33, %v1992_v18  ;;  %v2032_v58 = vadd.f32 1.0, %v2031_v11  ;;  %vm1999_vm14 = vweird.f32 %v4731_v33  ;;  %v2021_v24 = vadd.f32 1.1283791, %v2020_v57 }
 0x7e9   :  { %v4442_v52 = vclamps-f32 %v1967_v27, 1.0  ;;  %vm2000_vm0 = vmor %vm1998_vm15, %vm1999_vm14 }
 0x7ea   :  { %v1995_v21 = vsub.f32 1.0, %v1994_v46  ;;  %4732 = vrcp.f32 %v2032_v58  ;;  %v2044_v18 = vand.u32 2147483648, %v2032_v58  ;;  %v2042_v11 = vand.u32 2147483647, %v2032_v58 }
 0x7eb   :  { %v2094_v44 = vadd.f32 1.0, %v4442_v52  ;;  %vm2038_vm5 = vweird.f32 %v2032_v58  ;;  %v2022_v52 = vmul.f32 %v2021_v24, %v6051_v38 }
 0x7ec   :  { %v1996_v9 = vmul.f32 %v4731_v33, %v1995_v21  ;;  %vm2043_vm7 = vcmp.eq.f32.partialorder %v2042_v11, 8.507059e+37 }
 0x7ed   :  { %v2102_v1 = vmul.f32 %v2094_v44, %v1758_v50  ;;  %v1760_v50 = vmul.f32 0.5, %v6038_v62 }
 0x7ee   :  { %v1997_v7 = vadd.f32 %v4731_v33, %v1996_v9 }
 0x7ef   :  { %4450 = vmatmul.msk.f32.gmra.mxu0 %vm2115_vm12, %v2102_v1 }
 0x7f0   :  { %v2001_v59 = vsel %vm2000_vm0, %v4731_v33, %v1997_v7  ;;  %v4733_v20 = vpop.eup %4732  ;;  %v2045_v33 = vor.u32 1.1754944e-38, %v2044_v18 }
 0x7f1   :  { %v2006_v31 = vsel %vm2003_vm1, %v2005_v51, %v2001_v59  ;;  %v2034_v35 = vmul.f32 %v4733_v20, %v2032_v58  ;;  %vm2039_vm3 = vweird.f32 %v4733_v20 }
 0x7f2   :  { %v2007_v32 = vmul.f32 %v2006_v31, %v1982_v42  ;;  %vm2040_vm6 = vmor %vm2038_vm5, %vm2039_vm3 }
 0x7f3   :  { %v2035_v5 = vsub.f32 1.0, %v2034_v35 }
 0x7f4   :  { %v4443_v26 = vclamps-f32 %v2007_v32, 1.0 }
 0x7f5   :  { %v2036_v27 = vmul.f32 %v4733_v20, %v2035_v5 }
 0x7f6   :  { %v2095_v54 = vadd.f32 1.0, %v4443_v26 }
 0x7f7   :  { %v2037_v22 = vadd.f32 %v4733_v20, %v2036_v27 }
 0x7f8   :  { %v2103_v14 = vmul.f32 %v2095_v54, %v1759_v36 }
 0x7f9   :  { %v2041_v28 = vsel %vm2040_vm6, %v4733_v20, %v2037_v22 }
 0x7fa   :  { %4451 = vmatmul.msk.f32.gmra.mxu0 %vm2115_vm12, %v2103_v14  ;;  %v2046_v46 = vsel %vm2043_vm7, %v2045_v33, %v2041_v28 }
 0x7fb   :  { %v2047_v43 = vmul.f32 %v2046_v46, %v2022_v52 }
 0x7fd   :  { %v4444_v45 = vclamps-f32 %v2047_v43, 1.0 }
 0x7ff   :  { %v2096_v44 = vadd.f32 1.0, %v4444_v45 }
 0x801   :  { %v2104_v21 = vmul.f32 %v2096_v44, %v1760_v50  ;;  %v6099_v44 = vld [vmem:[#allocation2 + $0x98] sm:$0xff] }
 0x803   :  { %4452 = vmatmul.msk.f32.gmra.mxu0 %vm2115_vm12, %v2104_v21  ;;  %v2114_v21 = vperm.slane %v6099_v44, 3 }
 0x815   :  { %v1751_v48 = vpop.f32.mrf.mxu3 }
 0x816   :  { %v1752_v58 = vadd.f32 %v5912_v0, %v1751_v48 }
 0x818   :  { %v1769_v6 = vmul.f32 0.70710677, %v1752_v58 }
 0x81a   :  { %v2050_v1 = vmul.f32 %v1769_v6, %v1769_v6 }
 0x81c   :  { %v2051_v9 = vmin.f32 %v2050_v1, 16.0 }
 0x81e   :  { %v2052_v38 = vmul.f32 2.1237322e-06, %v2051_v9  ;;  %v2063_v23 = vmul.f32 3.8918573e-05, %v2051_v9 }
 0x820   :  { %v2053_v4 = vadd.f32 0.00028619796, %v2052_v38  ;;  %v2064_v7 = vadd.f32 0.001143296, %v2063_v23  ;;  %v1761_v23 = vmul.f32 0.5, %v1752_v58 }
 0x822   :  { %v2054_v51 = vmul.f32 %v2053_v4, %v2051_v9  ;;  %v2065_v42 = vmul.f32 %v2064_v7, %v2051_v9 }
 0x824   :  { %v2066_v59 = vadd.f32 0.014752088, %v2065_v42  ;;  %v2055_v20 = vadd.f32 0.0036580483, %v2054_v51 }
 0x826   :  { %v2067_v31 = vmul.f32 %v2066_v59, %v2051_v9  ;;  %v2056_v57 = vmul.f32 %v2055_v20, %v2051_v9 }
 0x828   :  { %v2068_v62 = vadd.f32 0.112945676, %v2067_v31  ;;  %v2057_v26 = vadd.f32 0.05243302, %v2056_v57 }
 0x82a   :  { %v2069_v32 = vmul.f32 %v2068_v62, %v2051_v9  ;;  %v2058_v0 = vmul.f32 %v2057_v26, %v2051_v9 }
 0x82c   :  { %v2070_v35 = vadd.f32 0.4994258, %v2069_v32  ;;  %v2059_v24 = vadd.f32 0.18741608, %v2058_v0 }
 0x82e   :  { %v2071_v5 = vmul.f32 %v2070_v35, %v2051_v9  ;;  %v2060_v54 = vmul.f32 %v2059_v24, %v2051_v9 }
 0x830   :  { %v2072_v36 = vadd.f32 1.0, %v2071_v5  ;;  %v2061_v22 = vadd.f32 1.1283791, %v2060_v54 }
 0x832   :  { %4734 = vrcp.f32 %v2072_v36  ;;  %v2084_v14 = vand.u32 2147483648, %v2072_v36  ;;  %v2082_v52 = vand.u32 2147483647, %v2072_v36  ;;  %vm2078_vm10 = vweird.f32 %v2072_v36 }
 0x833   :  { %v2062_v43 = vmul.f32 %v2061_v22, %v1769_v6 }
 0x834   :  { %v2085_v46 = vor.u32 1.1754944e-38, %v2084_v14  ;;  %vm2083_vm11 = vcmp.eq.f32.partialorder %v2082_v52, 8.507059e+37 }
 0x838   :  { %v4735_v18 = vpop.eup %4734 }
 0x839   :  { %v2074_v27 = vmul.f32 %v4735_v18, %v2072_v36  ;;  %vm2079_vm8 = vweird.f32 %v4735_v18 }
 0x83a   :  { %vm2080_vm2 = vmor %vm2078_vm10, %vm2079_vm8 }
 0x83b   :  { %v2075_v11 = vsub.f32 1.0, %v2074_v27 }
 0x83d   :  { %v2076_v33 = vmul.f32 %v4735_v18, %v2075_v11 }
 0x83f   :  { %v2077_v28 = vadd.f32 %v4735_v18, %v2076_v33 }
 0x841   :  { %v2081_v45 = vsel %vm2080_vm2, %v4735_v18, %v2077_v28 }
 0x842   :  { %v2086_v50 = vsel %vm2083_vm11, %v2085_v46, %v2081_v45 }
 0x843   :  { %v2087_v48 = vmul.f32 %v2086_v50, %v2062_v43 }
 0x845   :  { %v4445_v1 = vclamps-f32 %v2087_v48, 1.0  ;;  %v2157_v9 = vpop.f32.mrf.mxu0 }
 0x846   :  { %v2158_v38 = vadd.f32 %v2157_v9, %v2114_v21 }
 0x847   :  { %v2097_v4 = vadd.f32 1.0, %v4445_v1 }
 0x848   :  { %v2181_v7 = vadd.f32 %v2158_v38, %v5857_v41 }
 0x849   :  { %v2105_v51 = vmul.f32 %v2097_v4, %v1761_v23 }
 0x84a   :  { %v2189_v42 = vsel %vm386_vm4, %v2181_v7, 0.0 }
 0x84b   :  { %2190 = vadd.xlane.f32.xlu1 %v2189_v42  ;;  %4453 = vmatmul.msk.f32.gmra.mxu0 %vm2115_vm12, %v2105_v51 }
 0x84e   :  { %v2160_v6 = vpop.f32.mrf.mxu0 }
 0x84f   :  { %v2161_v59 = vadd.f32 %v2160_v6, %v2114_v21 }
 0x851   :  { %v2182_v20 = vadd.f32 %v2161_v59, %v5865_v25 }
 0x853   :  { %v2192_v31 = vsel %vm386_vm4, %v2182_v20, 0.0 }
 0x854   :  { %2193 = vadd.xlane.f32.xlu2 %v2192_v31 }
 0x857   :  { %v2163_v62 = vpop.f32.mrf.mxu0 }
 0x858   :  { %v2164_v57 = vadd.f32 %v2163_v62, %v2114_v21 }
 0x85a   :  { %v2183_v58 = vadd.f32 %v2164_v57, %v5873_v30 }
 0x85c   :  { %v2195_v32 = vsel %vm386_vm4, %v2183_v58, 0.0 }
 0x85d   :  { %2196 = vadd.xlane.f32.xlu0 %v2195_v32 }
 0x860   :  { %v2166_v41 = vpop.f32.mrf.mxu0 }
 0x861   :  { %v2167_v35 = vadd.f32 %v2166_v41, %v2114_v21 }
 0x863   :  { %v2184_v26 = vadd.f32 %v2167_v35, %v5881_v39 }
 0x865   :  { %v2198_v5 = vsel %vm386_vm4, %v2184_v26, 0.0 }
 0x866   :  { %2199 = vadd.xlane.f32.xlu1 %v2198_v5 }
 0x86c   :  { %v2169_v36 = vpop.f32.mrf.mxu0 }
 0x86d   :  { %v2170_v0 = vadd.f32 %v2169_v36, %v2114_v21 }
 0x86f   :  { %v2185_v25 = vadd.f32 %v2170_v0, %v5888_v8 }
 0x871   :  { %v2201_v24 = vsel %vm386_vm4, %v2185_v25, 0.0 }
 0x872   :  { %2202 = vadd.xlane.f32.xlu2 %v2201_v24 }
 0x877   :  { %v2172_v18 = vpop.f32.mrf.mxu0 }
 0x878   :  { %v2173_v54 = vadd.f32 %v2172_v18, %v2114_v21 }
 0x87a   :  { %v2186_v30 = vadd.f32 %v2173_v54, %v5895_v53 }
 0x87c   :  { %v2204_v27 = vsel %vm386_vm4, %v2186_v30, 0.0 }
 0x87d   :  { %2205 = vadd.xlane.f32.xlu0 %v2204_v27 }
 0x880   :  { %v2175_v11 = vpop.f32.mrf.mxu0 }
 0x881   :  { %v2176_v14 = vadd.f32 %v2175_v11, %v2114_v21 }
 0x883   :  { %v2187_v39 = vadd.f32 %v2176_v14, %v5902_v60  ;;  %v2387_v14 = vld [vmem:[#allocation5 + $0xe0] sm:$0xff] }
 0x884   :  { %2425 = vmatpush.msrb.mxu1 %v2387_v14 }
 0x885   :  { %v2207_v22 = vsel %vm386_vm4, %v2187_v39, 0.0 }
 0x886   :  { %2208 = vadd.xlane.f32.xlu2 %v2207_v22  ;;  %v2457_v22 = vld [vmem:[#allocation5 + $0x100] sm:$0xff] }
 0x887   :  { %2471 = vmatpush.msrb.mxu2 %v2457_v22 }
 0x8be   :  { %v2191_v33 = vpop.xlane.xlu1 %2190 }
 0x8bf   :  { %v2213_v8 = vmul.f32 %v2191_v33, %v5181_v2  ;;  %v2503_v33 = vld [vmem:[#allocation5 + $0x120] sm:$0xff] }
 0x8c0   :  { %2517 = vmatpush.msrb.mxu3 %v2503_v33 }
 0x8c1   :  { %v6118_v52 = vsub.f32 %v2181_v7, %v2213_v8  ;;  %v2549_v8 = vld [vmem:[#allocation5 + $0x140] sm:$0xff] }
 0x8c2   :  { %2563 = vmatpush.msrb.mxu0 %v2549_v8 }
 0x8c3   :  { %v2229_v28 = vmul.f32 %v6118_v52, %v6118_v52 }
 0x8c5   :  { %v2237_v53 = vsel %vm386_vm4, %v2229_v28, 0.0 }
 0x8c6   :  { %2238 = vadd.xlane.f32.xlu1 %v2237_v53  ;;  %v2456_v53 = vld [vmem:[#allocation5 + $0xf8] sm:$0xff] }
 0x8c7   :  { %v2194_v46 = vpop.xlane.xlu2 %2193  ;;  %2472 = vmatpush.msrb.mxu2 %v2456_v53 }
 0x8c8   :  { %v2214_v43 = vmul.f32 %v2194_v46, %v5181_v2  ;;  %v2178_v45 = vpop.f32.mrf.mxu0  ;;  %v2502_v46 = vld [vmem:[#allocation5 + $0x118] sm:$0xff] }
 0x8c9   :  { %v2179_v50 = vadd.f32 %v2178_v45, %v2114_v21  ;;  %2518 = vmatpush.msrb.mxu3 %v2502_v46 }
 0x8ca   :  { %v6124_v60 = vsub.f32 %v2182_v20, %v2214_v43 }
 0x8cb   :  { %v6127_v48 = vadd.f32 %v2179_v50, %v5915_v16  ;;  %v2548_v50 = vld [vmem:[#allocation5 + $0x138] sm:$0xff] }
 0x8cc   :  { %v2230_v1 = vmul.f32 %v6124_v60, %v6124_v60  ;;  %2564 = vmatpush.msrb.mxu0 %v2548_v50 }
 0x8cd   :  { %v2210_v9 = vsel %vm386_vm4, %v6127_v48, 0.0 }
 0x8ce   :  { %2211 = vadd.xlane.f32.xlu1 %v2210_v9  ;;  %v2240_v38 = vsel %vm386_vm4, %v2230_v1, 0.0  ;;  %v2385_v9 = vld [vmem:[#allocation5 + $0xd0] sm:$0xff] }
 0x8cf   :  { %2241 = vadd.xlane.f32.xlu0 %v2240_v38  ;;  %v2455_v38 = vld [vmem:[#allocation5 + $0xf0] sm:$0xff] }
 0x8d0   :  { %v2197_v23 = vpop.xlane.xlu0 %2196  ;;  %2473 = vmatpush.msrb.mxu2 %v2455_v38 }
 0x8d1   :  { %v2215_v4 = vmul.f32 %v2197_v23, %v5181_v2  ;;  %v2501_v23 = vld [vmem:[#allocation5 + $0x110] sm:$0xff] }
 0x8d2   :  { %2519 = vmatpush.msrb.mxu3 %v2501_v23 }
 0x8d3   :  { %v6135_v7 = vsub.f32 %v2183_v58, %v2215_v4 }
 0x8d5   :  { %v2231_v21 = vmul.f32 %v6135_v7, %v6135_v7 }
 0x8d7   :  { %v2243_v16 = vsel %vm386_vm4, %v2231_v21, 0.0 }
 0x8d8   :  { %2244 = vadd.xlane.f32.xlu2 %v2243_v16  ;;  %v2547_v16 = vld [vmem:[#allocation5 + $0x130] sm:$0xff] }
 0x8d9   :  { %v2200_v51 = vpop.xlane.xlu1 %2199  ;;  %2565 = vmatpush.msrb.mxu0 %v2547_v16 }
 0x8da   :  { %v2216_v42 = vmul.f32 %v2200_v51, %v5181_v2 }
 0x8dc   :  { %v6141_v6 = vsub.f32 %v2184_v26, %v2216_v42 }
 0x8de   :  { %v2232_v59 = vmul.f32 %v6141_v6, %v6141_v6 }
 0x8e0   :  { %v2246_v20 = vsel %vm386_vm4, %v2232_v59, 0.0  ;;  %v2384_v59 = vld [vmem:[#allocation5 + $0xc8] sm:$0xff] }
 0x8e1   :  { %2247 = vadd.xlane.f32.xlu0 %v2246_v20  ;;  %v2454_v20 = vld [vmem:[#allocation5 + $0xe8] sm:$0xff] }
 0x8e2   :  { %2474 = vmatpush.msrb.mxu2 %v2454_v20 }
 0x8e5   :  { %v2203_v31 = vpop.xlane.xlu2 %2202 }
 0x8e6   :  { %v2217_v62 = vmul.f32 %v2203_v31, %v5181_v2  ;;  %v2500_v31 = vld [vmem:[#allocation5 + $0x108] sm:$0xff] }
 0x8e7   :  { %2520 = vmatpush.msrb.mxu3 %v2500_v31 }
 0x8e8   :  { %v6147_v57 = vsub.f32 %v2185_v25, %v2217_v62 }
 0x8ea   :  { %v2233_v58 = vmul.f32 %v6147_v57, %v6147_v57 }
 0x8ec   :  { %v2249_v32 = vsel %vm386_vm4, %v2233_v58, 0.0  ;;  %v2546_v58 = vld [vmem:[#allocation5 + $0x128] sm:$0xff] }
 0x8ed   :  { %2250 = vadd.xlane.f32.xlu1 %v2249_v32  ;;  %2566 = vmatpush.msrb.mxu0 %v2546_v58 }
 0x8f0   :  { %v2206_v41 = vpop.xlane.xlu0 %2205 }
 0x8f1   :  { %v2218_v35 = vmul.f32 %v2206_v41, %v5181_v2 }
 0x8f3   :  { %v6153_v26 = vsub.f32 %v2186_v30, %v2218_v35 }
 0x8f5   :  { %v2234_v5 = vmul.f32 %v6153_v26, %v6153_v26 }
 0x8f7   :  { %v2252_v36 = vsel %vm386_vm4, %v2234_v5, 0.0 }
 0x8f8   :  { %2253 = vadd.xlane.f32.xlu2 %v2252_v36 }
 0x8f9   :  { %v2209_v0 = vpop.xlane.xlu2 %2208 }
 0x8fa   :  { %v2219_v25 = vmul.f32 %v2209_v0, %v5181_v2  ;;  %v6174_v0 = vperm.slane %v6099_v44, 4 }
 0x8fc   :  { %v6159_v24 = vsub.f32 %v2187_v39, %v2219_v25  ;;  %v2386_v39 = vld [vmem:[#allocation5 + $0xd8] sm:$0xff] }
 0x8fd   :  { %2426 = vmatpush.msrb.mxu1 %v2386_v39 }
 0x8fe   :  { %v2235_v18 = vmul.f32 %v6159_v24, %v6159_v24 }
 0x8ff   :  { %2427 = vmatpush.msrb.mxu1 %v2385_v9 }
 0x900   :  { %v2255_v54 = vsel %vm386_vm4, %v2235_v18, 0.0 }
 0x901   :  { %2256 = vadd.xlane.f32.xlu0 %v2255_v54  ;;  %2428 = vmatpush.msrb.mxu1 %v2384_v59 }
 0x939   :  { %v2239_v27 = vpop.xlane.xlu1 %2238 }
 0x93a   :  { %v2261_v30 = vmul.f32 %v2239_v27, %v5181_v2 }
 0x93c   :  { %v2269_v11 = vadd.f32 1e-12, %v2261_v30  ;;  %v6178_v30 = vperm.slane %v6099_v44, 5 }
 0x93e   :  { %4736 = vrsqrt.f32 %v2269_v11  ;;  %vm2283_vm14 = vweird.f32 %v2269_v11 }
 0x941   :  { %v2212_v28 = vpop.xlane.xlu1 %2211 }
 0x942   :  { %v2220_v43 = vmul.f32 %v2212_v28, %v5181_v2  ;;  %v2242_v45 = vpop.xlane.xlu0 %2241 }
 0x943   :  { %v2262_v1 = vmul.f32 %v2242_v45, %v5181_v2 }
 0x944   :  { %v4737_v4 = vpop.eup %4736  ;;  %v6168_v21 = vsub.f32 %v6127_v48, %v2220_v43 }
 0x945   :  { %v2278_v51 = vmul.f32 %v4737_v4, %v2269_v11  ;;  %v2270_v42 = vadd.f32 1e-12, %v2262_v1  ;;  %vm2284_vm13 = vweird.f32 %v4737_v4 }
 0x946   :  { %v2236_v62 = vmul.f32 %v6168_v21, %v6168_v21  ;;  %vm2285_vm15 = vmor %vm2283_vm14, %vm2284_vm13 }
 0x947   :  { %v2279_v32 = vmul.f32 %v4737_v4, %v2278_v51  ;;  %4738 = vrsqrt.f32 %v2270_v42  ;;  %vm2293_vm1 = vweird.f32 %v2270_v42 }
 0x948   :  { %v2258_v48 = vsel %vm386_vm4, %v2236_v62, 0.0 }
 0x949   :  { %v2280_v41 = vmul.f32 0.5, %v2279_v32  ;;  %2259 = vadd.xlane.f32.xlu1 %v2258_v48 }
 0x94b   :  { %v2281_v35 = vsub.f32 1.5, %v2280_v41  ;;  %v2245_v18 = vpop.xlane.xlu2 %2244 }
 0x94c   :  { %v2263_v27 = vmul.f32 %v2245_v18, %v5181_v2 }
 0x94d   :  { %v4739_v5 = vpop.eup %4738  ;;  %v2282_v36 = vmul.f32 %v4737_v4, %v2281_v35 }
 0x94e   :  { %v2288_v25 = vmul.f32 %v4739_v5, %v2270_v42  ;;  %v2271_v33 = vadd.f32 1e-12, %v2263_v27  ;;  %vm2294_vm0 = vweird.f32 %v4739_v5 }
 0x94f   :  { %v2286_v54 = vsel %vm2285_vm15, %v4737_v4, %v2282_v36  ;;  %vm2295_vm3 = vmor %vm2293_vm1, %vm2294_vm0 }
 0x950   :  { %v2357_v14 = vmul.f32 %v2286_v54, %v6118_v52  ;;  %v2289_v22 = vmul.f32 %v4739_v5, %v2288_v25  ;;  %4740 = vrsqrt.f32 %v2271_v33  ;;  %vm2303_vm6 = vweird.f32 %v2271_v33 }
 0x952   :  { %v2366_v8 = vmul.f32 %v6174_v0, %v2357_v14  ;;  %v2290_v28 = vmul.f32 0.5, %v2289_v22 }
 0x954   :  { %v6183_v11 = vadd.f32 %v6178_v30, %v2366_v8  ;;  %v2291_v39 = vsub.f32 1.5, %v2290_v28  ;;  %v2248_v52 = vpop.xlane.xlu0 %2247 }
 0x955   :  { %v2264_v45 = vmul.f32 %v2248_v52, %v5181_v2 }
 0x956   :  { %v2292_v53 = vmul.f32 %v4739_v5, %v2291_v39  ;;  %4454 = vmatmul.msk.f32.vlgmr.msrb.gmra.mxu1 %vm386_vm4, %v6183_v11  ;;  %4462 = vmatmul.msk.f32.vlgmr.msrb.gmra.mxu2 %vm386_vm4, %v6183_v11  ;;  %v4741_v46 = vpop.eup %4740 }
 0x957   :  { %4470 = vmatmul.msk.f32.vlgmr.msrb.gmra.mxu3 %vm386_vm4, %v6183_v11  ;;  %4478 = vmatmul.msk.f32.vlgmr.msrb.gmra.mxu0 %vm386_vm4, %v6183_v11  ;;  %v2298_v50 = vmul.f32 %v4741_v46, %v2271_v33  ;;  %v2272_v9 = vadd.f32 1e-12, %v2264_v45  ;;  %vm2304_vm5 = vweird.f32 %v4741_v46 }
 0x958   :  { %v2296_v44 = vsel %vm2295_vm3, %v4739_v5, %v2292_v53  ;;  %vm2305_vm7 = vmor %vm2303_vm6, %vm2304_vm5 }
 0x959   :  { %v2358_v43 = vmul.f32 %v2296_v44, %v6124_v60  ;;  %v2299_v38 = vmul.f32 %v4741_v46, %v2298_v50  ;;  %4742 = vrsqrt.f32 %v2272_v9  ;;  %vm2313_vm10 = vweird.f32 %v2272_v9 }
 0x95b   :  { %v2367_v1 = vmul.f32 %v6174_v0, %v2358_v43  ;;  %v2300_v4 = vmul.f32 0.5, %v2299_v38 }
 0x95d   :  { %v6197_v23 = vadd.f32 %v6178_v30, %v2367_v1  ;;  %v2301_v16 = vsub.f32 1.5, %v2300_v4 }
 0x95f   :  { %4455 = vmatmul.msk.f32.gmra.mxu1 %vm386_vm4, %v6197_v23  ;;  %4463 = vmatmul.msk.f32.gmra.mxu2 %vm386_vm4, %v6197_v23  ;;  %v2302_v60 = vmul.f32 %v4741_v46, %v2301_v16  ;;  %v4743_v51 = vpop.eup %4742 }
 0x960   :  { %4471 = vmatmul.msk.f32.gmra.mxu3 %vm386_vm4, %v6197_v23  ;;  %4479 = vmatmul.msk.f32.gmra.mxu0 %vm386_vm4, %v6197_v23  ;;  %v2308_v59 = vmul.f32 %v4743_v51, %v2272_v9  ;;  %v2251_v20 = vpop.xlane.xlu1 %2250  ;;  %vm2314_vm8 = vweird.f32 %v4743_v51 }
 0x961   :  { %v2306_v42 = vsel %vm2305_vm7, %v4741_v46, %v2302_v60  ;;  %v2265_v62 = vmul.f32 %v2251_v20, %v5181_v2  ;;  %vm2315_vm2 = vmor %vm2313_vm10, %vm2314_vm8 }
 0x962   :  { %v2359_v31 = vmul.f32 %v2306_v42, %v6135_v7  ;;  %v2309_v58 = vmul.f32 %v4743_v51, %v2308_v59 }
 0x963   :  { %v2273_v48 = vadd.f32 1e-12, %v2265_v62 }
 0x964   :  { %v2368_v32 = vmul.f32 %v6174_v0, %v2359_v31  ;;  %v2310_v41 = vmul.f32 0.5, %v2309_v58 }
 0x965   :  { %4744 = vrsqrt.f32 %v2273_v48  ;;  %vm2323_vm13 = vweird.f32 %v2273_v48 }
 0x966   :  { %v6211_v35 = vadd.f32 %v6178_v30, %v2368_v32  ;;  %v2311_v5 = vsub.f32 1.5, %v2310_v41 }
 0x968   :  { %4456 = vmatmul.msk.f32.gmra.mxu1 %vm386_vm4, %v6211_v35  ;;  %4464 = vmatmul.msk.f32.gmra.mxu2 %vm386_vm4, %v6211_v35  ;;  %v2312_v7 = vmul.f32 %v4743_v51, %v2311_v5 }
 0x969   :  { %4472 = vmatmul.msk.f32.gmra.mxu3 %vm386_vm4, %v6211_v35  ;;  %4480 = vmatmul.msk.f32.gmra.mxu0 %vm386_vm4, %v6211_v35 }
 0x96a   :  { %v2316_v36 = vsel %vm2315_vm2, %v4743_v51, %v2312_v7 }
 0x96b   :  { %v4745_v25 = vpop.eup %4744  ;;  %v2360_v18 = vmul.f32 %v2316_v36, %v6141_v6  ;;  %v2254_v27 = vpop.xlane.xlu2 %2253 }
 0x96c   :  { %v2318_v54 = vmul.f32 %v4745_v25, %v2273_v48  ;;  %v2266_v22 = vmul.f32 %v2254_v27, %v5181_v2  ;;  %vm2324_vm11 = vweird.f32 %v4745_v25  ;;  %v2594_v27 = vld [vmem:[#allocation5 + $0x158] sm:$0xff] }
 0x96d   :  { %v2369_v14 = vmul.f32 %v6174_v0, %v2360_v18  ;;  %vm2325_vm14 = vmor %vm2323_vm13, %vm2324_vm11  ;;  %v2641_v18 = vld [vmem:[#allocation5 + $0x180] sm:$0xff] }
 0x96e   :  { %v2319_v33 = vmul.f32 %v4745_v25, %v2318_v54  ;;  %v2274_v28 = vadd.f32 1e-12, %v2266_v22  ;;  %2655 = vmatpush.msra.mxu2 %v2641_v18  ;;  %v2593_v22 = vld [vmem:[#allocation5 + $0x150] sm:$0xff] }
 0x96f   :  { %v6225_v8 = vadd.f32 %v6178_v30, %v2369_v14  ;;  %v2640_v14 = vld [vmem:[#allocation5 + $0x178] sm:$0xff] }
 0x970   :  { %v2320_v39 = vmul.f32 0.5, %v2319_v33  ;;  %4746 = vrsqrt.f32 %v2274_v28  ;;  %vm2333_vm0 = vweird.f32 %v2274_v28  ;;  %2656 = vmatpush.msra.mxu2 %v2640_v14 }
 0x971   :  { %4457 = vmatmul.msk.f32.gmra.mxu1 %vm386_vm4, %v6225_v8  ;;  %4465 = vmatmul.msk.f32.gmra.mxu2 %vm386_vm4, %v6225_v8 }
 0x972   :  { %v2321_v6 = vsub.f32 1.5, %v2320_v39  ;;  %4473 = vmatmul.msk.f32.gmra.mxu3 %vm386_vm4, %v6225_v8  ;;  %4481 = vmatmul.msk.f32.gmra.mxu0 %vm386_vm4, %v6225_v8  ;;  %v2592_v39 = vld [vmem:[#allocation5 + $0x148] sm:$0xff] }
 0x974   :  { %v2322_v53 = vmul.f32 %v4745_v25, %v2321_v6  ;;  %v2257_v52 = vpop.xlane.xlu0 %2256  ;;  %v2638_v6 = vld [vmem:[#allocation5 + $0x168] sm:$0xff] }
 0x975   :  { %v2267_v45 = vmul.f32 %v2257_v52, %v5181_v2 }
 0x976   :  { %v2326_v44 = vsel %vm2325_vm14, %v4745_v25, %v2322_v53  ;;  %v4747_v46 = vpop.eup %4746  ;;  %v2595_v25 = vld [vmem:[#allocation5 + $0x160] sm:$0xff] }
 0x977   :  { %v2361_v43 = vmul.f32 %v2326_v44, %v6147_v57  ;;  %v2328_v50 = vmul.f32 %v4747_v46, %v2274_v28  ;;  %v2275_v9 = vadd.f32 1e-12, %v2267_v45  ;;  %vm2334_vm15 = vweird.f32 %v4747_v46  ;;  %2609 = vmatpush.msra.mxu1 %v2595_v25  ;;  %v2639_v28 = vld [vmem:[#allocation5 + $0x170] sm:$0xff] }
 0x978   :  { %vm2335_vm1 = vmor %vm2333_vm0, %vm2334_vm15  ;;  %2657 = vmatpush.msra.mxu2 %v2639_v28 }
 0x979   :  { %v2370_v1 = vmul.f32 %v6174_v0, %v2361_v43  ;;  %v2329_v38 = vmul.f32 %v4747_v46, %v2328_v50  ;;  %4748 = vrsqrt.f32 %v2275_v9  ;;  %vm2343_vm5 = vweird.f32 %v2275_v9  ;;  %2610 = vmatpush.msra.mxu1 %v2594_v27 }
 0x97a   :  { %2658 = vmatpush.msra.mxu2 %v2638_v6 }
 0x97b   :  { %v6239_v4 = vadd.f32 %v6178_v30, %v2370_v1  ;;  %v2330_v16 = vmul.f32 0.5, %v2329_v38  ;;  %2611 = vmatpush.msra.mxu1 %v2593_v22  ;;  %v6349_v22 = vld [vmem:[#allocation5 + $0x188] sm:$0xff] }
 0x97c   :  { %v2550_v28 = vperm.slane %v6349_v22, 3 }
 0x97d   :  { %4458 = vmatmul.msk.f32.gmra.mxu1 %vm386_vm4, %v6239_v4  ;;  %4466 = vmatmul.msk.f32.gmra.mxu2 %vm386_vm4, %v6239_v4  ;;  %v2331_v60 = vsub.f32 1.5, %v2330_v16 }
 0x97e   :  { %4474 = vmatmul.msk.f32.gmra.mxu3 %vm386_vm4, %v6239_v4  ;;  %4482 = vmatmul.msk.f32.gmra.mxu0 %vm386_vm4, %v6239_v4 }
 0x97f   :  { %v2332_v57 = vmul.f32 %v4747_v46, %v2331_v60  ;;  %v4749_v51 = vpop.eup %4748  ;;  %2612 = vmatpush.msra.mxu1 %v2592_v39 }
 0x980   :  { %v2338_v59 = vmul.f32 %v4749_v51, %v2275_v9  ;;  %vm2344_vm3 = vweird.f32 %v4749_v51 }
 0x981   :  { %v2336_v42 = vsel %vm2335_vm1, %v4747_v46, %v2332_v57  ;;  %vm2345_vm6 = vmor %vm2343_vm5, %vm2344_vm3 }
 0x982   :  { %v2362_v20 = vmul.f32 %v2336_v42, %v6153_v26  ;;  %v2339_v31 = vmul.f32 %v4749_v51, %v2338_v59 }
 0x984   :  { %v2371_v62 = vmul.f32 %v6174_v0, %v2362_v20  ;;  %v2340_v58 = vmul.f32 0.5, %v2339_v31 }
 0x986   :  { %v6252_v32 = vadd.f32 %v6178_v30, %v2371_v62  ;;  %v2341_v48 = vsub.f32 1.5, %v2340_v58 }
 0x988   :  { %4459 = vmatmul.msk.f32.gmra.mxu1 %vm386_vm4, %v6252_v32  ;;  %4467 = vmatmul.msk.f32.gmra.mxu2 %vm386_vm4, %v6252_v32  ;;  %v2342_v41 = vmul.f32 %v4749_v51, %v2341_v48 }
 0x989   :  { %4475 = vmatmul.msk.f32.gmra.mxu3 %vm386_vm4, %v6252_v32  ;;  %4483 = vmatmul.msk.f32.gmra.mxu0 %vm386_vm4, %v6252_v32 }
 0x98a   :  { %v2346_v26 = vsel %vm2345_vm6, %v4749_v51, %v2342_v41 }
 0x98b   :  { %v2363_v5 = vmul.f32 %v2346_v26, %v6159_v24 }
 0x98d   :  { %v2372_v7 = vmul.f32 %v6174_v0, %v2363_v5 }
 0x98f   :  { %v6265_v36 = vadd.f32 %v6178_v30, %v2372_v7 }
 0x991   :  { %7053 = vst [vmem:[#allocation17_spill] sm:$0xff] %v6265_v36  ;;  %4460 = vmatmul.msk.f32.gmra.mxu1 %vm386_vm4, %v6265_v36  ;;  %4468 = vmatmul.msk.f32.gmra.mxu2 %vm386_vm4, %v6265_v36 }
 0x992   :  { %4476 = vmatmul.msk.f32.gmra.mxu3 %vm386_vm4, %v6265_v36  ;;  %4484 = vmatmul.msk.f32.gmra.mxu0 %vm386_vm4, %v6265_v36 }
 0x9bc   :  { %v2260_v24 = vpop.xlane.xlu1 %2259 }
 0x9bd   :  { %v2268_v54 = vmul.f32 %v2260_v24, %v5181_v2  ;;  %v2504_v2 = vperm.slane %v6349_v22, 2 }
 0x9bf   :  { %v2276_v33 = vadd.f32 1e-12, %v2268_v54 }
 0x9c1   :  { %4750 = vrsqrt.f32 %v2276_v33  ;;  %vm2353_vm8 = vweird.f32 %v2276_v33 }
 0x9c7   :  { %v4751_v53 = vpop.eup %4750 }
 0x9c8   :  { %v2348_v44 = vmul.f32 %v4751_v53, %v2276_v33  ;;  %vm2354_vm7 = vweird.f32 %v4751_v53 }
 0x9c9   :  { %vm2355_vm10 = vmor %vm2353_vm8, %vm2354_vm7 }
 0x9ca   :  { %v2349_v52 = vmul.f32 %v4751_v53, %v2348_v44 }
 0x9cc   :  { %v2350_v46 = vmul.f32 0.5, %v2349_v52 }
 0x9ce   :  { %v2351_v43 = vsub.f32 1.5, %v2350_v46 }
 0x9d0   :  { %v2352_v45 = vmul.f32 %v4751_v53, %v2351_v43 }
 0x9d2   :  { %v2356_v50 = vsel %vm2355_vm10, %v4751_v53, %v2352_v45 }
 0x9d3   :  { %v2364_v1 = vmul.f32 %v2356_v50, %v6168_v21 }
 0x9d4   :  { %v2568_v21 = vpop.f32.mrf.mxu0 }
 0x9d5   :  { %v2373_v9 = vmul.f32 %v6174_v0, %v2364_v1  ;;  %v6317_v0 = vpop.f32.mrf.mxu1 }
 0x9d7   :  { %v6279_v38 = vadd.f32 %v6178_v30, %v2373_v9 }
 0x9d9   :  { %7054 = vst [vmem:[#allocation18_spill] sm:$0xff] %v6279_v38  ;;  %4461 = vmatmul.msk.f32.gmra.mxu1 %vm386_vm4, %v6279_v38  ;;  %4469 = vmatmul.msk.f32.gmra.mxu2 %vm386_vm4, %v6279_v38  ;;  %v6319_v30 = vpop.f32.mrf.mxu2 }
 0x9da   :  { %4477 = vmatmul.msk.f32.gmra.mxu3 %vm386_vm4, %v6279_v38  ;;  %4485 = vmatmul.msk.f32.gmra.mxu0 %vm386_vm4, %v6279_v38  ;;  %v6333_v20 = vpop.f32.mrf.mxu3 }
 0x9dd   :  { %v2571_v16 = vpop.f32.mrf.mxu0  ;;  %v6325_v60 = vpop.f32.mrf.mxu1 }
 0x9e1   :  { %4486 = vmatmul.msk.f32.vlgmr.msra.gmra.mxu1 %vm386_vm4, %v6183_v11  ;;  %4494 = vmatmul.msk.f32.vlgmr.msra.gmra.mxu2 %vm386_vm4, %v6183_v11 }
 0x9e2   :  { %v6327_v57 = vpop.f32.mrf.mxu2 }
 0x9e3   :  { %v2525_v48 = vpop.f32.mrf.mxu3 }
 0x9e5   :  { %v6329_v42 = vpop.f32.mrf.mxu1 }
 0x9e6   :  { %v2574_v51 = vpop.f32.mrf.mxu0 }
 0x9e9   :  { %4487 = vmatmul.msk.f32.gmra.mxu1 %vm386_vm4, %v6197_v23  ;;  %4495 = vmatmul.msk.f32.gmra.mxu2 %vm386_vm4, %v6197_v23 }
 0x9eb   :  { %v6331_v59 = vpop.f32.mrf.mxu2 }
 0x9ec   :  { %v2528_v7 = vpop.f32.mrf.mxu3 }
 0x9ee   :  { %v6335_v62 = vpop.f32.mrf.mxu1 }
 0x9ef   :  { %v2577_v31 = vpop.f32.mrf.mxu0 }
 0x9f1   :  { %4488 = vmatmul.msk.f32.gmra.mxu1 %vm386_vm4, %v6211_v35  ;;  %4496 = vmatmul.msk.f32.gmra.mxu2 %vm386_vm4, %v6211_v35 }
 0x9f4   :  { %v6337_v58 = vpop.f32.mrf.mxu2 }
 0x9f5   :  { %v2531_v54 = vpop.f32.mrf.mxu3 }
 0x9f9   :  { %4489 = vmatmul.msk.f32.gmra.mxu1 %vm386_vm4, %v6225_v8  ;;  %4497 = vmatmul.msk.f32.gmra.mxu2 %vm386_vm4, %v6225_v8 }
 0x9fa   :  { %v6339_v26 = vpop.f32.mrf.mxu1 }
 0x9fb   :  { %v2580_v41 = vpop.f32.mrf.mxu0 }
 0x9fc   :  { %v2581_v50 = vadd.f32 %v2580_v41, %v2550_v28  ;;  %v2569_v41 = vadd.f32 %v2568_v21, %v2550_v28 }
 0xa00   :  { %v6341_v5 = vpop.f32.mrf.mxu2 }
 0xa01   :  { %4490 = vmatmul.msk.f32.gmra.mxu1 %vm386_vm4, %v6239_v4  ;;  %4498 = vmatmul.msk.f32.gmra.mxu2 %vm386_vm4, %v6239_v4  ;;  %v2534_v53 = vpop.f32.mrf.mxu3 }
 0xa02   :  { %v2535_v21 = vadd.f32 %v2534_v53, %v2504_v2 }
 0xa05   :  { %v6343_v18 = vpop.f32.mrf.mxu1 }
 0xa06   :  { %v2583_v25 = vpop.f32.mrf.mxu0 }
 0xa07   :  { %v2584_v43 = vadd.f32 %v2583_v25, %v2550_v28  ;;  %v2572_v25 = vadd.f32 %v2571_v16, %v2550_v28 }
 0xa09   :  { %4491 = vmatmul.msk.f32.gmra.mxu1 %vm386_vm4, %v6252_v32  ;;  %4499 = vmatmul.msk.f32.gmra.mxu2 %vm386_vm4, %v6252_v32 }
 0xa0b   :  { %v6345_v24 = vpop.f32.mrf.mxu2 }
 0xa0c   :  { %v2537_v45 = vpop.f32.mrf.mxu3 }
 0xa0e   :  { %v6347_v14 = vpop.f32.mrf.mxu1 }
 0xa0f   :  { %v2586_v27 = vpop.f32.mrf.mxu0 }
 0xa10   :  { %v2587_v52 = vadd.f32 %v2586_v27, %v2550_v28 }
 0xa11   :  { %4492 = vmatmul.msk.f32.gmra.mxu1 %vm386_vm4, %v6265_v36  ;;  %4500 = vmatmul.msk.f32.gmra.mxu2 %vm386_vm4, %v6265_v36 }
 0xa14   :  { %v6351_v33 = vpop.f32.mrf.mxu2 }
 0xa15   :  { %v2540_v37 = vpop.f32.mrf.mxu3 }
 0xa19   :  { %4493 = vmatmul.msk.f32.gmra.mxu1 %vm386_vm4, %v6279_v38  ;;  %4501 = vmatmul.msk.f32.gmra.mxu2 %vm386_vm4, %v6279_v38 }
 0xa56   :  { %v6354_v44 = vpop.f32.mrf.mxu1 }
 0xa57   :  { %v2589_v39 = vpop.f32.mrf.mxu0 }
 0xa58   :  { %v2590_v6 = vadd.f32 %v2589_v39, %v2550_v28  ;;  %v2578_v39 = vadd.f32 %v2577_v31, %v2550_v28 }
 0xa5a   :  { %4502 = vmatpush.xpose.msk.msra.mxu3 %vm278_vm9, %v2590_v6  ;;  %v2575_v6 = vadd.f32 %v2574_v51, %v2550_v28  ;;  %v2541_v51 = vadd.f32 %v2540_v37, %v2504_v2  ;;  %v2526_v37 = vadd.f32 %v2525_v48, %v2504_v2 }
 0xa5c   :  { %v6357_v46 = vpop.f32.mrf.mxu2 }
 0xa5e   :  { %4503 = vmatpush.xpose.msk.msra.mxu3 %vm278_vm9, %v2587_v52  ;;  %v6361_v1 = vpop.f32.mrf.mxu1 }
 0xa62   :  { %4504 = vmatpush.xpose.msk.msra.mxu3 %vm278_vm9, %v2584_v43  ;;  %v2543_v43 = vpop.f32.mrf.mxu3 }
 0xa63   :  { %v2544_v31 = vadd.f32 %v2543_v43, %v2504_v2 }
 0xa64   :  { %v6363_v9 = vpop.f32.mrf.mxu2 }
 0xa66   :  { %4505 = vmatpush.xpose.msk.msra.mxu3 %vm278_vm9, %v2581_v50  ;;  %v6367_v38 = vpop.f32.mrf.mxu1 }
 0xa6a   :  { %4506 = vmatpush.xpose.msk.msra.mxu3 %vm278_vm9, %v2578_v39 }
 0xa6c   :  { %v2663_v27 = vpop.f32.mrf.mxu2 }
 0xa6e   :  { %4507 = vmatpush.xpose.msk.msra.mxu3 %vm278_vm9, %v2575_v6  ;;  %v6373_v50 = vpop.f32.mrf.mxu1  ;;  %v2538_v6 = vadd.f32 %v2537_v45, %v2504_v2  ;;  %v2388_v45 = vperm.slane %v6349_v22, 0 }
 0xa70   :  { %v2434_v48 = vadd.f32 %v6325_v60, %v2388_v45 }
 0xa72   :  { %4508 = vmatpush.xpose.msk.msra.mxu3 %vm278_vm9, %v2572_v25  ;;  %v2532_v25 = vadd.f32 %v2531_v54, %v2504_v2  ;;  %v2431_v54 = vadd.f32 %v6317_v0, %v2388_v45  ;;  %v2437_v0 = vadd.f32 %v6329_v42, %v2388_v45 }
 0xa74   :  { %v2666_v52 = vpop.f32.mrf.mxu2 }
 0xa76   :  { %4509 = vmatpush.xpose.msk.msra.mxu3 %vm278_vm9, %v2569_v41  ;;  %v2623_v16 = vpop.f32.mrf.mxu1  ;;  %v2529_v41 = vadd.f32 %v2528_v7, %v2504_v2  ;;  %v2642_v7 = vperm.slane %v6349_v22, 5 }
 0xa7a   :  { %4510 = vmatpush.xpose.msk.msra.mxu3 %vm278_vm9, %v2544_v31  ;;  %v2523_v31 = vadd.f32 %v6333_v20, %v2504_v2 }
 0xa7c   :  { %v2669_v39 = vpop.f32.mrf.mxu2 }
 0xa7d   :  { %v2670_v20 = vadd.f32 %v2669_v39, %v2642_v7 }
 0xa7e   :  { %4511 = vmatpush.xpose.msk.msra.mxu3 %vm278_vm9, %v2541_v51  ;;  %v2626_v43 = vpop.f32.mrf.mxu1 }
 0xa82   :  { %4512 = vmatpush.xpose.msk.msra.mxu3 %vm278_vm9, %v2538_v6 }
 0xa84   :  { %v2672_v28 = vpop.f32.mrf.mxu2 }
 0xa85   :  { %v2673_v2 = vadd.f32 %v2672_v28, %v2642_v7  ;;  %v2440_v28 = vadd.f32 %v6335_v62, %v2388_v45 }
 0xa86   :  { %4513 = vmatpush.xpose.msk.msra.mxu3 %vm278_vm9, %v2535_v21  ;;  %v2629_v53 = vpop.f32.mrf.mxu1 }
 0xa8a   :  { %4514 = vmatpush.xpose.msk.msra.mxu3 %vm278_vm9, %v2532_v25 }
 0xa8c   :  { %v2675_v36 = vpop.f32.mrf.mxu2 }
 0xa8e   :  { %4515 = vmatpush.xpose.msk.msra.mxu3 %vm278_vm9, %v2529_v41  ;;  %v2632_v41 = vpop.f32.mrf.mxu1 }
 0xa92   :  { %4516 = vmatpush.xpose.msk.msra.mxu3 %vm278_vm9, %v2526_v37  ;;  %v2676_v37 = vadd.f32 %v2675_v36, %v2642_v7  ;;  %v2661_v36 = vadd.f32 %v6363_v9, %v2642_v7 }
 0xa94   :  { %v2678_v51 = vpop.f32.mrf.mxu2 }
 0xa95   :  { %v2679_v25 = vadd.f32 %v2678_v51, %v2642_v7  ;;  %v2596_v51 = vperm.slane %v6349_v22, 4 }
 0xa96   :  { %4517 = vmatpush.xpose.msk.msra.mxu3 %vm278_vm9, %v2523_v31  ;;  %v2667_v31 = vadd.f32 %v2666_v52, %v2642_v7  ;;  %v2635_v60 = vpop.f32.mrf.mxu1  ;;  %v2443_v52 = vadd.f32 %v6339_v26, %v2388_v45  ;;  %v2452_v26 = vadd.f32 %v6354_v44, %v2388_v45 }
 0xa97   :  { %v2633_v39 = vadd.f32 %v2632_v41, %v2596_v51  ;;  %v2627_v42 = vadd.f32 %v2626_v43, %v2596_v51  ;;  %v2618_v9 = vadd.f32 %v6367_v38, %v2596_v51  ;;  %v2615_v62 = vadd.f32 %v6361_v1, %v2596_v51 }
 0xa98   :  { %v2458_v38 = vperm.slane %v6349_v22, 1 }
 0xa99   :  { %4518 = vmatmul.msk.f32.vlgmr.msra.gmra.mxu3 %vm278_vm9, %v2431_v54  ;;  %v2664_v54 = vadd.f32 %v2663_v27, %v2642_v7  ;;  %v2624_v27 = vadd.f32 %v2623_v16, %v2596_v51  ;;  %v2449_v16 = vadd.f32 %v6347_v14, %v2388_v45 }
 0xa9a   :  { %v2480_v1 = vadd.f32 %v6327_v57, %v2458_v38  ;;  %v2486_v14 = vadd.f32 %v6337_v58, %v2458_v38  ;;  %v2489_v44 = vadd.f32 %v6341_v5, %v2458_v38  ;;  %v2495_v57 = vadd.f32 %v6351_v33, %v2458_v38 }
 0xa9c   :  { %v2681_v6 = vpop.f32.mrf.mxu2 }
 0xa9d   :  { %v2682_v21 = vadd.f32 %v2681_v6, %v2642_v7  ;;  %v2636_v6 = vadd.f32 %v2635_v60, %v2596_v51 }
 0xa9f   :  { %2973 = vmatpush.msra.mxu0 %v2682_v21  ;;  %v2630_v21 = vadd.f32 %v2629_v53, %v2596_v51  ;;  %v2446_v53 = vadd.f32 %v6343_v18, %v2388_v45  ;;  %v2483_v18 = vadd.f32 %v6331_v59, %v2458_v38  ;;  %v2498_v59 = vadd.f32 %v6357_v46, %v2458_v38 }
 0xaa1   :  { %4519 = vmatmul.msk.f32.gmra.mxu3 %vm278_vm9, %v2434_v48  ;;  %2974 = vmatpush.msra.mxu0 %v2679_v25  ;;  %v2621_v48 = vadd.f32 %v6373_v50, %v2596_v51  ;;  %v2477_v50 = vadd.f32 %v6319_v30, %v2458_v38  ;;  %v2492_v30 = vadd.f32 %v6345_v24, %v2458_v38 }
 0xaa3   :  { %2975 = vmatpush.msra.mxu0 %v2676_v37 }
 0xaa5   :  { %2976 = vmatpush.msra.mxu0 %v2673_v2 }
 0xaa7   :  { %2977 = vmatpush.msra.mxu0 %v2670_v20 }
 0xaa9   :  { %4520 = vmatmul.msk.f32.gmra.mxu3 %vm278_vm9, %v2437_v0  ;;  %2978 = vmatpush.msra.mxu0 %v2667_v31 }
 0xaab   :  { %2979 = vmatpush.msra.mxu0 %v2664_v54 }
 0xaad   :  { %2980 = vmatpush.msra.mxu0 %v2661_v36 }
 0xaaf   :  { %2981 = vmatpush.msra.mxu0 %v2636_v6 }
 0xab1   :  { %4521 = vmatmul.msk.f32.gmra.mxu3 %vm278_vm9, %v2440_v28  ;;  %2982 = vmatpush.msra.mxu0 %v2633_v39 }
 0xab3   :  { %2983 = vmatpush.msra.mxu0 %v2630_v21 }
 0xab5   :  { %2984 = vmatpush.msra.mxu0 %v2627_v42 }
 0xab7   :  { %2985 = vmatpush.msra.mxu0 %v2624_v27 }
 0xab9   :  { %4522 = vmatmul.msk.f32.gmra.mxu3 %vm278_vm9, %v2443_v52  ;;  %2986 = vmatpush.msra.mxu0 %v2621_v48 }
 0xabb   :  { %2987 = vmatpush.msra.mxu0 %v2618_v9 }
 0xabd   :  { %2988 = vmatpush.msra.mxu0 %v2615_v62 }
 0xac1   :  { %4523 = vmatmul.msk.f32.gmra.mxu3 %vm278_vm9, %v2446_v53 }
 0xac9   :  { %4524 = vmatmul.msk.f32.gmra.mxu3 %vm278_vm9, %v2449_v16 }
 0xad1   :  { %4525 = vmatmul.msk.f32.gmra.mxu3 %vm278_vm9, %v2452_v26 }
 0xad9   :  { %4526 = vmatmul.msk.f32.gmra.mxu3 %vm278_vm9, %v2477_v50 }
 0xae1   :  { %4527 = vmatmul.msk.f32.gmra.mxu3 %vm278_vm9, %v2480_v1 }
 0xae9   :  { %4528 = vmatmul.msk.f32.gmra.mxu3 %vm278_vm9, %v2483_v18 }
 0xaf1   :  { %4529 = vmatmul.msk.f32.gmra.mxu3 %vm278_vm9, %v2486_v14 }
 0xaf9   :  { %4530 = vmatmul.msk.f32.gmra.mxu3 %vm278_vm9, %v2489_v44 }
 0xb01   :  { %4531 = vmatmul.msk.f32.gmra.mxu3 %vm278_vm9, %v2492_v30 }
 0xb09   :  { %4532 = vmatmul.msk.f32.gmra.mxu3 %vm278_vm9, %v2495_v57 }
 0xb11   :  { %4533 = vmatmul.msk.f32.gmra.mxu3 %vm278_vm9, %v2498_v59 }
 0xb1c   :  { %v2797_v22 = vpop.f32.mrf.mxu3 }
 0xb1d   :  { %v2798_v58 = vadd.f32 %v2797_v22, %v5549_v12 }
 0xb1f   :  { %2845 = vmax.xlane.f32.xlu2 %v2798_v58 }
 0xb24   :  { %v2800_v43 = vpop.f32.mrf.mxu3 }
 0xb25   :  { %v2801_v5 = vadd.f32 %v2800_v43, %v5560_v13 }
 0xb27   :  { %2847 = vmax.xlane.f32.xlu0 %v2801_v5 }
 0xb2c   :  { %v2803_v45 = vpop.f32.mrf.mxu3 }
 0xb2d   :  { %v2804_v24 = vadd.f32 %v2803_v45, %v5571_v55 }
 0xb2f   :  { %2849 = vmax.xlane.f32.xlu1 %v2804_v24 }
 0xb34   :  { %v2806_v7 = vpop.f32.mrf.mxu3 }
 0xb35   :  { %v2807_v33 = vadd.f32 %v2806_v7, %v5582_v47 }
 0xb37   :  { %2851 = vmax.xlane.f32.xlu2 %v2807_v33 }
 0xb3c   :  { %v2809_v25 = vpop.f32.mrf.mxu3 }
 0xb3d   :  { %v2810_v46 = vadd.f32 %v2809_v25, %v5593_v61 }
 0xb3f   :  { %2853 = vmax.xlane.f32.xlu0 %v2810_v46 }
 0xb44   :  { %v2812_v41 = vpop.f32.mrf.mxu3 }
 0xb45   :  { %v6430_v12 = vadd.f32 %v2812_v41, %v5604_v19 }
 0xb47   :  { %2855 = vmax.xlane.f32.xlu1 %v6430_v12 }
 0xb4c   :  { %v2815_v13 = vpop.f32.mrf.mxu3 }
 0xb4d   :  { %v6434_v37 = vadd.f32 %v2815_v13, %v5615_v49 }
 0xb4f   :  { %2857 = vmax.xlane.f32.xlu2 %v6434_v37 }
 0xb54   :  { %v2818_v55 = vpop.f32.mrf.mxu3 }
 0xb55   :  { %v6438_v47 = vadd.f32 %v2818_v55, %v5626_v56 }
 0xb57   :  { %2859 = vmax.xlane.f32.xlu0 %v6438_v47 }
 0xb5c   :  { %v2821_v61 = vpop.f32.mrf.mxu3 }
 0xb5d   :  { %v6442_v2 = vadd.f32 %v2821_v61, %v5637_v10 }
 0xb5f   :  { %2861 = vmax.xlane.f32.xlu1 %v6442_v2 }
 0xb64   :  { %v2824_v19 = vpop.f32.mrf.mxu3 }
 0xb65   :  { %v6446_v20 = vadd.f32 %v2824_v19, %v5648_v40 }
 0xb67   :  { %2863 = vmax.xlane.f32.xlu2 %v6446_v20 }
 0xb6c   :  { %v2827_v49 = vpop.f32.mrf.mxu3 }
 0xb6d   :  { %v6450_v0 = vadd.f32 %v2827_v49, %v5659_v29 }
 0xb6f   :  { %2865 = vmax.xlane.f32.xlu0 %v6450_v0 }
 0xb74   :  { %v2830_v56 = vpop.f32.mrf.mxu3 }
 0xb75   :  { %v6454_v31 = vadd.f32 %v2830_v56, %v5670_v34 }
 0xb77   :  { %2867 = vmax.xlane.f32.xlu1 %v6454_v31 }
 0xb7c   :  { %v2833_v10 = vpop.f32.mrf.mxu3 }
 0xb7d   :  { %v6458_v54 = vadd.f32 %v2833_v10, %v5681_v63 }
 0xb7f   :  { %2869 = vmax.xlane.f32.xlu2 %v6458_v54 }
 0xb84   :  { %v2836_v40 = vpop.f32.mrf.mxu3 }
 0xb85   :  { %v6462_v60 = vadd.f32 %v2836_v40, %v5692_v3 }
 0xb87   :  { %2871 = vmax.xlane.f32.xlu0 %v6462_v60 }
 0xb8c   :  { %v2839_v29 = vpop.f32.mrf.mxu3 }
 0xb8d   :  { %v6466_v51 = vadd.f32 %v2839_v29, %v5703_v15 }
 0xb8f   :  { %2873 = vmax.xlane.f32.xlu1 %v6466_v51 }
 0xb92   :  { %v2846_v34 = vpop.xlane.xlu2 %2845 }
 0xb93   :  { %v2877_v36 = vsub.f32 %v2798_v58, %v2846_v34 }
 0xb94   :  { %v2842_v6 = vpop.f32.mrf.mxu3 }
 0xb95   :  { %v2893_v28 = vmul.f32 1.442695, %v2877_v36  ;;  %v6470_v63 = vadd.f32 %v2842_v6, %v5713_v17  ;;  %v3056_v36 = vld [vmem:[#allocation2 + $0xd0] sm:$0xff] }
 0xb96   :  { %3162 = vmatpush.msrb.mxu2 %v3056_v36 }
 0xb97   :  { %4752 = vpow2.f32 %v2893_v28  ;;  %2875 = vmax.xlane.f32.xlu2 %v6470_v63 }
 0xb9a   :  { %v2848_v3 = vpop.xlane.xlu0 %2847 }
 0xb9b   :  { %v2878_v39 = vsub.f32 %v2801_v5, %v2848_v3 }
 0xb9d   :  { %v4753_v21 = vpop.eup %4752  ;;  %v2895_v42 = vmul.f32 1.442695, %v2878_v39 }
 0xb9e   :  { %2989 = vmatmul.f32.vlgmr.msra.gmra.mxu0 %v4753_v21  ;;  %2925 = vadd.xlane.f32.xlu0 %v4753_v21 }
 0xb9f   :  { %4754 = vpow2.f32 %v2895_v42 }
 0xba2   :  { %v2850_v15 = vpop.xlane.xlu1 %2849 }
 0xba3   :  { %v2879_v27 = vsub.f32 %v2804_v24, %v2850_v15 }
 0xba5   :  { %v4755_v52 = vpop.eup %4754  ;;  %v2897_v48 = vmul.f32 1.442695, %v2879_v27 }
 0xba6   :  { %2992 = vmatmul.f32.gmra.mxu0 %v4755_v52  ;;  %2927 = vadd.xlane.f32.xlu2 %v4755_v52 }
 0xba7   :  { %4756 = vpow2.f32 %v2897_v48 }
 0xbaa   :  { %v2852_v9 = vpop.xlane.xlu2 %2851 }
 0xbab   :  { %v2880_v17 = vsub.f32 %v2807_v33, %v2852_v9 }
 0xbad   :  { %v4757_v62 = vpop.eup %4756  ;;  %v2899_v53 = vmul.f32 1.442695, %v2880_v17 }
 0xbae   :  { %2995 = vmatmul.f32.gmra.mxu0 %v4757_v62 }
 0xbaf   :  { %4758 = vpow2.f32 %v2899_v53 }
 0xbb2   :  { %v2854_v16 = vpop.xlane.xlu0 %2853 }
 0xbb3   :  { %v2881_v26 = vsub.f32 %v2810_v46, %v2854_v16 }
 0xbb5   :  { %v4759_v38 = vpop.eup %4758  ;;  %v2901_v50 = vmul.f32 1.442695, %v2881_v26 }
 0xbb6   :  { %2998 = vmatmul.f32.gmra.mxu0 %v4759_v38 }
 0xbb7   :  { %4760 = vpow2.f32 %v2901_v50 }
 0xbba   :  { %v2856_v1 = vpop.xlane.xlu1 %2855 }
 0xbbb   :  { %v2882_v18 = vsub.f32 %v6430_v12, %v2856_v1  ;;  %v3058_v1 = vld [vmem:[#allocation2 + $0xe0] sm:$0xff] }
 0xbbc   :  { %3097 = vmatpush.msrb.mxu1 %v3058_v1 }
 0xbbd   :  { %v4761_v14 = vpop.eup %4760  ;;  %v2903_v44 = vmul.f32 1.442695, %v2882_v18  ;;  %v3057_v18 = vld [vmem:[#allocation2 + $0xd8] sm:$0xff] }
 0xbbe   :  { %3001 = vmatmul.f32.gmra.mxu0 %v4761_v14  ;;  %3098 = vmatpush.msrb.mxu1 %v3057_v18 }
 0xbbf   :  { %4762 = vpow2.f32 %v2903_v44 }
 0xbc2   :  { %v2858_v30 = vpop.xlane.xlu2 %2857 }
 0xbc3   :  { %v2883_v57 = vsub.f32 %v6434_v37, %v2858_v30 }
 0xbc5   :  { %v4763_v59 = vpop.eup %4762  ;;  %v2905_v22 = vmul.f32 1.442695, %v2883_v57 }
 0xbc6   :  { %3004 = vmatmul.f32.gmra.mxu0 %v4763_v59 }
 0xbc7   :  { %4764 = vpow2.f32 %v2905_v22 }
 0xbca   :  { %v2860_v58 = vpop.xlane.xlu0 %2859 }
 0xbcb   :  { %v2884_v43 = vsub.f32 %v6438_v47, %v2860_v58 }
 0xbcd   :  { %v4765_v5 = vpop.eup %4764  ;;  %v2907_v45 = vmul.f32 1.442695, %v2884_v43 }
 0xbce   :  { %3007 = vmatmul.f32.gmra.mxu0 %v4765_v5 }
 0xbcf   :  { %4766 = vpow2.f32 %v2907_v45 }
 0xbd2   :  { %v2862_v24 = vpop.xlane.xlu1 %2861 }
 0xbd3   :  { %v2885_v7 = vsub.f32 %v6442_v2, %v2862_v24 }
 0xbd5   :  { %v4767_v33 = vpop.eup %4766  ;;  %v2909_v25 = vmul.f32 1.442695, %v2885_v7 }
 0xbd6   :  { %3010 = vmatmul.f32.gmra.mxu0 %v4767_v33 }
 0xbd7   :  { %4768 = vpow2.f32 %v2909_v25 }
 0xbda   :  { %v2864_v46 = vpop.xlane.xlu2 %2863 }
 0xbdb   :  { %v2886_v41 = vsub.f32 %v6446_v20, %v2864_v46 }
 0xbdd   :  { %v4769_v12 = vpop.eup %4768  ;;  %v2911_v13 = vmul.f32 1.442695, %v2886_v41 }
 0xbde   :  { %2941 = vadd.xlane.f32.xlu1 %v4769_v12  ;;  %3013 = vmatmul.f32.gmra.mxu0 %v4769_v12 }
 0xbdf   :  { %4770 = vpow2.f32 %v2911_v13 }
 0xbe2   :  { %v2866_v37 = vpop.xlane.xlu0 %2865 }
 0xbe3   :  { %v2887_v55 = vsub.f32 %v6450_v0, %v2866_v37 }
 0xbe5   :  { %v4771_v47 = vpop.eup %4770  ;;  %v2913_v61 = vmul.f32 1.442695, %v2887_v55 }
 0xbe6   :  { %2943 = vadd.xlane.f32.xlu0 %v4771_v47  ;;  %2929 = vadd.xlane.f32.xlu1 %v4757_v62 }
 0xbe7   :  { %4772 = vpow2.f32 %v2913_v61  ;;  %3016 = vmatmul.f32.gmra.mxu0 %v4771_v47 }
 0xbea   :  { %v2868_v2 = vpop.xlane.xlu1 %2867 }
 0xbeb   :  { %v2888_v19 = vsub.f32 %v6454_v31, %v2868_v2  ;;  %v3055_v31 = vld [vmem:[#allocation2 + $0xc8] sm:$0xff] }
 0xbec   :  { %3163 = vmatpush.msrb.mxu2 %v3055_v31 }
 0xbed   :  { %v4773_v49 = vpop.eup %4772  ;;  %v2915_v56 = vmul.f32 1.442695, %v2888_v19 }
 0xbee   :  { %2945 = vadd.xlane.f32.xlu2 %v4773_v49  ;;  %2931 = vadd.xlane.f32.xlu0 %v4759_v38 }
 0xbef   :  { %4774 = vpow2.f32 %v2915_v56  ;;  %3019 = vmatmul.f32.gmra.mxu0 %v4773_v49 }
 0xbf2   :  { %v2870_v20 = vpop.xlane.xlu2 %2869 }
 0xbf3   :  { %v2889_v10 = vsub.f32 %v6458_v54, %v2870_v20 }
 0xbf5   :  { %v4775_v40 = vpop.eup %4774  ;;  %v2917_v0 = vmul.f32 1.442695, %v2889_v10 }
 0xbf6   :  { %2933 = vadd.xlane.f32.xlu2 %v4761_v14  ;;  %2947 = vadd.xlane.f32.xlu1 %v4775_v40 }
 0xbf7   :  { %4776 = vpow2.f32 %v2917_v0  ;;  %3022 = vmatmul.f32.gmra.mxu0 %v4775_v40 }
 0xbfa   :  { %v2872_v29 = vpop.xlane.xlu0 %2871 }
 0xbfb   :  { %v2890_v34 = vsub.f32 %v6462_v60, %v2872_v29 }
 0xbfd   :  { %v4777_v6 = vpop.eup %4776  ;;  %v2919_v28 = vmul.f32 1.442695, %v2890_v34 }
 0xbfe   :  { %2949 = vadd.xlane.f32.xlu0 %v4777_v6  ;;  %2935 = vadd.xlane.f32.xlu1 %v4763_v59 }
 0xbff   :  { %4778 = vpow2.f32 %v2919_v28  ;;  %3025 = vmatmul.f32.gmra.mxu0 %v4777_v6 }
 0xc02   :  { %v2874_v54 = vpop.xlane.xlu1 %2873 }
 0xc03   :  { %v2891_v3 = vsub.f32 %v6466_v51, %v2874_v54 }
 0xc05   :  { %v4779_v39 = vpop.eup %4778  ;;  %v2921_v21 = vmul.f32 1.442695, %v2891_v3 }
 0xc06   :  { %2951 = vadd.xlane.f32.xlu2 %v4779_v39  ;;  %2937 = vadd.xlane.f32.xlu0 %v4765_v5 }
 0xc07   :  { %4780 = vpow2.f32 %v2921_v21  ;;  %3028 = vmatmul.f32.gmra.mxu0 %v4779_v39 }
 0xc0a   :  { %v2876_v60 = vpop.xlane.xlu2 %2875 }
 0xc0b   :  { %v2892_v42 = vsub.f32 %v6470_v63, %v2876_v60 }
 0xc0d   :  { %v4781_v15 = vpop.eup %4780  ;;  %v2923_v27 = vmul.f32 1.442695, %v2892_v42 }
 0xc0e   :  { %2939 = vadd.xlane.f32.xlu2 %v4767_v33  ;;  %2953 = vadd.xlane.f32.xlu1 %v4781_v15 }
 0xc0f   :  { %4782 = vpow2.f32 %v2923_v27  ;;  %3031 = vmatmul.f32.gmra.mxu0 %v4781_v15 }
 0xc11   :  { %v2926_v52 = vpop.xlane.xlu0 %2925 }
 0xc12   :  { %4784 = vrcp.f32 %v2926_v52 }
 0xc15   :  { %v4783_v48 = vpop.eup %4782 }
 0xc16   :  { %2955 = vadd.xlane.f32.xlu0 %v4783_v48 }
 0xc17   :  { %3034 = vmatmul.f32.gmra.mxu0 %v4783_v48 }
 0xc18   :  { %v4785_v9 = vpop.eup %4784 }
 0xc19   :  { %v2928_v51 = vpop.xlane.xlu2 %2927 }
 0xc1a   :  { %4786 = vrcp.f32 %v2928_v51 }
 0xc1b   :  { %v2990_v17 = vpop.f32.mrf.mxu0 }
 0xc1c   :  { %v3038_v62 = vmul.f32 %v4785_v9, %v2990_v17 }
 0xc1e   :  { %4542 = vmatmul.msk.f32.vlgmr.msrb.gmra.mxu2 %vm278_vm9, %v3038_v62 }
 0xc20   :  { %v4787_v53 = vpop.eup %4786 }
 0xc23   :  { %v2993_v63 = vpop.f32.mrf.mxu0 }
 0xc24   :  { %v3039_v16 = vmul.f32 %v4787_v53, %v2993_v63 }
 0xc26   :  { %4543 = vmatmul.msk.f32.gmra.mxu2 %vm278_vm9, %v3039_v16 }
 0xc2b   :  { %v2996_v26 = vpop.f32.mrf.mxu0 }
 0xc33   :  { %v2999_v38 = vpop.f32.mrf.mxu0 }
 0xc3b   :  { %v3002_v50 = vpop.f32.mrf.mxu0 }
 0xc43   :  { %v3005_v14 = vpop.f32.mrf.mxu0 }
 0xc4b   :  { %v3008_v44 = vpop.f32.mrf.mxu0 }
 0xc51   :  { %v2942_v30 = vpop.xlane.xlu1 %2941 }
 0xc52   :  { %4788 = vrcp.f32 %v2942_v30 }
 0xc53   :  { %v6486_v57 = vpop.f32.mrf.mxu0 }
 0xc58   :  { %v4789_v58 = vpop.eup %4788 }
 0xc59   :  { %v2944_v59 = vpop.xlane.xlu0 %2943  ;;  %v2930_v22 = vpop.xlane.xlu1 %2929 }
 0xc5a   :  { %4790 = vrcp.f32 %v2930_v22 }
 0xc5b   :  { %v3014_v43 = vpop.f32.mrf.mxu0  ;;  %4792 = vrcp.f32 %v2944_v59 }
 0xc5c   :  { %v3046_v5 = vmul.f32 %v4789_v58, %v3014_v43 }
 0xc5e   :  { %4534 = vmatmul.msk.f32.vlgmr.msrb.gmra.mxu1 %vm278_vm9, %v3046_v5 }
 0xc60   :  { %v4791_v45 = vpop.eup %4790 }
 0xc61   :  { %v2932_v24 = vpop.xlane.xlu0 %2931  ;;  %v2946_v7 = vpop.xlane.xlu2 %2945  ;;  %v3040_v33 = vmul.f32 %v4791_v45, %v2996_v26 }
 0xc62   :  { %4794 = vrcp.f32 %v2932_v24  ;;  %v4793_v25 = vpop.eup %4792 }
 0xc63   :  { %4544 = vmatmul.msk.f32.gmra.mxu2 %vm278_vm9, %v3040_v33  ;;  %4796 = vrcp.f32 %v2946_v7 }
 0xc64   :  { %v3017_v46 = vpop.f32.mrf.mxu0 }
 0xc65   :  { %v3047_v41 = vmul.f32 %v4793_v25, %v3017_v46 }
 0xc67   :  { %4535 = vmatmul.msk.f32.gmra.mxu1 %vm278_vm9, %v3047_v41 }
 0xc68   :  { %v4795_v12 = vpop.eup %4794 }
 0xc69   :  { %v2934_v13 = vpop.xlane.xlu2 %2933  ;;  %v2948_v37 = vpop.xlane.xlu1 %2947  ;;  %v3041_v55 = vmul.f32 %v4795_v12, %v2999_v38  ;;  %v6503_v38 = vld [vmem:[#allocation2 + $0xa0] sm:$0xff] }
 0xc6a   :  { %4798 = vrcp.f32 %v2934_v13  ;;  %v4797_v47 = vpop.eup %4796 }
 0xc6b   :  { %4545 = vmatmul.msk.f32.gmra.mxu2 %vm278_vm9, %v3041_v55  ;;  %4800 = vrcp.f32 %v2948_v37 }
 0xc6c   :  { %v3020_v61 = vpop.f32.mrf.mxu0 }
 0xc6d   :  { %v3048_v2 = vmul.f32 %v4797_v47, %v3020_v61 }
 0xc6f   :  { %4536 = vmatmul.msk.f32.gmra.mxu1 %vm278_vm9, %v3048_v2 }
 0xc70   :  { %v4799_v19 = vpop.eup %4798 }
 0xc71   :  { %v2950_v49 = vpop.xlane.xlu0 %2949  ;;  %v2936_v56 = vpop.xlane.xlu1 %2935  ;;  %v3042_v20 = vmul.f32 %v4799_v19, %v3002_v50  ;;  %v3189_v50 = vperm.slane %v6503_v38, 0 }
 0xc72   :  { %4802 = vrcp.f32 %v2936_v56  ;;  %v4801_v10 = vpop.eup %4800 }
 0xc73   :  { %4546 = vmatmul.msk.f32.gmra.mxu2 %vm278_vm9, %v3042_v20  ;;  %4804 = vrcp.f32 %v2950_v49 }
 0xc74   :  { %v3023_v40 = vpop.f32.mrf.mxu0 }
 0xc75   :  { %v3049_v0 = vmul.f32 %v4801_v10, %v3023_v40 }
 0xc77   :  { %4537 = vmatmul.msk.f32.gmra.mxu1 %vm278_vm9, %v3049_v0 }
 0xc78   :  { %v4803_v29 = vpop.eup %4802 }
 0xc79   :  { %v2938_v34 = vpop.xlane.xlu0 %2937  ;;  %v2952_v36 = vpop.xlane.xlu2 %2951  ;;  %v3043_v31 = vmul.f32 %v4803_v29, %v3005_v14 }
 0xc7a   :  { %4806 = vrcp.f32 %v2938_v34  ;;  %v4805_v6 = vpop.eup %4804 }
 0xc7b   :  { %4547 = vmatmul.msk.f32.gmra.mxu2 %vm278_vm9, %v3043_v31  ;;  %4808 = vrcp.f32 %v2952_v36  ;;  %v7055_v31 = vld [vmem:[#allocation17_spill] sm:$0xff] }
 0xc7c   :  { %v3026_v28 = vpop.f32.mrf.mxu0 }
 0xc7d   :  { %v3050_v54 = vmul.f32 %v4805_v6, %v3026_v28 }
 0xc7f   :  { %4538 = vmatmul.msk.f32.gmra.mxu1 %vm278_vm9, %v3050_v54 }
 0xc80   :  { %v4807_v3 = vpop.eup %4806 }
 0xc81   :  { %v2940_v39 = vpop.xlane.xlu2 %2939  ;;  %v3044_v21 = vmul.f32 %v4807_v3, %v3008_v44  ;;  %v2954_v60 = vpop.xlane.xlu1 %2953  ;;  %v7056_v3 = vld [vmem:[#allocation16_spill] sm:$0xff] }
 0xc82   :  { %4810 = vrcp.f32 %v2940_v39  ;;  %v4809_v42 = vpop.eup %4808 }
 0xc83   :  { %4548 = vmatmul.msk.f32.gmra.mxu2 %vm278_vm9, %v3044_v21  ;;  %4812 = vrcp.f32 %v2954_v60 }
 0xc84   :  { %v3029_v15 = vpop.f32.mrf.mxu0 }
 0xc85   :  { %v3051_v27 = vmul.f32 %v4809_v42, %v3029_v15 }
 0xc87   :  { %4539 = vmatmul.msk.f32.gmra.mxu1 %vm278_vm9, %v3051_v27 }
 0xc88   :  { %v4811_v52 = vpop.eup %4810 }
 0xc89   :  { %v3045_v48 = vmul.f32 %v4811_v52, %v6486_v57  ;;  %v2956_v51 = vpop.xlane.xlu0 %2955  ;;  %v4813_v9 = vpop.eup %4812 }
 0xc8a   :  { %4814 = vrcp.f32 %v2956_v51  ;;  %v7057_v51 = vld [vmem:[#allocation18_spill] sm:$0xff] }
 0xc8b   :  { %4549 = vmatmul.msk.f32.gmra.mxu2 %vm278_vm9, %v3045_v48 }
 0xc8c   :  { %v3032_v17 = vpop.f32.mrf.mxu0 }
 0xc8d   :  { %v3052_v62 = vmul.f32 %v4813_v9, %v3032_v17 }
 0xc8f   :  { %4540 = vmatmul.msk.f32.gmra.mxu1 %vm278_vm9, %v3052_v62 }
 0xc90   :  { %v4815_v53 = vpop.eup %4814 }
 0xc94   :  { %v3035_v63 = vpop.f32.mrf.mxu0 }
 0xc95   :  { %v3053_v16 = vmul.f32 %v4815_v53, %v3035_v63 }
 0xc97   :  { %4541 = vmatmul.msk.f32.gmra.mxu1 %vm278_vm9, %v3053_v16 }
 0xca1   :  { %v3165_v26 = vpop.f32.mrf.mxu2 }
 0xca9   :  { %v3168_v44 = vpop.f32.mrf.mxu2 }
 0xcdb   :  { %v3100_v1 = vpop.f32.mrf.mxu1 }
 0xcdc   :  { %v3166_v18 = vadd.f32 %v3165_v26, %v3100_v1 }
 0xcde   :  { %v3190_v14 = vadd.f32 %v3189_v50, %v3166_v18 }
 0xce0   :  { %v3198_v30 = vadd.f32 %v3190_v14, %v6183_v11 }
 0xce2   :  { %v3206_v57 = vsel %vm386_vm4, %v3198_v30, 0.0 }
 0xce3   :  { %3207 = vadd.xlane.f32.xlu1 %v3206_v57 }
 0xce4   :  { %v3103_v59 = vpop.f32.mrf.mxu1 }
 0xce5   :  { %v3169_v22 = vadd.f32 %v3168_v44, %v3103_v59 }
 0xce6   :  { %v3171_v43 = vpop.f32.mrf.mxu2 }
 0xce7   :  { %v3191_v58 = vadd.f32 %v3189_v50, %v3169_v22 }
 0xce9   :  { %v3199_v5 = vadd.f32 %v3191_v58, %v6197_v23 }
 0xceb   :  { %v3209_v45 = vsel %vm386_vm4, %v3199_v5, 0.0 }
 0xcec   :  { %3210 = vadd.xlane.f32.xlu2 %v3209_v45  ;;  %v3106_v24 = vpop.f32.mrf.mxu1 }
 0xced   :  { %v3172_v7 = vadd.f32 %v3171_v43, %v3106_v24 }
 0xcee   :  { %v3174_v25 = vpop.f32.mrf.mxu2 }
 0xcef   :  { %v3192_v33 = vadd.f32 %v3189_v50, %v3172_v7 }
 0xcf1   :  { %v3200_v46 = vadd.f32 %v3192_v33, %v6211_v35 }
 0xcf3   :  { %v3212_v11 = vsel %vm386_vm4, %v3200_v46, 0.0 }
 0xcf4   :  { %3213 = vadd.xlane.f32.xlu0 %v3212_v11  ;;  %v3109_v41 = vpop.f32.mrf.mxu1 }
 0xcf5   :  { %v3175_v12 = vadd.f32 %v3174_v25, %v3109_v41 }
 0xcf6   :  { %v3177_v37 = vpop.f32.mrf.mxu2 }
 0xcf7   :  { %v3193_v13 = vadd.f32 %v3189_v50, %v3175_v12 }
 0xcf9   :  { %v3201_v55 = vadd.f32 %v3193_v13, %v6225_v8 }
 0xcfb   :  { %v3215_v23 = vsel %vm386_vm4, %v3201_v55, 0.0 }
 0xcfc   :  { %3216 = vadd.xlane.f32.xlu1 %v3215_v23  ;;  %v3112_v47 = vpop.f32.mrf.mxu1 }
 0xcfd   :  { %v3178_v61 = vadd.f32 %v3177_v37, %v3112_v47 }
 0xcfe   :  { %v3180_v49 = vpop.f32.mrf.mxu2 }
 0xcff   :  { %v3194_v2 = vadd.f32 %v3189_v50, %v3178_v61  ;;  %v3403_v61 = vld [vmem:[%s7035_s4 + $0x38] sm:$0xff] }
 0xd00   :  { %3442 = vmatpush.msra.mxu1 %v3403_v61 }
 0xd01   :  { %v3202_v19 = vadd.f32 %v3194_v2, %v6239_v4 }
 0xd03   :  { %v3218_v35 = vsel %vm386_vm4, %v3202_v19, 0.0 }
 0xd04   :  { %3219 = vadd.xlane.f32.xlu2 %v3218_v35  ;;  %v3115_v56 = vpop.f32.mrf.mxu1 }
 0xd05   :  { %v3181_v20 = vadd.f32 %v3180_v49, %v3115_v56 }
 0xd06   :  { %v3183_v8 = vpop.f32.mrf.mxu2 }
 0xd07   :  { %v3195_v10 = vadd.f32 %v3189_v50, %v3181_v20  ;;  %v3401_v20 = vld [vmem:[%s7035_s4 + $0x28] sm:$0xff] }
 0xd09   :  { %v3203_v40 = vadd.f32 %v3195_v10, %v6252_v32 }
 0xd0b   :  { %v3221_v0 = vsel %vm386_vm4, %v3203_v40, 0.0 }
 0xd0c   :  { %3222 = vadd.xlane.f32.xlu0 %v3221_v0  ;;  %v3118_v29 = vpop.f32.mrf.mxu1 }
 0xd0d   :  { %v3184_v34 = vadd.f32 %v3183_v8, %v3118_v29  ;;  %v3400_v29 = vld [vmem:[%s7035_s4 + $0x20] sm:$0xff] }
 0xd0e   :  { %v3186_v21 = vpop.f32.mrf.mxu2 }
 0xd0f   :  { %v3196_v36 = vadd.f32 %v3189_v50, %v3184_v34 }
 0xd11   :  { %v3204_v6 = vadd.f32 %v3196_v36, %v7055_v31 }
 0xd13   :  { %v3224_v4 = vsel %vm386_vm4, %v3204_v6, 0.0 }
 0xd14   :  { %3225 = vadd.xlane.f32.xlu2 %v3224_v4  ;;  %v3121_v28 = vpop.f32.mrf.mxu1 }
 0xd15   :  { %v3187_v60 = vadd.f32 %v3186_v21, %v3121_v28 }
 0xd17   :  { %v3197_v15 = vadd.f32 %v3189_v50, %v3187_v60 }
 0xd19   :  { %v3205_v9 = vadd.f32 %v3197_v15, %v7057_v51 }
 0xd1b   :  { %v3227_v53 = vsel %vm386_vm4, %v3205_v9, 0.0 }
 0xd56   :  { %v3208_v54 = vpop.xlane.xlu1 %3207 }
 0xd57   :  { %v3230_v39 = vmul.f32 %v3208_v54, %v7056_v3 }
 0xd59   :  { %v6521_v42 = vsub.f32 %v3198_v30, %v3230_v39 }
 0xd5b   :  { %v3246_v32 = vmul.f32 %v6521_v42, %v6521_v42 }
 0xd5d   :  { %v3254_v27 = vsel %vm386_vm4, %v3246_v32, 0.0  ;;  %v6586_v32 = vperm.slane %v6503_v38, 1 }
 0xd5e   :  { %3255 = vadd.xlane.f32.xlu1 %v3254_v27 }
 0xd5f   :  { %v3211_v52 = vpop.xlane.xlu2 %3210 }
 0xd60   :  { %v3231_v48 = vmul.f32 %v3211_v52, %v7056_v3  ;;  %v6589_v52 = vperm.slane %v6503_v38, 2 }
 0xd62   :  { %v6528_v17 = vsub.f32 %v3199_v5, %v3231_v48 }
 0xd64   :  { %v3247_v62 = vmul.f32 %v6528_v17, %v6528_v17 }
 0xd66   :  { %v3257_v63 = vsel %vm386_vm4, %v3247_v62, 0.0  ;;  %3228 = vadd.xlane.f32.xlu1 %v3227_v53 }
 0xd67   :  { %v3214_v16 = vpop.xlane.xlu0 %3213  ;;  %3258 = vadd.xlane.f32.xlu0 %v3257_v63 }
 0xd68   :  { %v3232_v26 = vmul.f32 %v3214_v16, %v7056_v3 }
 0xd6a   :  { %v6535_v50 = vsub.f32 %v3200_v46, %v3232_v26 }
 0xd6c   :  { %v3248_v1 = vmul.f32 %v6535_v50, %v6535_v50 }
 0xd6e   :  { %v3260_v18 = vsel %vm386_vm4, %v3248_v1, 0.0 }
 0xd6f   :  { %3261 = vadd.xlane.f32.xlu2 %v3260_v18  ;;  %v3217_v14 = vpop.xlane.xlu1 %3216 }
 0xd70   :  { %v3233_v44 = vmul.f32 %v3217_v14, %v7056_v3 }
 0xd72   :  { %v6541_v30 = vsub.f32 %v3201_v55, %v3233_v44 }
 0xd74   :  { %v3249_v57 = vmul.f32 %v6541_v30, %v6541_v30 }
 0xd76   :  { %v3263_v59 = vsel %vm386_vm4, %v3249_v57, 0.0 }
 0xd77   :  { %v3220_v22 = vpop.xlane.xlu2 %3219  ;;  %3264 = vadd.xlane.f32.xlu0 %v3263_v59 }
 0xd78   :  { %v3234_v58 = vmul.f32 %v3220_v22, %v7056_v3 }
 0xd7a   :  { %v6547_v43 = vsub.f32 %v3202_v19, %v3234_v58  ;;  %v3402_v19 = vld [vmem:[%s7035_s4 + $0x30] sm:$0xff] }
 0xd7b   :  { %3443 = vmatpush.msra.mxu1 %v3402_v19 }
 0xd7c   :  { %v3250_v5 = vmul.f32 %v6547_v43, %v6547_v43 }
 0xd7d   :  { %3444 = vmatpush.msra.mxu1 %v3401_v20 }
 0xd7e   :  { %v3266_v45 = vsel %vm386_vm4, %v3250_v5, 0.0 }
 0xd7f   :  { %v3223_v24 = vpop.xlane.xlu0 %3222  ;;  %3267 = vadd.xlane.f32.xlu1 %v3266_v45  ;;  %3445 = vmatpush.msra.mxu1 %v3400_v29 }
 0xd80   :  { %v3235_v7 = vmul.f32 %v3223_v24, %v7056_v3 }
 0xd82   :  { %v6553_v33 = vsub.f32 %v3203_v40, %v3235_v7 }
 0xd84   :  { %v3251_v25 = vmul.f32 %v6553_v33, %v6553_v33 }
 0xd86   :  { %v3269_v46 = vsel %vm386_vm4, %v3251_v25, 0.0 }
 0xd87   :  { %3270 = vadd.xlane.f32.xlu2 %v3269_v46  ;;  %v3226_v11 = vpop.xlane.xlu2 %3225 }
 0xd88   :  { %v3236_v41 = vmul.f32 %v3226_v11, %v7056_v3 }
 0xd8a   :  { %v6559_v12 = vsub.f32 %v3204_v6, %v3236_v41 }
 0xd8c   :  { %v3252_v13 = vmul.f32 %v6559_v12, %v6559_v12 }
 0xd8e   :  { %v3272_v37 = vsel %vm386_vm4, %v3252_v13, 0.0 }
 0xd8f   :  { %3273 = vadd.xlane.f32.xlu0 %v3272_v37 }
 0xdd1   :  { %v3256_v55 = vpop.xlane.xlu1 %3255 }
 0xdd2   :  { %v3278_v23 = vmul.f32 %v3256_v55, %v7056_v3 }
 0xdd4   :  { %v3286_v47 = vadd.f32 1e-12, %v3278_v23 }
 0xdd6   :  { %4816 = vrsqrt.f32 %v3286_v47  ;;  %vm3300_vm2 = vweird.f32 %v3286_v47 }
 0xdd9   :  { %v3229_v2 = vpop.xlane.xlu1 %3228 }
 0xdda   :  { %v3259_v49 = vpop.xlane.xlu0 %3258  ;;  %v3237_v35 = vmul.f32 %v3229_v2, %v7056_v3 }
 0xddb   :  { %v3279_v56 = vmul.f32 %v3259_v49, %v7056_v3 }
 0xddc   :  { %v4817_v10 = vpop.eup %4816  ;;  %v6576_v40 = vsub.f32 %v3205_v9, %v3237_v35 }
 0xddd   :  { %v3295_v0 = vmul.f32 %v4817_v10, %v3286_v47  ;;  %v3287_v8 = vadd.f32 1e-12, %v3279_v56  ;;  %vm3301_vm9 = vweird.f32 %v4817_v10 }
 0xdde   :  { %v3253_v34 = vmul.f32 %v6576_v40, %v6576_v40  ;;  %vm3302_vm11 = vmor %vm3300_vm2, %vm3301_vm9 }
 0xddf   :  { %v3296_v36 = vmul.f32 %v4817_v10, %v3295_v0  ;;  %4818 = vrsqrt.f32 %v3287_v8  ;;  %vm3310_vm14 = vweird.f32 %v3287_v8 }
 0xde0   :  { %v3275_v31 = vsel %vm386_vm4, %v3253_v34, 0.0 }
 0xde1   :  { %v3297_v6 = vmul.f32 0.5, %v3296_v36  ;;  %3276 = vadd.xlane.f32.xlu1 %v3275_v31 }
 0xde2   :  { %v3262_v4 = vpop.xlane.xlu2 %3261 }
 0xde3   :  { %v3298_v28 = vsub.f32 1.5, %v3297_v6  ;;  %v3280_v54 = vmul.f32 %v3262_v4, %v7056_v3 }
 0xde5   :  { %v4819_v39 = vpop.eup %4818  ;;  %v3299_v21 = vmul.f32 %v4817_v10, %v3298_v28  ;;  %v3288_v60 = vadd.f32 1e-12, %v3280_v54 }
 0xde6   :  { %v3305_v15 = vmul.f32 %v4819_v39, %v3287_v8  ;;  %vm3311_vm13 = vweird.f32 %v4819_v39 }
 0xde7   :  { %v3303_v27 = vsel %vm3302_vm11, %v4817_v10, %v3299_v21  ;;  %4820 = vrsqrt.f32 %v3288_v60  ;;  %vm3312_vm15 = vmor %vm3310_vm14, %vm3311_vm13  ;;  %vm3320_vm1 = vweird.f32 %v3288_v60 }
 0xde8   :  { %v3374_v48 = vmul.f32 %v3303_v27, %v6521_v42  ;;  %v3306_v51 = vmul.f32 %v4819_v39, %v3305_v15 }
 0xdea   :  { %v3383_v9 = vmul.f32 %v6586_v32, %v3374_v48  ;;  %v3307_v62 = vmul.f32 0.5, %v3306_v51  ;;  %v3265_v53 = vpop.xlane.xlu0 %3264 }
 0xdeb   :  { %v3281_v63 = vmul.f32 %v3265_v53, %v7056_v3 }
 0xdec   :  { %v6595_v16 = vadd.f32 %v6589_v52, %v3383_v9  ;;  %v3308_v26 = vsub.f32 1.5, %v3307_v62 }
 0xded   :  { %v4821_v1 = vpop.eup %4820  ;;  %v3289_v18 = vadd.f32 1e-12, %v3281_v63 }
 0xdee   :  { %v3309_v14 = vmul.f32 %v4819_v39, %v3308_v26  ;;  %v3315_v38 = vmul.f32 %v4821_v1, %v3288_v60  ;;  %4550 = vmatmul.msk.f32.vlgmr.msra.gmra.mxu1 %vm386_vm4, %v6595_v16  ;;  %vm3321_vm0 = vweird.f32 %v4821_v1 }
 0xdef   :  { %4822 = vrsqrt.f32 %v3289_v18  ;;  %vm3322_vm3 = vmor %vm3320_vm1, %vm3321_vm0  ;;  %vm3330_vm6 = vweird.f32 %v3289_v18 }
 0xdf0   :  { %v3313_v42 = vsel %vm3312_vm15, %v4819_v39, %v3309_v14  ;;  %v3316_v44 = vmul.f32 %v4821_v1, %v3315_v38 }
 0xdf1   :  { %v3375_v57 = vmul.f32 %v3313_v42, %v6528_v17 }
 0xdf2   :  { %v3317_v59 = vmul.f32 0.5, %v3316_v44  ;;  %v3268_v22 = vpop.xlane.xlu1 %3267 }
 0xdf3   :  { %v3282_v58 = vmul.f32 %v3268_v22, %v7056_v3  ;;  %v3384_v5 = vmul.f32 %v6586_v32, %v3375_v57 }
 0xdf4   :  { %v3318_v45 = vsub.f32 1.5, %v3317_v59 }
 0xdf5   :  { %v4823_v24 = vpop.eup %4822  ;;  %v3290_v7 = vadd.f32 1e-12, %v3282_v58  ;;  %v6603_v25 = vadd.f32 %v6589_v52, %v3384_v5 }
 0xdf6   :  { %v3319_v46 = vmul.f32 %v4821_v1, %v3318_v45  ;;  %v3325_v11 = vmul.f32 %v4823_v24, %v3289_v18  ;;  %vm3331_vm5 = vweird.f32 %v4823_v24 }
 0xdf7   :  { %4824 = vrsqrt.f32 %v3290_v7  ;;  %4551 = vmatmul.msk.f32.gmra.mxu1 %vm386_vm4, %v6603_v25  ;;  %vm3332_vm7 = vmor %vm3330_vm6, %vm3331_vm5  ;;  %vm3340_vm10 = vweird.f32 %v3290_v7 }
 0xdf8   :  { %v3323_v17 = vsel %vm3322_vm3, %v4821_v1, %v3319_v46  ;;  %v3326_v41 = vmul.f32 %v4823_v24, %v3325_v11  ;;  %v6648_v11 = vld [vmem:[%s7035_s4 + $0x48] ss:$0 sm:$0xff] }
 0xdf9   :  { %v3376_v13 = vmul.f32 %v3323_v17, %v6535_v50 }
 0xdfa   :  { %v3327_v37 = vmul.f32 0.5, %v3326_v41  ;;  %v3271_v55 = vpop.xlane.xlu2 %3270 }
 0xdfb   :  { %v3283_v23 = vmul.f32 %v3271_v55, %v7056_v3  ;;  %v3385_v47 = vmul.f32 %v6586_v32, %v3376_v13 }
 0xdfc   :  { %v3328_v61 = vsub.f32 1.5, %v3327_v37 }
 0xdfd   :  { %v4825_v2 = vpop.eup %4824  ;;  %v3291_v19 = vadd.f32 1e-12, %v3283_v23  ;;  %v6611_v49 = vadd.f32 %v6589_v52, %v3385_v47 }
 0xdfe   :  { %v3329_v35 = vmul.f32 %v4823_v24, %v3328_v61  ;;  %v3335_v56 = vmul.f32 %v4825_v2, %v3290_v7  ;;  %vm3341_vm8 = vweird.f32 %v4825_v2 }
 0xdff   :  { %4826 = vrsqrt.f32 %v3291_v19  ;;  %4552 = vmatmul.msk.f32.gmra.mxu1 %vm386_vm4, %v6611_v49  ;;  %vm3342_vm9 = vmor %vm3340_vm10, %vm3341_vm8  ;;  %vm3350_vm11 = vweird.f32 %v3291_v19 }
 0xe00   :  { %v3333_v50 = vsel %vm3332_vm7, %v4823_v24, %v3329_v35  ;;  %v3336_v20 = vmul.f32 %v4825_v2, %v3335_v56 }
 0xe01   :  { %v3377_v10 = vmul.f32 %v3333_v50, %v6541_v30 }
 0xe02   :  { %v3337_v0 = vmul.f32 0.5, %v3336_v20  ;;  %v3274_v8 = vpop.xlane.xlu0 %3273 }
 0xe03   :  { %v3284_v29 = vmul.f32 %v3274_v8, %v7056_v3  ;;  %v3386_v34 = vmul.f32 %v6586_v32, %v3377_v10 }
 0xe04   :  { %v3338_v36 = vsub.f32 1.5, %v3337_v0 }
 0xe05   :  { %v4827_v31 = vpop.eup %4826  ;;  %v3292_v6 = vadd.f32 1e-12, %v3284_v29  ;;  %v6619_v4 = vadd.f32 %v6589_v52, %v3386_v34 }
 0xe06   :  { %v3339_v28 = vmul.f32 %v4825_v2, %v3338_v36  ;;  %v3345_v54 = vmul.f32 %v4827_v31, %v3291_v19  ;;  %vm3351_vm2 = vweird.f32 %v4827_v31 }
 0xe07   :  { %4828 = vrsqrt.f32 %v3292_v6  ;;  %4553 = vmatmul.msk.f32.gmra.mxu1 %vm386_vm4, %v6619_v4  ;;  %vm3352_vm13 = vmor %vm3350_vm11, %vm3351_vm2  ;;  %vm3360_vm15 = vweird.f32 %v3292_v6 }
 0xe08   :  { %v3343_v30 = vsel %vm3342_vm9, %v4825_v2, %v3339_v28  ;;  %v3346_v39 = vmul.f32 %v4827_v31, %v3345_v54 }
 0xe09   :  { %v3378_v21 = vmul.f32 %v3343_v30, %v6547_v43 }
 0xe0a   :  { %v3347_v60 = vmul.f32 0.5, %v3346_v39 }
 0xe0b   :  { %v3387_v15 = vmul.f32 %v6586_v32, %v3378_v21 }
 0xe0c   :  { %v3348_v27 = vsub.f32 1.5, %v3347_v60 }
 0xe0d   :  { %v4829_v48 = vpop.eup %4828  ;;  %v6626_v51 = vadd.f32 %v6589_v52, %v3387_v15 }
 0xe0e   :  { %v3349_v9 = vmul.f32 %v4827_v31, %v3348_v27  ;;  %v3355_v62 = vmul.f32 %v4829_v48, %v3292_v6  ;;  %vm3361_vm14 = vweird.f32 %v4829_v48 }
 0xe0f   :  { %4554 = vmatmul.msk.f32.gmra.mxu1 %vm386_vm4, %v6626_v51  ;;  %vm3362_vm0 = vmor %vm3360_vm15, %vm3361_vm14 }
 0xe10   :  { %v3353_v53 = vsel %vm3352_vm13, %v4827_v31, %v3349_v9  ;;  %v3356_v63 = vmul.f32 %v4829_v48, %v3355_v62 }
 0xe11   :  { %v3379_v43 = vmul.f32 %v3353_v53, %v6553_v33 }
 0xe12   :  { %v3357_v26 = vmul.f32 0.5, %v3356_v63 }
 0xe13   :  { %v3388_v1 = vmul.f32 %v6586_v32, %v3379_v43 }
 0xe14   :  { %v3358_v18 = vsub.f32 1.5, %v3357_v26  ;;  %v3830_v26 = vld [vmem:[#allocation2 + $0x160] sm:$0xff] }
 0xe15   :  { %v6633_v14 = vadd.f32 %v6589_v52, %v3388_v1  ;;  %3864 = vmatpush.msra.mxu2 %v3830_v26 }
 0xe16   :  { %v3359_v38 = vmul.f32 %v4829_v48, %v3358_v18 }
 0xe17   :  { %4555 = vmatmul.msk.f32.gmra.mxu1 %vm386_vm4, %v6633_v14 }
 0xe18   :  { %v3363_v42 = vsel %vm3362_vm0, %v4829_v48, %v3359_v38 }
 0xe19   :  { %v3380_v44 = vmul.f32 %v3363_v42, %v6559_v12 }
 0xe1b   :  { %v3389_v57 = vmul.f32 %v6586_v32, %v3380_v44 }
 0xe1d   :  { %v6640_v33 = vadd.f32 %v6589_v52, %v3389_v57  ;;  %v3829_v57 = vld [vmem:[#allocation2 + $0x158] sm:$0xff] }
 0xe1e   :  { %3865 = vmatpush.msra.mxu2 %v3829_v57 }
 0xe1f   :  { %4556 = vmatmul.msk.f32.gmra.mxu1 %vm386_vm4, %v6640_v33 }
 0xe54   :  { %v3277_v59 = vpop.xlane.xlu1 %3276 }
 0xe55   :  { %v3285_v22 = vmul.f32 %v3277_v59, %v7056_v3 }
 0xe57   :  { %v3293_v58 = vadd.f32 1e-12, %v3285_v22 }
 0xe59   :  { %4830 = vrsqrt.f32 %v3293_v58  ;;  %vm3370_vm3 = vweird.f32 %v3293_v58 }
 0xe5f   :  { %v4831_v5 = vpop.eup %4830 }
 0xe60   :  { %v3365_v45 = vmul.f32 %v4831_v5, %v3293_v58  ;;  %vm3371_vm1 = vweird.f32 %v4831_v5 }
 0xe61   :  { %vm3372_vm5 = vmor %vm3370_vm3, %vm3371_vm1 }
 0xe62   :  { %v3366_v24 = vmul.f32 %v4831_v5, %v3365_v45 }
 0xe64   :  { %v3367_v7 = vmul.f32 0.5, %v3366_v24 }
 0xe66   :  { %v3368_v46 = vsub.f32 1.5, %v3367_v7  ;;  %v3828_v7 = vld [vmem:[#allocation2 + $0x150] sm:$0xff] }
 0xe67   :  { %3866 = vmatpush.msra.mxu2 %v3828_v7 }
 0xe68   :  { %v3369_v12 = vmul.f32 %v4831_v5, %v3368_v46 }
 0xe6a   :  { %v3373_v17 = vsel %vm3372_vm5, %v4831_v5, %v3369_v12 }
 0xe6b   :  { %v3381_v41 = vmul.f32 %v3373_v17, %v6576_v40  ;;  %v3447_v13 = vpop.f32.mrf.mxu1 }
 0xe6c   :  { %v6652_v37 = vadd.f32 %v6648_v11, %v3447_v13 }
 0xe6d   :  { %v3390_v55 = vmul.f32 %v6586_v32, %v3381_v41  ;;  %v3827_v41 = vld [vmem:[#allocation2 + $0x148] sm:$0xff] }
 0xe6e   :  { %v6656_v23 = vmul.f32 0.70710677, %v6652_v37  ;;  %3867 = vmatpush.msra.mxu2 %v3827_v41 }
 0xe6f   :  { %v6659_v47 = vadd.f32 %v6589_v52, %v3390_v55 }
 0xe70   :  { %v3487_v61 = vmul.f32 %v6656_v23, %v6656_v23 }
 0xe71   :  { %4557 = vmatmul.msk.f32.gmra.mxu1 %vm386_vm4, %v6659_v47 }
 0xe72   :  { %v3488_v2 = vmin.f32 %v3487_v61, 16.0 }
 0xe74   :  { %v3489_v40 = vmul.f32 2.1237322e-06, %v3488_v2  ;;  %v3500_v19 = vmul.f32 3.8918573e-05, %v3488_v2  ;;  %v3450_v35 = vpop.f32.mrf.mxu1 }
 0xe75   :  { %v6666_v56 = vadd.f32 %v6648_v11, %v3450_v35 }
 0xe76   :  { %v3490_v32 = vadd.f32 0.00028619796, %v3489_v40  ;;  %v3501_v50 = vadd.f32 0.001143296, %v3500_v19 }
 0xe77   :  { %v6669_v20 = vmul.f32 0.70710677, %v6666_v56 }
 0xe78   :  { %v3491_v52 = vmul.f32 %v3490_v32, %v3488_v2  ;;  %v3502_v10 = vmul.f32 %v3501_v50, %v3488_v2 }
 0xe79   :  { %v3527_v0 = vmul.f32 %v6669_v20, %v6669_v20 }
 0xe7a   :  { %v3492_v8 = vadd.f32 0.0036580483, %v3491_v52  ;;  %v3503_v29 = vadd.f32 0.014752088, %v3502_v10  ;;  %v3826_v52 = vld [vmem:[#allocation2 + $0x140] sm:$0xff] }
 0xe7b   :  { %v6673_v34 = vmin.f32 %v3527_v0, 16.0  ;;  %3868 = vmatpush.msra.mxu2 %v3826_v52 }
 0xe7c   :  { %v3493_v36 = vmul.f32 %v3492_v8, %v3488_v2  ;;  %v3504_v31 = vmul.f32 %v3503_v29, %v3488_v2  ;;  %v3453_v6 = vpop.f32.mrf.mxu1  ;;  %v3825_v29 = vld [vmem:[#allocation2 + $0x138] sm:$0xff] }
 0xe7d   :  { %v3529_v28 = vmul.f32 2.1237322e-06, %v6673_v34  ;;  %v3540_v54 = vmul.f32 3.8918573e-05, %v6673_v34  ;;  %v6678_v30 = vadd.f32 %v6648_v11, %v3453_v6  ;;  %3869 = vmatpush.msra.mxu2 %v3825_v29 }
 0xe7e   :  { %v3494_v39 = vadd.f32 0.05243302, %v3493_v36  ;;  %v3505_v21 = vadd.f32 0.112945676, %v3504_v31 }
 0xe7f   :  { %v3530_v60 = vadd.f32 0.00028619796, %v3529_v28  ;;  %v3541_v15 = vadd.f32 0.001143296, %v3540_v54  ;;  %v6681_v48 = vmul.f32 0.70710677, %v6678_v30 }
 0xe80   :  { %v3506_v27 = vmul.f32 %v3505_v21, %v3488_v2  ;;  %v3495_v53 = vmul.f32 %v3494_v39, %v3488_v2  ;;  %v3824_v39 = vld [vmem:[#allocation2 + $0x130] sm:$0xff] }
 0xe81   :  { %v3531_v9 = vmul.f32 %v3530_v60, %v6673_v34  ;;  %v3542_v62 = vmul.f32 %v3541_v15, %v6673_v34  ;;  %v3567_v43 = vmul.f32 %v6681_v48, %v6681_v48  ;;  %3870 = vmatpush.msra.mxu2 %v3824_v39 }
 0xe82   :  { %v3507_v63 = vadd.f32 0.4994258, %v3506_v27  ;;  %v3496_v58 = vadd.f32 0.18741608, %v3495_v53 }
 0xe83   :  { %v3532_v1 = vadd.f32 0.0036580483, %v3531_v9  ;;  %v3543_v18 = vadd.f32 0.014752088, %v3542_v62  ;;  %v6687_v42 = vmin.f32 %v3567_v43, 16.0  ;;  %v3823_v43 = vld [vmem:[#allocation2 + $0x128] sm:$0xff] }
 0xe84   :  { %v3508_v38 = vmul.f32 %v3507_v63, %v3488_v2  ;;  %v3456_v44 = vpop.f32.mrf.mxu1  ;;  %v3497_v61 = vmul.f32 %v3496_v58, %v3488_v2  ;;  %3871 = vmatpush.msra.mxu2 %v3823_v43 }
 0xe85   :  { %v3533_v59 = vmul.f32 %v3532_v1, %v6673_v34  ;;  %v3544_v22 = vmul.f32 %v3543_v18, %v6673_v34  ;;  %v3569_v45 = vmul.f32 2.1237322e-06, %v6687_v42  ;;  %v6695_v24 = vadd.f32 %v6648_v11, %v3456_v44 }
 0xe86   :  { %v6691_v5 = vadd.f32 1.0, %v3508_v38  ;;  %v3580_v17 = vmul.f32 3.8918573e-05, %v6687_v42  ;;  %v3498_v6 = vadd.f32 1.1283791, %v3497_v61 }
 0xe87   :  { %v3534_v46 = vadd.f32 0.05243302, %v3533_v59  ;;  %v3545_v12 = vadd.f32 0.112945676, %v3544_v22  ;;  %v3570_v55 = vadd.f32 0.00028619796, %v3569_v45 }
 0xe88   :  { %4832 = vrcp.f32 %v6691_v5  ;;  %v3581_v40 = vadd.f32 0.001143296, %v3580_v17  ;;  %v6701_v19 = vmul.f32 0.70710677, %v6695_v24  ;;  %v3519_v1 = vand.u32 2147483647, %v6691_v5 }
 0xe89   :  { %v3546_v13 = vmul.f32 %v3545_v12, %v6673_v34  ;;  %v3535_v35 = vmul.f32 %v3534_v46, %v6673_v34  ;;  %v3571_v50 = vmul.f32 %v3570_v55, %v6687_v42  ;;  %v3521_v18 = vand.u32 2147483648, %v6691_v5 }
 0xe8a   :  { %v3582_v10 = vmul.f32 %v3581_v40, %v6687_v42  ;;  %v3607_v0 = vmul.f32 %v6701_v19, %v6701_v19  ;;  %v3499_v58 = vmul.f32 %v3498_v6, %v6656_v23  ;;  %vm3515_vm7 = vweird.f32 %v6691_v5 }
 0xe8b   :  { %v3547_v32 = vadd.f32 0.4994258, %v3546_v13  ;;  %v3572_v36 = vadd.f32 0.0036580483, %v3571_v50  ;;  %v3536_v60 = vadd.f32 0.18741608, %v3535_v35 }
 0xe8c   :  { %v3459_v8 = vpop.f32.mrf.mxu1  ;;  %v3583_v28 = vadd.f32 0.014752088, %v3582_v10  ;;  %v6709_v54 = vmin.f32 %v3607_v0, 16.0  ;;  %vm3520_vm10 = vcmp.eq.f32.partialorder %v3519_v1, 8.507059e+37  ;;  %v3522_v13 = vor.u32 1.1754944e-38, %v3521_v18 }
 0xe8d   :  { %v3548_v2 = vmul.f32 %v3547_v32, %v6673_v34  ;;  %v6715_v27 = vadd.f32 %v6648_v11, %v3459_v8  ;;  %v3573_v9 = vmul.f32 %v3572_v36, %v6687_v42  ;;  %v3537_v45 = vmul.f32 %v3536_v60, %v6673_v34 }
 0xe8e   :  { %v4833_v31 = vpop.eup %4832  ;;  %v3584_v62 = vmul.f32 %v3583_v28, %v6687_v42  ;;  %v3609_v53 = vmul.f32 2.1237322e-06, %v6709_v54  ;;  %v3620_v63 = vmul.f32 3.8918573e-05, %v6709_v54  ;;  %v3471_v32 = vmul.f32 0.5, %v6652_v37 }
 0xe8f   :  { %v3511_v21 = vmul.f32 %v4833_v31, %v6691_v5  ;;  %v6712_v15 = vadd.f32 1.0, %v3548_v2  ;;  %vm3516_vm6 = vweird.f32 %v4833_v31  ;;  %v3574_v38 = vadd.f32 0.05243302, %v3573_v9 }
 0xe90   :  { %v3585_v57 = vadd.f32 0.112945676, %v3584_v62  ;;  %v3610_v59 = vadd.f32 0.00028619796, %v3609_v53  ;;  %v3621_v22 = vadd.f32 0.001143296, %v3620_v63  ;;  %vm3517_vm8 = vmor %vm3515_vm7, %vm3516_vm6 }
 0xe91   :  { %v3512_v26 = vsub.f32 1.0, %v3511_v21  ;;  %4834 = vrcp.f32 %v6712_v15  ;;  %v6728_v7 = vmul.f32 0.70710677, %v6715_v27  ;;  %v3575_v23 = vmul.f32 %v3574_v38, %v6687_v42 }
 0xe92   :  { %v3586_v12 = vmul.f32 %v3585_v57, %v6687_v42  ;;  %v3611_v17 = vmul.f32 %v3610_v59, %v6709_v54  ;;  %v3622_v41 = vmul.f32 %v3621_v22, %v6709_v54  ;;  %v3538_v52 = vadd.f32 1.1283791, %v3537_v45 }
 0xe93   :  { %v3513_v44 = vmul.f32 %v4833_v31, %v3512_v26  ;;  %v3647_v5 = vmul.f32 %v6728_v7, %v6728_v7  ;;  %v3559_v8 = vand.u32 2147483647, %v6712_v15  ;;  %v3576_v21 = vadd.f32 0.18741608, %v3575_v23 }
 0xe94   :  { %v3587_v61 = vadd.f32 0.4994258, %v3586_v12  ;;  %v3612_v40 = vadd.f32 0.0036580483, %v3611_v17  ;;  %v3623_v35 = vadd.f32 0.014752088, %v3622_v41  ;;  %v3462_v36 = vpop.f32.mrf.mxu1  ;;  %v3539_v26 = vmul.f32 %v3538_v52, %v6669_v20 }
 0xe95   :  { %v3514_v46 = vadd.f32 %v4833_v31, %v3513_v44  ;;  %v6744_v39 = vmin.f32 %v3647_v5, 16.0  ;;  %v6753_v1 = vadd.f32 %v6648_v11, %v3462_v36  ;;  %vm3555_vm2 = vweird.f32 %v6712_v15 }
 0xe96   :  { %v3588_v29 = vmul.f32 %v3587_v61, %v6687_v42  ;;  %v3624_v2 = vmul.f32 %v3623_v35, %v6709_v54  ;;  %v3613_v28 = vmul.f32 %v3612_v40, %v6709_v54  ;;  %vm3560_vm13 = vcmp.eq.f32.partialorder %v3559_v8, 8.507059e+37 }
 0xe97   :  { %v4835_v34 = vpop.eup %4834  ;;  %v3518_v55 = vsel %vm3517_vm8, %v4833_v31, %v3514_v46  ;;  %v3561_v31 = vand.u32 2147483648, %v6712_v15  ;;  %v3649_v53 = vmul.f32 2.1237322e-06, %v6744_v39  ;;  %v3660_v63 = vmul.f32 3.8918573e-05, %v6744_v39 }
 0xe98   :  { %v3523_v50 = vsel %vm3520_vm10, %v3522_v13, %v3518_v55  ;;  %v3551_v10 = vmul.f32 %v4835_v34, %v6712_v15  ;;  %v6746_v60 = vadd.f32 1.0, %v3588_v29  ;;  %v3625_v9 = vadd.f32 0.112945676, %v3624_v2 }
 0xe99   :  { %v3524_v0 = vmul.f32 %v3523_v50, %v3499_v58  ;;  %vm3556_vm9 = vweird.f32 %v4835_v34  ;;  %v3614_v38 = vadd.f32 0.05243302, %v3613_v28  ;;  %v3562_v59 = vor.u32 1.1754944e-38, %v3561_v31 }
 0xe9a   :  { %v3552_v6 = vsub.f32 1.0, %v3551_v10  ;;  %4836 = vrcp.f32 %v6746_v60  ;;  %v3626_v44 = vmul.f32 %v3625_v9, %v6709_v54  ;;  %vm3557_vm11 = vmor %vm3555_vm2, %vm3556_vm9  ;;  %v3650_v22 = vadd.f32 0.00028619796, %v3649_v53 }
 0xe9b   :  { %v4558_v37 = vclamps-f32 %v3524_v0, 1.0  ;;  %v3661_v58 = vadd.f32 0.001143296, %v3660_v63  ;;  %v3577_v20 = vmul.f32 %v3576_v21, %v6687_v42  ;;  %v6761_v15 = vmul.f32 0.70710677, %v6753_v1 }
 0xe9c   :  { %v3553_v62 = vmul.f32 %v4835_v34, %v3552_v6  ;;  %v3627_v46 = vadd.f32 0.4994258, %v3626_v44  ;;  %v3651_v17 = vmul.f32 %v3650_v22, %v6744_v39  ;;  %v3615_v23 = vmul.f32 %v3614_v38, %v6709_v54  ;;  %v3465_v61 = vpop.f32.mrf.mxu1 }
 0xe9d   :  { %v3807_v43 = vadd.f32 1.0, %v4558_v37  ;;  %v3662_v41 = vmul.f32 %v3661_v58, %v6744_v39  ;;  %v3687_v42 = vmul.f32 %v6761_v15, %v6761_v15  ;;  %v3472_v40 = vmul.f32 0.5, %v6666_v56 }
 0xe9e   :  { %v3554_v18 = vadd.f32 %v4835_v34, %v3553_v62  ;;  %v3628_v5 = vmul.f32 %v3627_v46, %v6709_v54  ;;  %v3652_v50 = vadd.f32 0.0036580483, %v3651_v17  ;;  %v3578_v52 = vadd.f32 1.1283791, %v3577_v20 }
 0xe9f   :  { %v3815_v57 = vmul.f32 %v3807_v43, %v3471_v32  ;;  %v3663_v55 = vadd.f32 0.014752088, %v3662_v41  ;;  %v6773_v8 = vmin.f32 %v3687_v42, 16.0  ;;  %v3616_v36 = vadd.f32 0.18741608, %v3615_v23 }
 0xea0   :  { %v3558_v45 = vsel %vm3557_vm11, %v4835_v34, %v3554_v18  ;;  %v4837_v34 = vpop.eup %4836  ;;  %v6770_v10 = vadd.f32 1.0, %v3628_v5  ;;  %v6776_v6 = vadd.f32 %v6648_v11, %v3465_v61  ;;  %v3599_v56 = vand.u32 2147483647, %v6746_v60 }
 0xea1   :  { %v3563_v12 = vsel %vm3560_vm13, %v3562_v59, %v3558_v45  ;;  %4566 = vmatmul.msk.f32.vlgmr.msra.gmra.mxu2 %vm2115_vm12, %v3815_v57  ;;  %v3591_v32 = vmul.f32 %v4837_v34, %v6746_v60  ;;  %v3664_v0 = vmul.f32 %v3663_v55, %v6744_v39  ;;  %vm3596_vm14 = vweird.f32 %v4837_v34 }
 0xea2   :  { %v3564_v13 = vmul.f32 %v3563_v12, %v3539_v26  ;;  %v3601_v31 = vand.u32 2147483648, %v6746_v60  ;;  %4838 = vrcp.f32 %v6770_v10  ;;  %v3653_v21 = vmul.f32 %v3652_v50, %v6744_v39 }
 0xea3   :  { %v3592_v2 = vsub.f32 1.0, %v3591_v32  ;;  %v3665_v9 = vadd.f32 0.112945676, %v3664_v0  ;;  %v3579_v62 = vmul.f32 %v3578_v52, %v6681_v48  ;;  %vm3595_vm15 = vweird.f32 %v6746_v60 }
 0xea4   :  { %v4559_v35 = vclamps-f32 %v3564_v13, 1.0  ;;  %v3689_v53 = vmul.f32 2.1237322e-06, %v6773_v8  ;;  %v3700_v63 = vmul.f32 3.8918573e-05, %v6773_v8  ;;  %v3617_v26 = vmul.f32 %v3616_v36, %v6709_v54  ;;  %vm3597_vm0 = vmor %vm3595_vm15, %vm3596_vm14 }
 0xea5   :  { %v3593_v37 = vmul.f32 %v4837_v34, %v3592_v2  ;;  %v3666_v18 = vmul.f32 %v3665_v9, %v6744_v39  ;;  %v6789_v38 = vmul.f32 0.70710677, %v6776_v6  ;;  %vm3600_vm1 = vcmp.eq.f32.partialorder %v3599_v56, 8.507059e+37 }
 0xea6   :  { %v3808_v29 = vadd.f32 1.0, %v4559_v35  ;;  %v3602_v48 = vor.u32 1.1754944e-38, %v3601_v31  ;;  %v3690_v44 = vadd.f32 0.00028619796, %v3689_v53  ;;  %v3701_v60 = vadd.f32 0.001143296, %v3700_v63 }
 0xea7   :  { %v3594_v43 = vadd.f32 %v4837_v34, %v3593_v37  ;;  %v3654_v59 = vadd.f32 0.05243302, %v3653_v21  ;;  %v3667_v22 = vadd.f32 0.4994258, %v3666_v18  ;;  %v3727_v58 = vmul.f32 %v6789_v38, %v6789_v38 }
 0xea8   :  { %v3816_v28 = vmul.f32 %v3808_v29, %v3472_v40  ;;  %v4839_v54 = vpop.eup %4838  ;;  %v3691_v20 = vmul.f32 %v3690_v44, %v6773_v8  ;;  %v3702_v46 = vmul.f32 %v3701_v60, %v6773_v8  ;;  %v3473_v12 = vmul.f32 0.5, %v6678_v30 }
 0xea9   :  { %v3598_v57 = vsel %vm3597_vm0, %v4837_v34, %v3594_v43  ;;  %v3618_v41 = vadd.f32 1.1283791, %v3617_v26  ;;  %v3631_v13 = vmul.f32 %v4839_v54, %v6770_v10  ;;  %v3639_v23 = vand.u32 2147483647, %v6770_v10 }
 0xeaa   :  { %4567 = vmatmul.msk.f32.gmra.mxu2 %vm2115_vm12, %v3816_v28  ;;  %v3603_v45 = vsel %vm3600_vm1, %v3602_v48, %v3598_v57  ;;  %v3668_v5 = vmul.f32 %v3667_v22, %v6744_v39  ;;  %v3703_v34 = vadd.f32 0.014752088, %v3702_v46  ;;  %v6801_v55 = vmin.f32 %v3727_v58, 16.0 }
 0xeab   :  { %v3604_v17 = vmul.f32 %v3603_v45, %v3579_v62  ;;  %v3632_v61 = vsub.f32 1.0, %v3631_v13  ;;  %v3641_v40 = vand.u32 2147483648, %v6770_v10  ;;  %v3655_v35 = vmul.f32 %v3654_v59, %v6744_v39 }
 0xeac   :  { %v3669_v32 = vadd.f32 1.0, %v3668_v5  ;;  %v3692_v50 = vadd.f32 0.0036580483, %v3691_v20  ;;  %v3704_v30 = vmul.f32 %v3703_v34, %v6773_v8  ;;  %v3729_v52 = vmul.f32 2.1237322e-06, %v6801_v55 }
 0xead   :  { %v4560_v42 = vclamps-f32 %v3604_v17, 1.0  ;;  %v3633_v29 = vmul.f32 %v4839_v54, %v3632_v61  ;;  %vm3636_vm3 = vweird.f32 %v4839_v54  ;;  %v3740_v2 = vmul.f32 3.8918573e-05, %v6801_v55 }
 0xeae   :  { %vm3635_vm5 = vweird.f32 %v6770_v10  ;;  %4840 = vrcp.f32 %v3669_v32  ;;  %v3656_v31 = vadd.f32 0.18741608, %v3655_v35  ;;  %v3705_v28 = vadd.f32 0.112945676, %v3704_v30 }
 0xeaf   :  { %v3809_v0 = vadd.f32 1.0, %v4560_v42  ;;  %v3634_v56 = vadd.f32 %v4839_v54, %v3633_v29  ;;  %vm3637_vm6 = vmor %vm3635_vm5, %vm3636_vm3  ;;  %v3642_v37 = vor.u32 1.1754944e-38, %v3641_v40  ;;  %v3693_v21 = vmul.f32 %v3692_v50, %v6773_v8 }
 0xeb0   :  { %v3730_v9 = vadd.f32 0.00028619796, %v3729_v52  ;;  %v3741_v62 = vadd.f32 0.001143296, %v3740_v2  ;;  %v3619_v53 = vmul.f32 %v3618_v41, %v6701_v19  ;;  %vm3640_vm7 = vcmp.eq.f32.partialorder %v3639_v23, 8.507059e+37 }
 0xeb1   :  { %v3817_v36 = vmul.f32 %v3809_v0, %v3473_v12  ;;  %v3638_v63 = vsel %vm3637_vm6, %v4839_v54, %v3634_v56  ;;  %v3706_v43 = vmul.f32 %v3705_v28, %v6773_v8  ;;  %v3657_v44 = vmul.f32 %v3656_v31, %v6744_v39 }
 0xeb2   :  { %v3643_v10 = vsel %vm3640_vm7, %v3642_v37, %v3638_v63  ;;  %v3731_v26 = vmul.f32 %v3730_v9, %v6801_v55  ;;  %v3742_v18 = vmul.f32 %v3741_v62, %v6801_v55  ;;  %v3694_v59 = vadd.f32 0.05243302, %v3693_v21 }
 0xeb3   :  { %4568 = vmatmul.msk.f32.gmra.mxu2 %vm2115_vm12, %v3817_v36  ;;  %v3644_v48 = vmul.f32 %v3643_v10, %v3619_v53  ;;  %v3707_v60 = vadd.f32 0.4994258, %v3706_v43  ;;  %v3474_v46 = vmul.f32 0.5, %v6695_v24  ;;  %v3658_v17 = vadd.f32 1.1283791, %v3657_v44 }
 0xeb4   :  { %v4841_v57 = vpop.eup %4840  ;;  %v3743_v22 = vadd.f32 0.014752088, %v3742_v18  ;;  %v3732_v45 = vadd.f32 0.0036580483, %v3731_v26  ;;  %v3681_v13 = vand.u32 2147483648, %v3669_v32  ;;  %v3695_v23 = vmul.f32 %v3694_v59, %v6773_v8 }
 0xeb5   :  { %v4561_v58 = vclamps-f32 %v3644_v48, 1.0  ;;  %v3671_v19 = vmul.f32 %v4841_v57, %v3669_v32  ;;  %v3708_v54 = vmul.f32 %v3707_v60, %v6773_v8  ;;  %vm3676_vm8 = vweird.f32 %v4841_v57 }
 0xeb6   :  { %v3744_v20 = vmul.f32 %v3743_v22, %v6801_v55  ;;  %v3679_v61 = vand.u32 2147483647, %v3669_v32  ;;  %v3733_v40 = vmul.f32 %v3732_v45, %v6801_v55  ;;  %vm3675_vm10 = vweird.f32 %v3669_v32 }
 0xeb7   :  { %v3810_v12 = vadd.f32 1.0, %v4561_v58  ;;  %v3672_v41 = vsub.f32 1.0, %v3671_v19  ;;  %v3709_v39 = vadd.f32 1.0, %v3708_v54  ;;  %vm3677_vm9 = vmor %vm3675_vm10, %vm3676_vm8  ;;  %v3682_v24 = vor.u32 1.1754944e-38, %v3681_v13 }
 0xeb8   :  { %v3745_v5 = vadd.f32 0.112945676, %v3744_v20  ;;  %v3696_v30 = vadd.f32 0.18741608, %v3695_v23  ;;  %v3659_v52 = vmul.f32 %v3658_v17, %v6728_v7  ;;  %vm3680_vm2 = vcmp.eq.f32.partialorder %v3679_v61, 8.507059e+37 }
 0xeb9   :  { %v3818_v34 = vmul.f32 %v3810_v12, %v3474_v46  ;;  %v3673_v42 = vmul.f32 %v4841_v57, %v3672_v41  ;;  %4842 = vrcp.f32 %v3709_v39  ;;  %v3734_v36 = vadd.f32 0.05243302, %v3733_v40 }
 0xeba   :  { %v3746_v50 = vmul.f32 %v3745_v5, %v6801_v55  ;;  %v3697_v32 = vmul.f32 %v3696_v30, %v6773_v8  ;;  %v3475_v53 = vmul.f32 0.5, %v6715_v27  ;;  %v3721_v10 = vand.u32 2147483648, %v3709_v39 }
 0xebb   :  { %v3674_v35 = vadd.f32 %v4841_v57, %v3673_v42  ;;  %4569 = vmatmul.msk.f32.gmra.mxu2 %vm2115_vm12, %v3818_v34  ;;  %v3735_v9 = vmul.f32 %v3734_v36, %v6801_v55  ;;  %v3719_v48 = vand.u32 2147483647, %v3709_v39  ;;  %vm3715_vm13 = vweird.f32 %v3709_v39 }
 0xebc   :  { %v3747_v29 = vadd.f32 0.4994258, %v3746_v50  ;;  %v3698_v43 = vadd.f32 1.1283791, %v3697_v32  ;;  %v3722_v8 = vor.u32 1.1754944e-38, %v3721_v10  ;;  %v3476_v46 = vmul.f32 0.5, %v6753_v1 }
 0xebd   :  { %v3678_v0 = vsel %vm3677_vm9, %v4841_v57, %v3674_v35  ;;  %v3736_v44 = vadd.f32 0.18741608, %v3735_v9  ;;  %vm3720_vm15 = vcmp.eq.f32.partialorder %v3719_v48, 8.507059e+37  ;;  %v3477_v40 = vmul.f32 0.5, %v6776_v6 }
 0xebe   :  { %v3683_v2 = vsel %vm3680_vm2, %v3682_v24, %v3678_v0  ;;  %v3748_v31 = vmul.f32 %v3747_v29, %v6801_v55  ;;  %v3699_v57 = vmul.f32 %v3698_v43, %v6761_v15 }
 0xebf   :  { %v3684_v56 = vmul.f32 %v3683_v2, %v3659_v52  ;;  %v4843_v28 = vpop.eup %4842  ;;  %v3737_v58 = vmul.f32 %v3736_v44, %v6801_v55 }
 0xec0   :  { %v3711_v21 = vmul.f32 %v4843_v28, %v3709_v39  ;;  %v3749_v62 = vadd.f32 1.0, %v3748_v31  ;;  %vm3716_vm11 = vweird.f32 %v4843_v28 }
 0xec1   :  { %v4562_v37 = vclamps-f32 %v3684_v56, 1.0  ;;  %vm3717_vm14 = vmor %vm3715_vm13, %vm3716_vm11  ;;  %v3738_v12 = vadd.f32 1.1283791, %v3737_v58 }
 0xec2   :  { %v3712_v7 = vsub.f32 1.0, %v3711_v21  ;;  %4844 = vrcp.f32 %v3749_v62  ;;  %v3761_v17 = vand.u32 2147483648, %v3749_v62  ;;  %v3759_v23 = vand.u32 2147483647, %v3749_v62 }
 0xec3   :  { %v3811_v63 = vadd.f32 1.0, %v4562_v37  ;;  %vm3755_vm1 = vweird.f32 %v3749_v62  ;;  %v3739_v34 = vmul.f32 %v3738_v12, %v6789_v38 }
 0xec4   :  { %v3713_v18 = vmul.f32 %v4843_v28, %v3712_v7  ;;  %v3762_v5 = vor.u32 1.1754944e-38, %v3761_v17  ;;  %vm3760_vm5 = vcmp.eq.f32.partialorder %v3759_v23, 8.507059e+37 }
 0xec5   :  { %v3819_v26 = vmul.f32 %v3811_v63, %v3475_v53 }
 0xec6   :  { %v3714_v60 = vadd.f32 %v4843_v28, %v3713_v18 }
 0xec7   :  { %4570 = vmatmul.msk.f32.gmra.mxu2 %vm2115_vm12, %v3819_v26 }
 0xec8   :  { %v3718_v59 = vsel %vm3717_vm14, %v4843_v28, %v3714_v60  ;;  %v4845_v27 = vpop.eup %4844 }
 0xec9   :  { %v3723_v22 = vsel %vm3720_vm15, %v3722_v8, %v3718_v59  ;;  %v3751_v54 = vmul.f32 %v4845_v27, %v3749_v62  ;;  %vm3756_vm0 = vweird.f32 %v4845_v27 }
 0xeca   :  { %v3724_v19 = vmul.f32 %v3723_v22, %v3699_v57  ;;  %vm3757_vm3 = vmor %vm3755_vm1, %vm3756_vm0 }
 0xecb   :  { %v3752_v20 = vsub.f32 1.0, %v3751_v54 }
 0xecc   :  { %v4563_v45 = vclamps-f32 %v3724_v19, 1.0 }
 0xecd   :  { %v3753_v13 = vmul.f32 %v4845_v27, %v3752_v20 }
 0xece   :  { %v3812_v41 = vadd.f32 1.0, %v4563_v45 }
 0xecf   :  { %v3754_v15 = vadd.f32 %v4845_v27, %v3753_v13 }
 0xed0   :  { %v3820_v39 = vmul.f32 %v3812_v41, %v3476_v46 }
 0xed1   :  { %v3758_v55 = vsel %vm3757_vm3, %v4845_v27, %v3754_v15 }
 0xed2   :  { %4571 = vmatmul.msk.f32.gmra.mxu2 %vm2115_vm12, %v3820_v39  ;;  %v3763_v42 = vsel %vm3760_vm5, %v3762_v5, %v3758_v55  ;;  %v6838_v5 = vld [vmem:[#allocation2 + $0xa0] sm:$0xff] }
 0xed3   :  { %v3764_v61 = vmul.f32 %v3763_v42, %v3739_v34  ;;  %v3831_v34 = vperm.slane %v6838_v5, 3 }
 0xed5   :  { %v4564_v1 = vclamps-f32 %v3764_v61, 1.0 }
 0xed7   :  { %v3813_v35 = vadd.f32 1.0, %v4564_v1 }
 0xed9   :  { %v3821_v50 = vmul.f32 %v3813_v35, %v3477_v40 }
 0xedb   :  { %4572 = vmatmul.msk.f32.gmra.mxu2 %vm2115_vm12, %v3821_v50 }
 0xeee   :  { %v3468_v24 = vpop.f32.mrf.mxu1 }
 0xeef   :  { %v3469_v30 = vadd.f32 %v6648_v11, %v3468_v24 }
 0xef1   :  { %v3486_v52 = vmul.f32 0.70710677, %v3469_v30  ;;  %v3478_v46 = vmul.f32 0.5, %v3469_v30 }
 0xef3   :  { %v3767_v0 = vmul.f32 %v3486_v52, %v3486_v52 }
 0xef5   :  { %v3768_v29 = vmin.f32 %v3767_v0, 16.0 }
 0xef7   :  { %v3769_v38 = vmul.f32 2.1237322e-06, %v3768_v29  ;;  %v3780_v2 = vmul.f32 3.8918573e-05, %v3768_v29 }
 0xef9   :  { %v3770_v36 = vadd.f32 0.00028619796, %v3769_v38  ;;  %v3781_v56 = vadd.f32 0.001143296, %v3780_v2 }
 0xefb   :  { %v3771_v31 = vmul.f32 %v3770_v36, %v3768_v29  ;;  %v3782_v28 = vmul.f32 %v3781_v56, %v3768_v29 }
 0xefd   :  { %v3783_v32 = vadd.f32 0.014752088, %v3782_v28  ;;  %v3772_v37 = vadd.f32 0.0036580483, %v3771_v31 }
 0xeff   :  { %v3784_v21 = vmul.f32 %v3783_v32, %v3768_v29  ;;  %v3773_v9 = vmul.f32 %v3772_v37, %v3768_v29 }
 0xf01   :  { %v3785_v6 = vadd.f32 0.112945676, %v3784_v21  ;;  %v3774_v63 = vadd.f32 0.05243302, %v3773_v9 }
 0xf03   :  { %v3786_v62 = vmul.f32 %v3785_v6, %v3768_v29  ;;  %v3775_v11 = vmul.f32 %v3774_v63, %v3768_v29 }
 0xf05   :  { %v3787_v53 = vadd.f32 0.4994258, %v3786_v62  ;;  %v3776_v10 = vadd.f32 0.18741608, %v3775_v11 }
 0xf07   :  { %v3788_v7 = vmul.f32 %v3787_v53, %v3768_v29  ;;  %v3777_v18 = vmul.f32 %v3776_v10, %v3768_v29 }
 0xf09   :  { %v3789_v43 = vadd.f32 1.0, %v3788_v7  ;;  %v3778_v8 = vadd.f32 1.1283791, %v3777_v18 }
 0xf0b   :  { %4846 = vrcp.f32 %v3789_v43  ;;  %v3801_v60 = vand.u32 2147483648, %v3789_v43  ;;  %v3799_v59 = vand.u32 2147483647, %v3789_v43  ;;  %vm3795_vm7 = vweird.f32 %v3789_v43 }
 0xf0c   :  { %v3779_v58 = vmul.f32 %v3778_v8, %v3486_v52 }
 0xf0d   :  { %v3802_v22 = vor.u32 1.1754944e-38, %v3801_v60  ;;  %vm3800_vm10 = vcmp.eq.f32.partialorder %v3799_v59, 8.507059e+37 }
 0xf11   :  { %v4847_v26 = vpop.eup %4846 }
 0xf12   :  { %v3791_v48 = vmul.f32 %v4847_v26, %v3789_v43  ;;  %vm3796_vm6 = vweird.f32 %v4847_v26 }
 0xf13   :  { %vm3797_vm8 = vmor %vm3795_vm7, %vm3796_vm6 }
 0xf14   :  { %v3792_v44 = vsub.f32 1.0, %v3791_v48 }
 0xf16   :  { %v3793_v57 = vmul.f32 %v4847_v26, %v3792_v44 }
 0xf18   :  { %v3794_v27 = vadd.f32 %v4847_v26, %v3793_v57 }
 0xf1a   :  { %v3798_v19 = vsel %vm3797_vm8, %v4847_v26, %v3794_v27 }
 0xf1b   :  { %v3803_v54 = vsel %vm3800_vm10, %v3802_v22, %v3798_v19 }
 0xf1c   :  { %v3804_v45 = vmul.f32 %v3803_v54, %v3779_v58 }
 0xf1e   :  { %v4565_v20 = vclamps-f32 %v3804_v45, 1.0 }
 0xf20   :  { %v3814_v12 = vadd.f32 1.0, %v4565_v20 }
 0xf22   :  { %v3822_v17 = vmul.f32 %v3814_v12, %v3478_v46 }
 0xf24   :  { %4573 = vmatmul.msk.f32.gmra.mxu2 %vm2115_vm12, %v3822_v17  ;;  %v3873_v41 = vpop.f32.mrf.mxu2 }
 0xf2d   :  { %v3876_v13 = vpop.f32.mrf.mxu2 }
 0xf36   :  { %v3879_v23 = vpop.f32.mrf.mxu2 }
 0xf37   :  { %v3880_v1 = vadd.f32 %v3879_v23, %v3831_v34 }
 0xf39   :  { %v3899_v35 = vadd.f32 %v3880_v1, %v6611_v49 }
 0xf3b   :  { %v3911_v52 = vsel %vm386_vm4, %v3899_v35, 0.0 }
 0xf3e   :  { %v3882_v39 = vpop.f32.mrf.mxu2 }
 0xf3f   :  { %v3883_v0 = vadd.f32 %v3882_v39, %v3831_v34 }
 0xf41   :  { %v3900_v38 = vadd.f32 %v3883_v0, %v6619_v4  ;;  %v3877_v4 = vadd.f32 %v3876_v13, %v3831_v34 }
 0xf43   :  { %v3914_v2 = vsel %vm386_vm4, %v3900_v38, 0.0  ;;  %v3898_v6 = vadd.f32 %v3877_v4, %v6603_v25 }
 0xf4a   :  { %v3885_v15 = vpop.f32.mrf.mxu2 }
 0xf4b   :  { %v3886_v28 = vadd.f32 %v3885_v15, %v3831_v34 }
 0xf4d   :  { %v3901_v37 = vadd.f32 %v3886_v28, %v6626_v51 }
 0xf4f   :  { %v3917_v21 = vsel %vm386_vm4, %v3901_v37, 0.0 }
 0xf55   :  { %v3888_v55 = vpop.f32.mrf.mxu2 }
 0xf56   :  { %v3889_v42 = vadd.f32 %v3888_v55, %v3831_v34 }
 0xf58   :  { %v3902_v61 = vadd.f32 %v3889_v42, %v6633_v14  ;;  %v3874_v14 = vadd.f32 %v3873_v41, %v3831_v34 }
 0xf5a   :  { %v3920_v40 = vsel %vm386_vm4, %v3902_v61, 0.0  ;;  %v3897_v36 = vadd.f32 %v3874_v14, %v6595_v16  ;;  %v3908_v16 = vsel %vm386_vm4, %v3898_v6, 0.0 }
 0xf5b   :  { %3921 = vadd.xlane.f32.xlu1 %v3920_v40 }
 0xf5c   :  { %v3905_v49 = vsel %vm386_vm4, %v3897_v36, 0.0 }
 0xf5e   :  { %v3891_v50 = vpop.f32.mrf.mxu2 }
 0xf5f   :  { %v3892_v24 = vadd.f32 %v3891_v50, %v3831_v34 }
 0xf61   :  { %v3903_v30 = vadd.f32 %v3892_v24, %v6640_v33 }
 0xf63   :  { %3912 = vadd.xlane.f32.xlu1 %v3911_v52  ;;  %v3923_v29 = vsel %vm386_vm4, %v3903_v30, 0.0 }
 0xf64   :  { %3924 = vadd.xlane.f32.xlu0 %v3923_v29 }
 0xf6c   :  { %3915 = vadd.xlane.f32.xlu0 %v3914_v2 }
 0xf74   :  { %3906 = vadd.xlane.f32.xlu0 %v3905_v49 }
 0xfa7   :  { %v3894_v56 = vpop.f32.mrf.mxu2 }
 0xfa8   :  { %v3895_v33 = vadd.f32 %v3894_v56, %v3831_v34 }
 0xfaa   :  { %v3904_v31 = vadd.f32 %v3895_v33, %v6659_v47 }
 0xfac   :  { %v3926_v32 = vsel %vm386_vm4, %v3904_v31, 0.0 }
 0xfad   :  { %3927 = vadd.xlane.f32.xlu2 %v3926_v32 }
 0xfb5   :  { %3918 = vadd.xlane.f32.xlu2 %v3917_v21 }
 0xfbd   :  { %3909 = vadd.xlane.f32.xlu2 %v3908_v16 }
 0xfce   :  { %v3922_v9 = vpop.xlane.xlu1 %3921 }
 0xfcf   :  { %v3934_v62 = vmul.f32 %v3922_v9, %v7056_v3 }
 0xfd1   :  { %v6858_v53 = vsub.f32 %v3902_v61, %v3934_v62 }
 0xfd3   :  { %v3950_v47 = vmul.f32 %v6858_v53, %v6858_v53 }
 0xfd5   :  { %v3968_v63 = vsel %vm386_vm4, %v3950_v47, 0.0 }
 0xfd6   :  { %3969 = vadd.xlane.f32.xlu0 %v3968_v63  ;;  %v3913_v51 = vpop.xlane.xlu1 %3912 }
 0xfd7   :  { %v3931_v7 = vmul.f32 %v3913_v51, %v7056_v3  ;;  %v3925_v43 = vpop.xlane.xlu0 %3924 }
 0xfd8   :  { %v3935_v25 = vmul.f32 %v3925_v43, %v7056_v3 }
 0xfd9   :  { %v6865_v11 = vsub.f32 %v3899_v35, %v3931_v7 }
 0xfda   :  { %v6867_v10 = vsub.f32 %v3903_v30, %v3935_v25 }
 0xfdb   :  { %v3947_v26 = vmul.f32 %v6865_v11, %v6865_v11 }
 0xfdc   :  { %v3951_v18 = vmul.f32 %v6867_v10, %v6867_v10 }
 0xfdd   :  { %v3959_v48 = vsel %vm386_vm4, %v3947_v26, 0.0 }
 0xfde   :  { %3960 = vadd.xlane.f32.xlu0 %v3959_v48  ;;  %v3971_v44 = vsel %vm386_vm4, %v3951_v18, 0.0 }
 0xfdf   :  { %v3916_v60 = vpop.xlane.xlu0 %3915  ;;  %3972 = vadd.xlane.f32.xlu2 %v3971_v44 }
 0xfe0   :  { %v3932_v8 = vmul.f32 %v3916_v60, %v7056_v3 }
 0xfe2   :  { %v6876_v57 = vsub.f32 %v3900_v38, %v3932_v8 }
 0xfe4   :  { %v3948_v59 = vmul.f32 %v6876_v57, %v6876_v57 }
 0xfe6   :  { %v3962_v27 = vsel %vm386_vm4, %v3948_v59, 0.0 }
 0xfe7   :  { %v3907_v22 = vpop.xlane.xlu0 %3906  ;;  %3963 = vadd.xlane.f32.xlu2 %v3962_v27 }
 0xfe8   :  { %v3929_v58 = vmul.f32 %v3907_v22, %v7056_v3 }
 0xfea   :  { %v6882_v19 = vsub.f32 %v3897_v36, %v3929_v58 }
 0xfec   :  { %v3945_v54 = vmul.f32 %v6882_v19, %v6882_v19 }
 0xfee   :  { %v3953_v45 = vsel %vm386_vm4, %v3945_v54, 0.0 }
 0xfef   :  { %3954 = vadd.xlane.f32.xlu2 %v3953_v45 }
0x1020   :  { %v3928_v20 = vpop.xlane.xlu2 %3927 }
0x1021   :  { %v3936_v46 = vmul.f32 %v3928_v20, %v7056_v3 }
0x1023   :  { %v6888_v12 = vsub.f32 %v3904_v31, %v3936_v46 }
0x1025   :  { %v3952_v17 = vmul.f32 %v6888_v12, %v6888_v12 }
0x1027   :  { %v3974_v41 = vsel %vm386_vm4, %v3952_v17, 0.0 }
0x1028   :  { %3975 = vadd.xlane.f32.xlu1 %v3974_v41  ;;  %v3919_v13 = vpop.xlane.xlu2 %3918 }
0x1029   :  { %v3933_v23 = vmul.f32 %v3919_v13, %v7056_v3 }
0x102b   :  { %v6894_v39 = vsub.f32 %v3901_v37, %v3933_v23 }
0x102d   :  { %v3949_v15 = vmul.f32 %v6894_v39, %v6894_v39 }
0x102f   :  { %v3965_v34 = vsel %vm386_vm4, %v3949_v15, 0.0 }
0x1030   :  { %3966 = vadd.xlane.f32.xlu1 %v3965_v34  ;;  %v3910_v55 = vpop.xlane.xlu2 %3909 }
0x1031   :  { %v3930_v42 = vmul.f32 %v3910_v55, %v7056_v3 }
0x1033   :  { %v6900_v61 = vsub.f32 %v3898_v6, %v3930_v42  ;;  %v7068_v42 = vmov 0.0  }
0x1035   :  { %v3946_v1 = vmul.f32 %v6900_v61, %v6900_v61 }
0x1037   :  { %v3956_v40 = vsel %vm386_vm4, %v3946_v1, 0.0 }
0x1038   :  { %3957 = vadd.xlane.f32.xlu1 %v3956_v40 }
0x1049   :  { %v3970_v50 = vpop.xlane.xlu0 %3969 }
0x104a   :  { %v3982_v30 = vmul.f32 %v3970_v50, %v7056_v3 }
0x104c   :  { %v3990_v29 = vadd.f32 1e-12, %v3982_v30 }
0x104e   :  { %vm4049_vm14 = vweird.f32 %v3990_v29 }
0x1051   :  { %v3961_v38 = vpop.xlane.xlu0 %3960 }
0x1052   :  { %v3973_v35 = vpop.xlane.xlu2 %3972  ;;  %v3979_v2 = vmul.f32 %v3961_v38, %v7056_v3 }
0x1053   :  { %v3983_v24 = vmul.f32 %v3973_v35, %v7056_v3 }
0x1054   :  { %v6913_v33 = vadd.f32 1e-12, %v3979_v2 }
0x1055   :  { %v3991_v0 = vadd.f32 1e-12, %v3983_v24 }
0x1056   :  { %vm4019_vm8 = vweird.f32 %v6913_v33 }
0x1057   :  { %4848 = vrsqrt.f32 %v3991_v0  ;;  %vm4059_vm11 = vweird.f32 %v3991_v0 }
0x1058   :  { %4850 = vrsqrt.f32 %v3990_v29 }
0x105a   :  { %v3964_v52 = vpop.xlane.xlu2 %3963 }
0x105b   :  { %v3980_v14 = vmul.f32 %v3964_v52, %v7056_v3 }
0x105d   :  { %v6909_v36 = vadd.f32 1e-12, %v3980_v14  ;;  %v6911_v56 = vpop.eup %4848 }
0x105e   :  { %v6915_v31 = vpop.eup %4850  ;;  %v4054_v32 = vmul.f32 %v6911_v56, %v3991_v0  ;;  %vm4060_vm9 = vweird.f32 %v6911_v56 }
0x105f   :  { %4852 = vrsqrt.f32 %v6909_v36  ;;  %v4044_v37 = vmul.f32 %v6915_v31, %v3990_v29  ;;  %vm4050_vm2 = vweird.f32 %v6915_v31  ;;  %vm6950_vm13 = vmor %vm4059_vm11, %vm4060_vm9  ;;  %vm4029_vm7 = vweird.f32 %v6909_v36 }
0x1060   :  { %4854 = vrsqrt.f32 %v6913_v33  ;;  %v4055_v6 = vmul.f32 %v6911_v56, %v4054_v32  ;;  %vm6958_vm15 = vmor %vm4049_vm14, %vm4050_vm2 }
0x1061   :  { %v4045_v62 = vmul.f32 %v6915_v31, %v4044_v37 }
0x1062   :  { %v3955_v49 = vpop.xlane.xlu2 %3954  ;;  %v4056_v51 = vmul.f32 0.5, %v4055_v6 }
0x1063   :  { %v3977_v28 = vmul.f32 %v3955_v49, %v7056_v3  ;;  %v4046_v43 = vmul.f32 0.5, %v4045_v62 }
0x1064   :  { %v4057_v18 = vsub.f32 1.5, %v4056_v51 }
0x1065   :  { %v6922_v4 = vadd.f32 1e-12, %v3977_v28  ;;  %v6926_v9 = vpop.eup %4852  ;;  %v4047_v59 = vsub.f32 1.5, %v4046_v43 }
0x1066   :  { %v6930_v63 = vpop.eup %4854  ;;  %v4024_v7 = vmul.f32 %v6926_v9, %v6909_v36  ;;  %v4058_v54 = vmul.f32 %v6911_v56, %v4057_v18  ;;  %vm4030_vm3 = vweird.f32 %v6926_v9 }
0x1067   :  { %4856 = vrsqrt.f32 %v6922_v4  ;;  %v4014_v25 = vmul.f32 %v6930_v63, %v6913_v33  ;;  %v4048_v17 = vmul.f32 %v6915_v31, %v4047_v59  ;;  %vm4020_vm6 = vweird.f32 %v6930_v63  ;;  %vm6979_vm10 = vmor %vm4029_vm7, %vm4030_vm3 }
0x1068   :  { %v4025_v60 = vmul.f32 %v6926_v9, %v4024_v7  ;;  %v4062_v34 = vsel %vm6950_vm13, %v6911_v56, %v4058_v54  ;;  %vm6987_vm2 = vmor %vm4019_vm8, %vm4020_vm6  ;;  %vm4197_vm8 = vcmask 64512  }
0x1069   :  { %v4015_v22 = vmul.f32 %v6930_v63, %v4014_v25  ;;  %v4052_v24 = vsel %vm6958_vm15, %v6915_v31, %v4048_v17  ;;  %v4079_v29 = vmul.f32 %v4062_v34, %v6867_v10  ;;  %v4081_v31 = vperm.slane %v6838_v5, 4 }
0x106a   :  { %v4026_v45 = vmul.f32 0.5, %v4025_v60  ;;  %v4078_v28 = vmul.f32 %v4052_v24, %v6858_v53  ;;  %vm3999_vm15 = vweird.f32 %v6922_v4  ;;  %v4158_v24 = vld [vmem:[#allocation2 + $0x1a0] sm:$0xff] }
0x106b   :  { %v4016_v13 = vmul.f32 0.5, %v4015_v22  ;;  %v4088_v6 = vmul.f32 %v4081_v31, %v4079_v29 }
0x106c   :  { %v4027_v1 = vsub.f32 1.5, %v4026_v45  ;;  %v4087_v51 = vmul.f32 %v4081_v31, %v4078_v28 }
0x106d   :  { %v6937_v44 = vpop.eup %4856  ;;  %v4017_v52 = vsub.f32 1.5, %v4016_v13 }
0x106e   :  { %v3994_v20 = vmul.f32 %v6937_v44, %v6922_v4  ;;  %v4028_v38 = vmul.f32 %v6926_v9, %v4027_v1  ;;  %vm4000_vm14 = vweird.f32 %v6937_v44  ;;  %v7066_v4 = vld [vmem:[#allocation14_spill] sm:$0xff] }
0x106f   :  { %v4018_v32 = vmul.f32 %v6930_v63, %v4017_v52  ;;  %v4099_v17 = vshll.u32 %v7066_v4, 3  ;;  %v4156_v52 = vld [vmem:[#allocation2 + $0x190] sm:$0xff]  ;;  %v4183_v28 = vand.u32 3, %v7066_v4 }
0x1070   :  { %v3995_v40 = vmul.f32 %v6937_v44, %v3994_v20  ;;  %v4032_v53 = vsel %vm6979_vm10, %v6926_v9, %v4028_v38 }
0x1071   :  { %v4022_v7 = vsel %vm6987_vm2, %v6930_v63, %v4018_v32  ;;  %v4076_v25 = vmul.f32 %v4032_v53, %v6876_v57  ;;  %v4875_v53 = vld [vmem:[%s7031_s0] sm:$0xff]  ;;  %s4991_s0 = smov [#allocation8]  }
0x1072   :  { %v3996_v14 = vmul.f32 0.5, %v3995_v40  ;;  %v4075_v63 = vmul.f32 %v4022_v7, %v6865_v11  ;;  %v4129_v40 = vld [vmem:[#allocation2 + $0x180] sm:$0xff]  ;;  %s4284_s19 = sshll.u32 %s4991_s0, 4  ;;  %s4285_s19 = int_to_ptr.vmem [resolvable:$true] %s4284_s19 }
0x1073   :  { %v4085_v22 = vmul.f32 %v4081_v31, %v4076_v25 }
0x1074   :  { %v4084_v45 = vmul.f32 %v4081_v31, %v4075_v63 }
0x109b   :  { %v3976_v21 = vpop.xlane.xlu1 %3975 }
0x109c   :  { %v3984_v16 = vmul.f32 %v3976_v21, %v7056_v3  ;;  %v4090_v21 = vperm.slane %v6838_v5, 5 }
0x109e   :  { %v3992_v47 = vadd.f32 1e-12, %v3984_v16  ;;  %v3997_v16 = vsub.f32 1.5, %v3996_v14  ;;  %v4097_v9 = vadd.f32 %v4090_v21, %v4088_v6  ;;  %v4096_v60 = vadd.f32 %v4090_v21, %v4087_v51 }
0x109f   :  { %v4093_v41 = vadd.f32 %v4090_v21, %v4084_v45  ;;  %v4990_v6 = vmov 2  }
0x10a0   :  { %4858 = vrsqrt.f32 %v3992_v47  ;;  %vm4069_vm1 = vweird.f32 %v3992_v47  ;;  %4618 = vset.pattern.permute.xlu2 %v4990_v6 }
0x10a1   :  { %4224 = vperm.xlu2 %4618, %v4875_v53  }
0x10a3   :  { %v3967_v26 = vpop.xlane.xlu1 %3966 }
0x10a4   :  { %v3981_v48 = vmul.f32 %v3967_v26, %v7056_v3  ;;  %v3998_v26 = vmul.f32 %v6937_v44, %v3997_v16 }
0x10a6   :  { %v4859_v8 = vpop.eup %4858  ;;  %v6940_v27 = vadd.f32 1e-12, %v3981_v48 }
0x10a7   :  { %v4064_v58 = vmul.f32 %v4859_v8, %v3992_v47  ;;  %vm4070_vm0 = vweird.f32 %v4859_v8 }
0x10a8   :  { %4860 = vrsqrt.f32 %v6940_v27  ;;  %vm4071_vm5 = vmor %vm4069_vm1, %vm4070_vm0  ;;  %vm4039_vm11 = vweird.f32 %v6940_v27 }
0x10a9   :  { %v4065_v46 = vmul.f32 %v4859_v8, %v4064_v58  ;;  %vm4001_vm0 = vmor %vm3999_vm15, %vm4000_vm14 }
0x10aa   :  { %v4002_v57 = vsel %vm4001_vm0, %v6937_v44, %v3998_v26 }
0x10ab   :  { %v4066_v23 = vmul.f32 0.5, %v4065_v46  ;;  %v3958_v15 = vpop.xlane.xlu1 %3957  ;;  %v4073_v11 = vmul.f32 %v4002_v57, %v6882_v19  ;;  %v4128_v19 = vld [vmem:[#allocation2 + $0x178] sm:$0xff] }
0x10ac   :  { %v3978_v55 = vmul.f32 %v3958_v15, %v7056_v3  ;;  %v7067_v15 = vld [vmem:[#allocation15_spill] sm:$0xff] }
0x10ad   :  { %v4067_v35 = vsub.f32 1.5, %v4066_v23  ;;  %v4082_v23 = vmul.f32 %v4081_v31, %v4073_v11  ;;  %vm4100_vm6 = vcmp.eq.s32.totalorder %v7067_v15, %v4099_v17  ;;  %v4187_v32 = vshra.s32 %v7067_v15, 2 }
0x10ae   :  { %v4861_v50 = vpop.eup %4860  ;;  %v3986_v30 = vadd.f32 1e-12, %v3978_v55  ;;  %v4574_v1 = vsel %vm4100_vm6, 1.0, %v7068_v42 }
0x10af   :  { %v4068_v0 = vmul.f32 %v4859_v8, %v4067_v35  ;;  %v4034_v3 = vmul.f32 %v4861_v50, %v6940_v27  ;;  %vm4040_vm9 = vweird.f32 %v4861_v50  ;;  %v4091_v55 = vadd.f32 %v4090_v21, %v4082_v23  ;;  %v4127_v35 = vld [vmem:[#allocation2 + $0x170] sm:$0xff] }
0x10b0   :  { %4862 = vrsqrt.f32 %v3986_v30  ;;  %vm4041_vm13 = vmor %vm4039_vm11, %vm4040_vm9  ;;  %vm4009_vm3 = vweird.f32 %v3986_v30  ;;  %vm4188_vm7 = vcmp.eq.s32.totalorder %v4187_v32, %v7066_v4  ;;  %vm4246_vm9 = vcmask 1024  }
0x10b1   :  { %v4072_v2 = vsel %vm4071_vm5, %v4859_v8, %v4068_v0  ;;  %v4035_v49 = vmul.f32 %v4861_v50, %v4034_v3  ;;  %v4155_v0 = vld [vmem:[#allocation2 + $0x188] sm:$0xff]  ;;  %v4874_v3 = vld [vmem:[#allocation2 + $0x90] sm:$0xff]  ;;  %vm4266_vm11 = vcmask 0  }
0x10b2   :  { %v4080_v56 = vmul.f32 %v4072_v2, %v6888_v12  ;;  %v4130_v29 = vperm.slane %v4874_v3, 2 }
0x10b3   :  { %v4036_v37 = vmul.f32 0.5, %v4035_v49  ;;  %v4159_v49 = vperm.slane %v4874_v3, 3 }
0x10b4   :  { %v4089_v12 = vmul.f32 %v4081_v31, %v4080_v56 }
0x10b5   :  { %v4037_v62 = vsub.f32 1.5, %v4036_v37 }
0x10b6   :  { %v4863_v36 = vpop.eup %4862  ;;  %v4098_v47 = vadd.f32 %v4090_v21, %v4089_v12 }
0x10b7   :  { %v4038_v5 = vmul.f32 %v4861_v50, %v4037_v62  ;;  %v4004_v43 = vmul.f32 %v4863_v36, %v3986_v30  ;;  %vm4010_vm1 = vweird.f32 %v4863_v36  ;;  %v4157_v30 = vld [vmem:[#allocation2 + $0x198] sm:$0xff] }
0x10b8   :  { %4114 = vmatpush.msrb.mxu3 %v4098_v47  ;;  %vm4011_vm5 = vmor %vm4009_vm3, %vm4010_vm1 }
0x10b9   :  { %v4042_v18 = vsel %vm4041_vm13, %v4861_v50, %v4038_v5  ;;  %v4005_v48 = vmul.f32 %v4863_v36, %v4004_v43 }
0x10ba   :  { %4115 = vmatpush.msrb.mxu3 %v4097_v9  ;;  %v4077_v8 = vmul.f32 %v4042_v18, %v6894_v39  ;;  %v4094_v39 = vadd.f32 %v4090_v21, %v4085_v22 }
0x10bb   :  { %v4006_v59 = vmul.f32 0.5, %v4005_v48 }
0x10bc   :  { %4116 = vmatpush.msrb.mxu3 %v4096_v60  ;;  %v4086_v27 = vmul.f32 %v4081_v31, %v4077_v8 }
0x10bd   :  { %v4007_v58 = vsub.f32 1.5, %v4006_v59 }
0x10be   :  { %v4095_v54 = vadd.f32 %v4090_v21, %v4086_v27 }
0x10bf   :  { %v4008_v20 = vmul.f32 %v4863_v36, %v4007_v58 }
0x10c0   :  { %4117 = vmatpush.msrb.mxu3 %v4095_v54 }
0x10c1   :  { %v4012_v46 = vsel %vm4011_vm5, %v4863_v36, %v4008_v20 }
0x10c2   :  { %4118 = vmatpush.msrb.mxu3 %v4094_v39  ;;  %v4074_v13 = vmul.f32 %v4012_v46, %v6900_v61  ;;  %v4126_v61 = vld [vmem:[#allocation2 + $0x168] sm:$0xff]  ;;  %v4992_v39 = vmov 2.0  }
0x10c4   :  { %4119 = vmatpush.msrb.mxu3 %v4093_v41  ;;  %v4083_v44 = vmul.f32 %v4081_v31, %v4074_v13 }
0x10c6   :  { %v4092_v34 = vadd.f32 %v4090_v21, %v4083_v44  ;;  %v4579_v21 = vsel %vm4188_vm7, 1.0, %v7068_v42 }
0x10c8   :  { %4120 = vmatpush.msrb.mxu3 %v4092_v34 }
0x10ca   :  { %4121 = vmatpush.msrb.mxu3 %v4091_v55 }
0x10cb   :  { %4575 = vmatmul.msk.f32.vlgmr.msrb.gmra.mxu3 %vm2115_vm12, %v4574_v1  ;;  %vm4184_vm12 = vcmp.eq.s32.totalorder %v4183_v28, %v7067_v15 }
0x10cc   :  { %4146 = vmatpush.msra.mxu3 %v4129_v40  ;;  %v4578_v37 = vsel %vm4184_vm12, 1.0, %v7068_v42 }
0x10ce   :  { %4147 = vmatpush.msra.mxu3 %v4128_v19 }
0x10d0   :  { %4148 = vmatpush.msra.mxu3 %v4127_v35 }
0x10d2   :  { %4149 = vmatpush.msra.mxu3 %v4126_v61 }
0x10d4   :  { %4175 = vmatpush.msrb.mxu3 %v4158_v24 }
0x10d6   :  { %4176 = vmatpush.msrb.mxu3 %v4157_v30 }
0x10d8   :  { %4177 = vmatpush.msrb.mxu3 %v4156_v52 }
0x10da   :  { %4178 = vmatpush.msrb.mxu3 %v4155_v0 }
0x10fb   :  { %v4225_v51 = vpop.permute.xlu2 %4224 }
0x10fc   :  { %vm4226_vm10 = vcmp.eq.s32.totalorder %v7067_v15, %v4225_v51 }
0x10fd   :  { %v4581_v43 = vsel %vm4226_vm10, 1.0, %v7068_v42 }
0x114e   :  { %v4123_v50 = vpop.f32.mrf.mxu3 }
0x114f   :  { %4576 = vmatmul.msk.f32.vlgmr.msra.gmra.mxu3 %vm386_vm4, %v4123_v50 }
0x11d2   :  { %v4151_v38 = vpop.f32.mrf.mxu3 }
0x11d3   :  { %v4152_v14 = vadd.f32 %v4151_v38, %v4130_v29 }
0x11d5   :  { %4864 = vtanh.f32 %v4152_v14 }
0x11db   :  { %v4865_v2 = vpop.eup %4864 }
0x11dc   :  { %4577 = vmatmul.msk.f32.vlgmr.msrb.gmra.mxu3 %vm386_vm4, %v4865_v2  ;;  %vm4221_vm4 = vcmask 25600  }
0x125f   :  { %v4180_v56 = vpop.f32.mrf.mxu3 }
0x1260   :  { %v4181_v31 = vadd.f32 %v4180_v56, %v4159_v49 }
0x1262   :  { %4193 = vperm.xlu0 %4617, %v4181_v31  }
0x126a   :  { %4619 = vset.pattern.permute.xlu0 %v4990_v6 }
0x12d4   :  { %v4194_v10 = vpop.permute.xlu0 %4193 }
0x12d5   :  { %v4196_v12 = vmul.f32 %v4578_v37, %v4194_v10 }
0x12d7   :  { %4216 = vmatpush.msrb.mxu0 %v4196_v12 }
0x12d8   :  { %4580 = vmatmul.msk.f32.vlgmr.msrb.gmra.mxu0 %vm4197_vm8, %v4579_v21 }
0x1355   :  { %v4218_v16 = vpop.f32.mrf.mxu0 }
0x1356   :  { %v4229_v62 = vsel %vm4221_vm4, %v4218_v16, -inf  ;;  %4222 = vst.msk [vmem:[#allocation8] sm:$0x3] %vm4221_vm4, %v4218_v16  ;;  %v4241_v9 = vmul.f32 %v4581_v43, %v4218_v16 }
0x1357   :  { %4230 = vmax.xlane.f32.xlu1 %v4229_v62  ;;  %4289 = dma.vmem_to_hbm [thread:$0]  %s4285_s19, 32, %s4287_s22, [#allocation9]  }
0x1358   :  { %v4242_v25 = vsel %vm4221_vm4, %v4241_v9, 0.0 }
0x13ca   :  { %v4231_v36 = vpop.xlane.xlu1 %4230 }
0x13cb   :  { %v4232_v33 = vsub.f32 %v4218_v16, %v4231_v36 }
0x13cd   :  { %v4233_v47 = vmul.f32 1.442695, %v4232_v33 }
0x13cf   :  { %4866 = vpow2.f32 %v4233_v47 }
0x13d5   :  { %v4867_v7 = vpop.eup %4866 }
0x13d6   :  { %v4235_v5 = vsel %vm4221_vm4, %v4867_v7, 0.0 }
0x13d7   :  { %4236 = vadd.xlane.f32.xlu1 %v4235_v5 }
0x13df   :  { %4243 = vadd.xlane.f32.xlu1 %v4242_v25 }
0x144a   :  { %v4237_v26 = vpop.xlane.xlu1 %4236 }
0x144b   :  { %4868 = vlog2.f32 %v4237_v26 }
0x144c   :  { %4870 = vrcp.f32 %v4992_v39 }
0x1451   :  { %v4869_v18 = vpop.eup %4868 }
0x1452   :  { %v4239_v48 = vmul.f32 0.6931472, %v4869_v18  ;;  %v4244_v8 = vpop.xlane.xlu1 %4243  ;;  %v4871_v11 = vpop.eup %4870 }
0x1453   :  { %v4259_v46 = vmul.f32 2.0, %v4871_v11  ;;  %vm4263_vm2 = vweird.f32 %v4871_v11 }
0x1454   :  { %v4240_v60 = vadd.f32 %v4239_v48, %v4231_v36 }
0x1455   :  { %v4260_v4 = vsub.f32 1.0, %v4259_v46 }
0x1456   :  { %v4245_v63 = vsub.f32 %v4240_v60, %v4244_v8 }
0x1457   :  { %v4261_v17 = vmul.f32 %v4871_v11, %v4260_v4 }
0x1458   :  { %v4247_v59 = vsel %vm4246_vm9, %v4245_v63, 0.0 }
0x1459   :  { %4248 = vadd.xlane.f32.xlu1 %v4247_v59  ;;  %v4262_v41 = vadd.f32 %v4871_v11, %v4261_v17 }
0x145b   :  { %v4264_v13 = vsel %vm4263_vm2, %v4871_v11, %v4262_v41 }
0x14cc   :  { %v4249_v27 = vpop.xlane.xlu1 %4248 }
0x14cd   :  { %v4250_v22 = vrot.slane %v4249_v27, 4 }
0x14cf   :  { %v4251_v57 = vadd.f32 %v4250_v22, %v4249_v27 }
0x14d1   :  { %v4252_v58 = vrot.slane %v4251_v57, 2 }
0x14d3   :  { %v4253_v54 = vadd.f32 %v4252_v58, %v4251_v57 }
0x14d5   :  { %v4254_v45 = vrot.slane %v4253_v54, 1 }
0x14d7   :  { %v4255_v20 = vadd.f32 %v4254_v45, %v4253_v54 }
0x14d9   :  { %4588 = vpush %v4255_v20 }
0x150a   :  { %s4589_s26 = spop %4588 }
0x150b   :  { %v4257_v44 = vstv %s4589_s26 }
0x150c   :  { %v4265_v23 = vmul.f32 %v4264_v13, %v4257_v44 }
0x150e   :  { %4267 = vst.msk [vmem:[#allocation7] sm:$0x1] %vm4266_vm11, %v4265_v23 }
0x150f   :  { %4278 = dma.vmem_to_hbm [thread:$0]  %s4274_s23, 16, %s4276_s25, [#allocation4]  }
0x1510   :  { %4976 = dma.done.wait [#allocation4], 16  }
0x1511   :  { %4977 = vsyncadd [#allocation4], 4294967280 }
0x1512   :  { %4978 = dma.done.wait [#allocation9], 32  }
0x1513   :  { %4979 = vsyncadd [#allocation9], 4294967264 }
0x1514   :  { %4298 = vsyncpa [#allocation3], 1 }
0x1515   :  { %4299 = vsyncpa [#allocation6], 1 }
0x1516   :  { %4300 = vsyncpa [#allocation4], 1 }
0x1517   :  { %4301 = vsyncpa [#allocation9], 1 }

</bundles_post_ra>
